<compile_context>
chip_gen: v6e
topology: v6e:2x2x1
jax: 0.10.0
libtpu: 0.0.40
codegen_flags: <defaults>
</compile_context>

<pallas_src>
import functools

import jax
import jax.numpy as jnp
from jax.experimental import pallas as pl
from jax.experimental.pallas import tpu as pltpu

LN_EPS = 0.001  # RMSNorm eps inside Merge.feature_mlp (MLP_RMSNorm default)


# --------------------------------------------------------------------------- #
# Kernel
# --------------------------------------------------------------------------- #
def _ffn_resblock_kernel(x_ref, h_ref,
                         wg_ref, bg_ref,        # gate_mlp Linear   (W bf16, b f32)
                         wf_ref, bf_ref,        # feature_mlp Linear
                         rmsw_ref,              # feature_mlp RMSNorm weight (f32)
                         wo_ref, bo_ref,        # final MLP Linear
                         out_ref, xm_ref,
                         *, ew_dtype):
    """One batch tile: folded gate matmul + feature MLP + merge + output Linear."""
    x = x_ref[...]                               # (TB, D) bf16
    h = h_ref[...]

    # ---- gate = sigmoid(gate_mlp(X) + gate_mlp(H)) folded into ONE matmul:
    #      sigmoid((x + h) @ Wg + 2*bg)
    gate_pre = jnp.dot(x + h, wg_ref[...], preferred_element_type=jnp.float32)
    gate = jax.nn.sigmoid((gate_pre + 2.0 * bg_ref[...]).astype(ew_dtype))

    # ---- feature_mlp(z) = SiLU(RMSNorm(z @ Wf + bf))
    #      two dots against the resident Wf (no (2*TB, D) concat copy)
    rms_w = rmsw_ref[...].astype(ew_dtype)

    def feature(z):
        y = jnp.dot(z, wf_ref[...], preferred_element_type=jnp.float32) + bf_ref[...]
        ms = jnp.mean(y * y, axis=-1, keepdims=True)              # f32 mean-square
        y = (y * jax.lax.rsqrt(ms + LN_EPS)).astype(ew_dtype) * rms_w
        return y * jax.nn.sigmoid(y)                              # SiLU (ew_dtype)

    fx = feature(x)
    fh = feature(h)

    # ---- Merge:  fx*g + (1-g)*fh  ==  fh + g*(fx - fh)
    xm = (fh + gate * (fx - fh)).astype(jnp.bfloat16)
    xm_ref[...] = xm

    # ---- final MLP (Linear + Identity); reuse the single bf16 xm for the dot
    out = jnp.dot(xm, wo_ref[...], preferred_element_type=jnp.float32) + bo_ref[...]
    out_ref[...] = out.astype(out_ref.dtype)


# --------------------------------------------------------------------------- #
# Wrapper / tiling decisions
# --------------------------------------------------------------------------- #
def _default_elementwise_dtype():
    """bf16 elementwise chain only on chips with bf16 VPU/EUP (v6e, v7x)."""
    kind = jax.devices()[0].device_kind.lower()
    if "v6" in kind or "v7" in kind or "7x" in kind:
        return jnp.bfloat16
    return jnp.float32            # v5e and older: no bf16 VPU/EUP -> keep f32


def _vmem_cap_bytes():
    """Upper bound for vmem_limit_bytes, per generation (v7x has 64 MiB physical)."""
    kind = jax.devices()[0].device_kind.lower()
    if "v7" in kind or "7x" in kind:
        return 56 * 1024 * 1024
    return 100 * 1024 * 1024      # v5e / v6e: 128 MiB physical


def _pick_batch_tile(B, max_tb, min_steps=2):
    """Largest multiple-of-16 divisor of B <= cap; cap chosen so the grid has at
    least `min_steps` steps whenever B allows it (keeps both v7x TCs busy).
    B must already be a multiple of 16 (caller pads)."""
    cap = min(max_tb, B)
    if B // cap < min_steps and B >= 16 * min_steps:
        cap = B // min_steps
    cap = max((cap // 16) * 16, 16)
    for tb in range(cap, 15, -16):
        if B % tb == 0:
            return tb
    return 16


def _res_spec(shape):
    """Resident (constant-index) operand: DMA'd once, single-buffered."""
    idx = lambda i: (0,) * len(shape)
    try:
        return pl.BlockSpec(shape, idx, pipeline_mode=pl.Buffered(1))
    except (TypeError, AttributeError):   # older jax without pipeline_mode support
        return pl.BlockSpec(shape, idx)


def ffn_resblock(x, h, params, *, max_batch_tile=1024):
    """FFN_Resblock forward. x, h: (B, D). Returns (out, merged_x), both bf16.

    Weights in `params` are pre-transposed to (in, out) and bf16; biases f32."""
    orig_B, D = x.shape
    O = params["wo"].shape[1]

    # bf16 streamed activations (min sublane tile is 16) -> pad B to a multiple of 16
    x = x.astype(jnp.bfloat16)
    h = h.astype(jnp.bfloat16)
    pad = (-orig_B) % 16
    if pad:
        x = jnp.pad(x, ((0, pad), (0, 0)))
        h = jnp.pad(h, ((0, pad), (0, 0)))
    B = orig_B + pad

    tb = _pick_batch_tile(B, max_batch_tile)
    grid = (B // tb,)

    act_spec = lambda d: pl.BlockSpec((tb, d), lambda i: (i, 0))   # streamed over batch

    # VMEM budget derived from actual shapes (weights single-buffered, acts x2 buffers)
    needed = (2 * tb * D * 2 * 2                 # x, h tiles, double-buffered, bf16
              + (tb * D + tb * O) * 2 * 2        # xm, out tiles, double-buffered, bf16
              + (2 * D * D + D * O) * 2          # wg, wf, wo resident, single-buffered
              + (3 * D + O) * 4                  # biases + rms weight (f32)
              + 8 * tb * max(D, O) * 4)          # f32 intermediates headroom
    vmem_limit = int(min(_vmem_cap_bytes(), int(needed * 1.25) + (2 << 20)))
    # TODO(synk): for D >~ 2K, add an output-feature (N) tiling grid axis over
    # Wg/Wf/Wo instead of holding the full matrices resident (v7x has 64 MiB VMEM).

    ew_dtype = _default_elementwise_dtype()

    cost = pl.CostEstimate(
        flops=2 * B * D * (3 * D + O),           # gate (1x) + feature (2x) + out
        transcendentals=3 * B * D,               # gate sigmoid + 2x SiLU sigmoid
        bytes_accessed=(2 * B * D * 2            # x, h (bf16)
                        + B * (D + O) * 2        # xm, out (bf16)
                        + (2 * D * D + D * O) * 2
                        + (3 * D + O) * 4),
    )

    out, xm = pl.pallas_call(
        functools.partial(_ffn_resblock_kernel, ew_dtype=ew_dtype),
        out_shape=(jax.ShapeDtypeStruct((B, O), jnp.bfloat16),
                   jax.ShapeDtypeStruct((B, D), jnp.bfloat16)),
        grid=grid,
        in_specs=[act_spec(D), act_spec(D),
                  _res_spec((D, D)), _res_spec((1, D)),
                  _res_spec((D, D)), _res_spec((1, D)),
                  _res_spec((1, D)),
                  _res_spec((D, O)), _res_spec((1, O))],
        out_specs=(act_spec(O), act_spec(D)),
        compiler_params=pltpu.CompilerParams(
            dimension_semantics=("parallel",),   # shard batch across both TCs on v7x
            vmem_limit_bytes=vmem_limit,
        ),
        cost_estimate=cost,
    )(x, h,
      params["wg"], params["bg"],
      params["wf"], params["bf"],
      params["rms_w"],
      params["wo"], params["bo"])

    if pad:
        out, xm = out[:orig_B], xm[:orig_B]
    return out, xm


# --------------------------------------------------------------------------- #
# Params / references
# --------------------------------------------------------------------------- #
def make_params(key, hiddens, out_hiddens, w_dtype=jnp.bfloat16):
    ks = jax.random.split(key, 6)
    std = 0.02
    # weights stored as (in, out) == PyTorch Linear weight transposed; bf16 for the MXU
    return {
        "wg": (jax.random.normal(ks[0], (hiddens, hiddens), jnp.float32) * std).astype(w_dtype),
        "bg": jax.random.normal(ks[1], (1, hiddens), jnp.float32) * std,
        "wf": (jax.random.normal(ks[2], (hiddens, hiddens), jnp.float32) * std).astype(w_dtype),
        "bf": jax.random.normal(ks[3], (1, hiddens), jnp.float32) * std,
        "rms_w": jnp.ones((1, hiddens), jnp.float32),       # RMSNorm weight init = 1
        "wo": (jax.random.normal(ks[4], (hiddens, out_hiddens), jnp.float32) * std).astype(w_dtype),
        "bo": jax.random.normal(ks[5], (1, out_hiddens), jnp.float32) * std,
    }


def _reference(x, h, p, ew_dtype):
    """Pure-JAX reference mirroring the kernel's bf16-matmul / mixed-precision math."""
    xb, hb = x.astype(jnp.bfloat16), h.astype(jnp.bfloat16)
    dot = lambda a, w: jnp.dot(a, w, preferred_element_type=jnp.float32)
    gate = jax.nn.sigmoid((dot(xb + hb, p["wg"]) + 2.0 * p["bg"]).astype(ew_dtype))

    def feature(z):
        y = dot(z, p["wf"]) + p["bf"]
        y = (y * jax.lax.rsqrt(jnp.mean(y * y, -1, keepdims=True) + LN_EPS)
             ).astype(ew_dtype) * p["rms_w"].astype(ew_dtype)
        return y * jax.nn.sigmoid(y)

    fx, fh = feature(xb), feature(hb)
    xm = (fh + gate * (fx - fh)).astype(jnp.bfloat16)
    out = (dot(xm, p["wo"]) + p["bo"]).astype(jnp.bfloat16)
    return out, xm


def _reference_f32_unfused(x, h, p):
    """f32, unfused-gate reference matching the original PyTorch module's math."""
    f32 = lambda a: a.astype(jnp.float32)
    gate = jax.nn.sigmoid((x @ f32(p["wg"]) + p["bg"]) + (h @ f32(p["wg"]) + p["bg"]))

    def feature(z):
        y = z @ f32(p["wf"]) + p["bf"]
        y = y * jax.lax.rsqrt(jnp.mean(y * y, -1, keepdims=True) + LN_EPS) * p["rms_w"]
        return y * jax.nn.sigmoid(y)

    fx, fh = feature(x), feature(h)
    xm = fx * gate + (1.0 - gate) * fh
    out = xm @ f32(p["wo"]) + p["bo"]
    return out, xm


if __name__ == "__main__":
    B, D, O = 256, 256, 256          # small, lane/sublane aligned shapes
    key = jax.random.PRNGKey(0)
    kx, kh, kp = jax.random.split(key, 3)
    x = jax.random.normal(kx, (B, D), jnp.float32)
    h = jax.random.normal(kh, (B, D), jnp.float32)
    params = make_params(kp, D, O)

    # default max_batch_tile -> tile picker caps at B//2, so grid=(2,) and both
    # v7x TensorCores get work (no-op on single-TC v5e/v6e)
    out, xm = ffn_resblock(x, h, params)
    jax.block_until_ready((out, xm))

    out32, xm32 = out.astype(jnp.float32), xm.astype(jnp.float32)

    ew_dtype = _default_elementwise_dtype()
    ref_out, ref_xm = _reference(x, h, params, ew_dtype)
    assert jnp.allclose(out32, ref_out.astype(jnp.float32), atol=2e-2, rtol=2e-2), \
        "output mismatch (kernel-matching reference)"
    assert jnp.allclose(xm32, ref_xm.astype(jnp.float32), atol=2e-2, rtol=2e-2), \
        "merged-X mismatch (kernel-matching reference)"

    # looser check against the true unfused f32 math of the original PyTorch module
    ref_out32, ref_xm32 = _reference_f32_unfused(x, h, params)
    assert jnp.allclose(out32, ref_out32, atol=6e-2, rtol=6e-2), \
        "output mismatch (f32 unfused reference)"
    assert jnp.allclose(xm32, ref_xm32, atol=6e-2, rtol=6e-2), \
        "merged-X mismatch (f32 unfused reference)"

    print("KERNEL_OK")
</pallas_src>

<mosaic_0001>
module attributes {stable_mosaic.version = 11 : i64} {
  func.func @_ffn_resblock_kernel(%arg0: i32, %arg1: memref<128x256xbf16, #tpu.memory_space<vmem>>, %arg2: memref<128x256xbf16, #tpu.memory_space<vmem>>, %arg3: memref<256x256xbf16, #tpu.memory_space<vmem>>, %arg4: memref<1x256xf32, #tpu.memory_space<vmem>>, %arg5: memref<256x256xbf16, #tpu.memory_space<vmem>>, %arg6: memref<1x256xf32, #tpu.memory_space<vmem>>, %arg7: memref<1x256xf32, #tpu.memory_space<vmem>>, %arg8: memref<256x256xbf16, #tpu.memory_space<vmem>>, %arg9: memref<1x256xf32, #tpu.memory_space<vmem>>, %arg10: memref<128x256xbf16, #tpu.memory_space<vmem>>, %arg11: memref<128x256xbf16, #tpu.memory_space<vmem>>) attributes {dimension_semantics = [#tpu.dimension_semantics<parallel>], iteration_bounds = array<i64: 2>, scalar_prefetch = 0 : i64, scratch_operands = 0 : i64, tpu.core_type = #tpu.core_type<tc>, window_params = [{transform_indices = @transform_0, window_bounds = array<i64: 128, 256>}, {transform_indices = @transform_1, window_bounds = array<i64: 128, 256>}, {pipeline_mode = #tpu.pipeline_mode<synchronous>, transform_indices = @transform_2, window_bounds = array<i64: 256, 256>}, {pipeline_mode = #tpu.pipeline_mode<synchronous>, transform_indices = @transform_3, window_bounds = array<i64: 1, 256>}, {pipeline_mode = #tpu.pipeline_mode<synchronous>, transform_indices = @transform_4, window_bounds = array<i64: 256, 256>}, {pipeline_mode = #tpu.pipeline_mode<synchronous>, transform_indices = @transform_5, window_bounds = array<i64: 1, 256>}, {pipeline_mode = #tpu.pipeline_mode<synchronous>, transform_indices = @transform_6, window_bounds = array<i64: 1, 256>}, {pipeline_mode = #tpu.pipeline_mode<synchronous>, transform_indices = @transform_7, window_bounds = array<i64: 256, 256>}, {pipeline_mode = #tpu.pipeline_mode<synchronous>, transform_indices = @transform_8, window_bounds = array<i64: 1, 256>}, {transform_indices = @transform_9, window_bounds = array<i64: 128, 256>}, {transform_indices = @transform_10, window_bounds = array<i64: 128, 256>}]} {
    %c0 = arith.constant 0 : index
    %c0_0 = arith.constant 0 : index
    %0 = vector.load %arg1[%c0, %c0_0] : memref<128x256xbf16, #tpu.memory_space<vmem>>, vector<128x256xbf16>
    %c0_1 = arith.constant 0 : index
    %c0_2 = arith.constant 0 : index
    %1 = vector.load %arg2[%c0_1, %c0_2] : memref<128x256xbf16, #tpu.memory_space<vmem>>, vector<128x256xbf16>
    %2 = arith.addf %0, %1 : vector<128x256xbf16>
    %c0_3 = arith.constant 0 : index
    %c0_4 = arith.constant 0 : index
    %3 = vector.load %arg3[%c0_3, %c0_4] : memref<256x256xbf16, #tpu.memory_space<vmem>>, vector<256x256xbf16>
    %cst = arith.constant dense<0.000000e+00> : vector<128x256xf32>
    %4 = tpu.matmul %2, %3, %cst {dimension_numbers = #tpu.dot_dimension_numbers<[1], [0], [0], [1], [0, 0, 1, 1], [], []>} : vector<128x256xbf16>, vector<256x256xbf16>, vector<128x256xf32> -> vector<128x256xf32>
    %c0_5 = arith.constant 0 : index
    %c0_6 = arith.constant 0 : index
    %5 = vector.load %arg4[%c0_5, %c0_6] : memref<1x256xf32, #tpu.memory_space<vmem>>, vector<1x256xf32>
    %cst_7 = arith.constant 2.000000e+00 : f32
    %6 = vector.broadcast %cst_7 : f32 to vector<1x256xf32>
    %7 = arith.mulf %6, %5 : vector<1x256xf32>
    %8 = vector.broadcast %7 : vector<1x256xf32> to vector<128x256xf32>
    %9 = arith.addf %4, %8 : vector<128x256xf32>
    %10 = arith.negf %9 : vector<128x256xf32>
    %11 = math.exp %10 : vector<128x256xf32>
    %cst_8 = arith.constant 1.000000e+00 : f32
    %12 = vector.broadcast %cst_8 : f32 to vector<128x256xf32>
    %13 = arith.addf %12, %11 : vector<128x256xf32>
    %14 = arith.divf %12, %13 : vector<128x256xf32>
    %c0_9 = arith.constant 0 : index
    %c0_10 = arith.constant 0 : index
    %15 = vector.load %arg7[%c0_9, %c0_10] : memref<1x256xf32, #tpu.memory_space<vmem>>, vector<1x256xf32>
    %c0_11 = arith.constant 0 : index
    %c0_12 = arith.constant 0 : index
    %16 = vector.load %arg5[%c0_11, %c0_12] : memref<256x256xbf16, #tpu.memory_space<vmem>>, vector<256x256xbf16>
    %cst_13 = arith.constant dense<0.000000e+00> : vector<128x256xf32>
    %17 = tpu.matmul %0, %16, %cst_13 {dimension_numbers = #tpu.dot_dimension_numbers<[1], [0], [0], [1], [0, 0, 1, 1], [], []>} : vector<128x256xbf16>, vector<256x256xbf16>, vector<128x256xf32> -> vector<128x256xf32>
    %c0_14 = arith.constant 0 : index
    %c0_15 = arith.constant 0 : index
    %18 = vector.load %arg6[%c0_14, %c0_15] : memref<1x256xf32, #tpu.memory_space<vmem>>, vector<1x256xf32>
    %19 = vector.broadcast %18 : vector<1x256xf32> to vector<128x256xf32>
    %20 = arith.addf %17, %19 : vector<128x256xf32>
    %21 = arith.mulf %20, %20 : vector<128x256xf32>
    %cst_16 = arith.constant dense<0.000000e+00> : vector<128xf32>
    %22 = vector.multi_reduction <add>, %21, %cst_16 [1] : vector<128x256xf32> to vector<128xf32>
    %23 = vector.shape_cast %22 : vector<128xf32> to vector<128x1xf32>
    %cst_17 = arith.constant 2.560000e+02 : f32
    %24 = vector.broadcast %cst_17 : f32 to vector<128x1xf32>
    %25 = arith.divf %23, %24 : vector<128x1xf32>
    %cst_18 = arith.constant 1.000000e-03 : f32
    %26 = vector.broadcast %cst_18 : f32 to vector<128x1xf32>
    %27 = arith.addf %25, %26 : vector<128x1xf32>
    %28 = math.rsqrt %27 : vector<128x1xf32>
    %29 = vector.broadcast %28 : vector<128x1xf32> to vector<128x256xf32>
    %30 = arith.mulf %20, %29 : vector<128x256xf32>
    %31 = vector.broadcast %15 : vector<1x256xf32> to vector<128x256xf32>
    %32 = arith.mulf %30, %31 : vector<128x256xf32>
    %33 = arith.negf %32 : vector<128x256xf32>
    %34 = math.exp %33 : vector<128x256xf32>
    %cst_19 = arith.constant 1.000000e+00 : f32
    %35 = vector.broadcast %cst_19 : f32 to vector<128x256xf32>
    %36 = arith.addf %35, %34 : vector<128x256xf32>
    %37 = arith.divf %35, %36 : vector<128x256xf32>
    %38 = arith.mulf %32, %37 : vector<128x256xf32>
    %c0_20 = arith.constant 0 : index
    %c0_21 = arith.constant 0 : index
    %39 = vector.load %arg5[%c0_20, %c0_21] : memref<256x256xbf16, #tpu.memory_space<vmem>>, vector<256x256xbf16>
    %cst_22 = arith.constant dense<0.000000e+00> : vector<128x256xf32>
    %40 = tpu.matmul %1, %39, %cst_22 {dimension_numbers = #tpu.dot_dimension_numbers<[1], [0], [0], [1], [0, 0, 1, 1], [], []>} : vector<128x256xbf16>, vector<256x256xbf16>, vector<128x256xf32> -> vector<128x256xf32>
    %c0_23 = arith.constant 0 : index
    %c0_24 = arith.constant 0 : index
    %41 = vector.load %arg6[%c0_23, %c0_24] : memref<1x256xf32, #tpu.memory_space<vmem>>, vector<1x256xf32>
    %42 = vector.broadcast %41 : vector<1x256xf32> to vector<128x256xf32>
    %43 = arith.addf %40, %42 : vector<128x256xf32>
    %44 = arith.mulf %43, %43 : vector<128x256xf32>
    %cst_25 = arith.constant dense<0.000000e+00> : vector<128xf32>
    %45 = vector.multi_reduction <add>, %44, %cst_25 [1] : vector<128x256xf32> to vector<128xf32>
    %46 = vector.shape_cast %45 : vector<128xf32> to vector<128x1xf32>
    %cst_26 = arith.constant 2.560000e+02 : f32
    %47 = vector.broadcast %cst_26 : f32 to vector<128x1xf32>
    %48 = arith.divf %46, %47 : vector<128x1xf32>
    %cst_27 = arith.constant 1.000000e-03 : f32
    %49 = vector.broadcast %cst_27 : f32 to vector<128x1xf32>
    %50 = arith.addf %48, %49 : vector<128x1xf32>
    %51 = math.rsqrt %50 : vector<128x1xf32>
    %52 = vector.broadcast %51 : vector<128x1xf32> to vector<128x256xf32>
    %53 = arith.mulf %43, %52 : vector<128x256xf32>
    %54 = vector.broadcast %15 : vector<1x256xf32> to vector<128x256xf32>
    %55 = arith.mulf %53, %54 : vector<128x256xf32>
    %56 = arith.negf %55 : vector<128x256xf32>
    %57 = math.exp %56 : vector<128x256xf32>
    %cst_28 = arith.constant 1.000000e+00 : f32
    %58 = vector.broadcast %cst_28 : f32 to vector<128x256xf32>
    %59 = arith.addf %58, %57 : vector<128x256xf32>
    %60 = arith.divf %58, %59 : vector<128x256xf32>
    %61 = arith.mulf %55, %60 : vector<128x256xf32>
    %62 = arith.subf %38, %61 : vector<128x256xf32>
    %63 = arith.mulf %14, %62 : vector<128x256xf32>
    %64 = arith.addf %61, %63 : vector<128x256xf32>
    %65 = arith.truncf %64 : vector<128x256xf32> to vector<128x256xbf16>
    %c0_29 = arith.constant 0 : index
    %c0_30 = arith.constant 0 : index
    %66 = vector.load %arg11[%c0_29, %c0_30] : memref<128x256xbf16, #tpu.memory_space<vmem>>, vector<128x256xbf16>
    tpu.vector_store %arg11[%c0_29, %c0_30], %65 {strides = array<i32>} : memref<128x256xbf16, #tpu.memory_space<vmem>>, vector<128x256xbf16>,
    %c0_31 = arith.constant 0 : index
    %c0_32 = arith.constant 0 : index
    %67 = vector.load %arg8[%c0_31, %c0_32] : memref<256x256xbf16, #tpu.memory_space<vmem>>, vector<256x256xbf16>
    %cst_33 = arith.constant dense<0.000000e+00> : vector<128x256xf32>
    %68 = tpu.matmul %65, %67, %cst_33 {dimension_numbers = #tpu.dot_dimension_numbers<[1], [0], [0], [1], [0, 0, 1, 1], [], []>} : vector<128x256xbf16>, vector<256x256xbf16>, vector<128x256xf32> -> vector<128x256xf32>
    %c0_34 = arith.constant 0 : index
    %c0_35 = arith.constant 0 : index
    %69 = vector.load %arg9[%c0_34, %c0_35] : memref<1x256xf32, #tpu.memory_space<vmem>>, vector<1x256xf32>
    %70 = vector.broadcast %69 : vector<1x256xf32> to vector<128x256xf32>
    %71 = arith.addf %68, %70 : vector<128x256xf32>
    %72 = arith.truncf %71 : vector<128x256xf32> to vector<128x256xbf16>
    %c0_36 = arith.constant 0 : index
    %c0_37 = arith.constant 0 : index
    %73 = vector.load %arg10[%c0_36, %c0_37] : memref<128x256xbf16, #tpu.memory_space<vmem>>, vector<128x256xbf16>
    tpu.vector_store %arg10[%c0_36, %c0_37], %72 {strides = array<i32>} : memref<128x256xbf16, #tpu.memory_space<vmem>>, vector<128x256xbf16>,
    return
  }
  func.func @transform_0(%arg0: i32) -> (i32, i32) {
    %c0_i32 = arith.constant 0 : i32
    %c0_i32_0 = arith.constant 0 : i32
    return %arg0, %c0_i32 : i32, i32
  }
  func.func @transform_1(%arg0: i32) -> (i32, i32) {
    %c0_i32 = arith.constant 0 : i32
    %c0_i32_0 = arith.constant 0 : i32
    return %arg0, %c0_i32 : i32, i32
  }
  func.func @transform_2(%arg0: i32) -> (i32, i32) {
    %c0_i32 = arith.constant 0 : i32
    %c0_i32_0 = arith.constant 0 : i32
    %c0_i32_1 = arith.constant 0 : i32
    return %c0_i32, %c0_i32_0 : i32, i32
  }
  func.func @transform_3(%arg0: i32) -> (i32, i32) {
    %c0_i32 = arith.constant 0 : i32
    %c0_i32_0 = arith.constant 0 : i32
    %c0_i32_1 = arith.constant 0 : i32
    return %c0_i32, %c0_i32_0 : i32, i32
  }
  func.func @transform_4(%arg0: i32) -> (i32, i32) {
    %c0_i32 = arith.constant 0 : i32
    %c0_i32_0 = arith.constant 0 : i32
    %c0_i32_1 = arith.constant 0 : i32
    return %c0_i32, %c0_i32_0 : i32, i32
  }
  func.func @transform_5(%arg0: i32) -> (i32, i32) {
    %c0_i32 = arith.constant 0 : i32
    %c0_i32_0 = arith.constant 0 : i32
    %c0_i32_1 = arith.constant 0 : i32
    return %c0_i32, %c0_i32_0 : i32, i32
  }
  func.func @transform_6(%arg0: i32) -> (i32, i32) {
    %c0_i32 = arith.constant 0 : i32
    %c0_i32_0 = arith.constant 0 : i32
    %c0_i32_1 = arith.constant 0 : i32
    return %c0_i32, %c0_i32_0 : i32, i32
  }
  func.func @transform_7(%arg0: i32) -> (i32, i32) {
    %c0_i32 = arith.constant 0 : i32
    %c0_i32_0 = arith.constant 0 : i32
    %c0_i32_1 = arith.constant 0 : i32
    return %c0_i32, %c0_i32_0 : i32, i32
  }
  func.func @transform_8(%arg0: i32) -> (i32, i32) {
    %c0_i32 = arith.constant 0 : i32
    %c0_i32_0 = arith.constant 0 : i32
    %c0_i32_1 = arith.constant 0 : i32
    return %c0_i32, %c0_i32_0 : i32, i32
  }
  func.func @transform_9(%arg0: i32) -> (i32, i32) {
    %c0_i32 = arith.constant 0 : i32
    %c0_i32_0 = arith.constant 0 : i32
    return %arg0, %c0_i32 : i32, i32
  }
  func.func @transform_10(%arg0: i32) -> (i32, i32) {
    %c0_i32 = arith.constant 0 : i32
    %c0_i32_0 = arith.constant 0 : i32
    return %arg0, %c0_i32 : i32, i32
  }
}

</mosaic_0001>

<bundles_post_ra>
// kernel: tpu_custom_call.1
= control target key start
LH: loop header
LB: loop body
LE: loop exit
PB: predicated region body
PF: predicated region fallthrough
CT: control target
= control target key end

     0   :  { %s6646_s0 = inlined_call_operand.hbm [shape: bf16[256,256], index: 0, kind: input, shape index: {}]   ;;  %s6647_s1 = inlined_call_operand.hbm [shape: bf16[256,256], index: 1, kind: input, shape index: {}]   ;;  %s6648_s2 = inlined_call_operand.hbm [shape: bf16[256,256], index: 2, kind: input, shape index: {}]   ;;  %s6649_s3 = inlined_call_operand.vmem [shape: f32[1,256], index: 3, kind: input, shape index: {}]   ;;  %s6650_s4 = inlined_call_operand.hbm [shape: bf16[256,256], index: 4, kind: input, shape index: {}]   ;;  %s6651_s5 = inlined_call_operand.vmem [shape: f32[1,256], index: 5, kind: input, shape index: {}]   ;;  %s6652_s6 = inlined_call_operand.vmem [shape: f32[1,256], index: 6, kind: input, shape index: {}]   ;;  %s6653_s7 = inlined_call_operand.hbm [shape: bf16[256,256], index: 7, kind: input, shape index: {}]   ;;  %s6654_s8 = inlined_call_operand.vmem [shape: f32[1,256], index: 8, kind: input, shape index: {}]   ;;  %s6655_s9 = inlined_call_operand.hbm [shape: bf16[256,256], index: 9, kind: output, shape index: {0}]   ;;  %s6656_s10 = inlined_call_operand.hbm [shape: bf16[256,256], index: 10, kind: output, shape index: {1}]  }
   0x1   :  { %6735 = sst [smem:[#allocation99_spill]] %s6646_s0 }
   0x2   :  { %6736 = sst [smem:[#allocation100_spill]] %s6648_s2 }
   0x3   :  { %6737 = sst [smem:[#allocation101_spill]] %s6650_s4 }
   0x4   :  { %6738 = sst [smem:[#allocation102_spill]] %s6653_s7 }
   0x5   :  { %16 = vsyncpa [#allocation3], 0 }
   0x6   :  { %18 = vsyncpa [#allocation3 + $0x1], 0 }
   0x7   :  { %19 = vsyncpa [#allocation6], 0 }
   0x8   :  { %21 = vsyncpa [#allocation6 + $0x1], 0 }
   0x9   :  { %22 = vsyncpa [#allocation9], 0 }
   0xa   :  { %23 = vsyncpa [#allocation4], 0 }
   0xb   :  { %25 = vsyncpa [#allocation4 + $0x1], 0 }
   0xc   :  { %26 = vsyncpa [#allocation13], 0 }
   0xd   :  { %28 = vsyncpa [#allocation13 + $0x1], 0  ;;  %s4748_s13 = smov 0   ;;  %s4750_s14 = smov 0  }
   0xe   :  { %s4752_s15 = smov 0   ;;  %s4754_s16 = smov 0  }
   0xf LB: > { %6739 = sst [smem:[#allocation20_spill]] %s4668_s13  ;;  %s4769_s17 = sadd.s32 4294967295, %s4680_s16   ;;  %s4680_s16 = sphi %s4754_s16, %s6977_s16   ;;  %s4676_s15 = sphi %s4752_s15, %s6979_s15   ;;  %s4672_s14 = sphi %s4750_s14, %s6981_s14   ;;  %s4668_s13 = sphi %s4748_s13, %s6980_s13  }
  0x10   : > { %6740 = sst [smem:[#allocation21_spill]] %s4676_s15  ;;  %s3381_s18 = sadd.s32 4294967294, %s4680_s16  }
  0x11   : > { %p54_p0 = scmp.ne.s32.totalorder %s4672_s14, %s4668_s13  ;;  %p6657_p1 = scmp.eq.s32.totalorder %s4769_s17, 0 }
  0x12   : > { %p251_p2 = scmp.eq.s32.totalorder %s4769_s17, 1  ;;  %p257_p3 = scmp.eq.s32.totalorder %s3381_s18, 1 }
  0x13   : > { %p4778_p4 = por %p6657_p1, %p54_p0  ;;  %p3382_p5 = scmp.ge.s32.totalorder %s4680_s16, 1 }
  0x14   : > { %p4783_p6 = por %p257_p3, %p54_p0  ;;  %p290_p7 = scmp.lt.s32.totalorder %s4680_s16, 3 }
  0x15   : > { %s6741_s19 = scalar_select %p4778_p4, 1, 0 }
  0x16   : > { %s6742_s20 = scalar_select %p4783_p6, 1, 0 }
  0x17   : > { %p4788_p8 = pnand %p3382_p5, %p290_p7  ;;  %s4682_s22 = smov [#allocation7]  }
  0x18   : > { %6743 = sst [smem:[#allocation22_spill]] %s6742_s20  ;;  %s302_s23 = sshll.u32 %s4682_s22, 4  ;;  %s303_s23 = int_to_ptr.vmem [resolvable:$true] %s302_s23 }
  0x19   : > { %p3745_p9 = pneg %p4788_p8  ;;  %s4683_s25 = smov [#allocation8]  }
  0x1a   : > { %s318_s26 = sshll.u32 %s4683_s25, 4  ;;  %s4684_s27 = smov [#allocation10]   ;;  %s319_s26 = int_to_ptr.vmem [resolvable:$true] %s318_s26 }
  0x1b   : > { %p4797_p11 = pnand %p3745_p9, %p6657_p1  ;;  %s337_s28 = sshll.u32 %s4684_s27, 4  ;;  %s338_s28 = int_to_ptr.vmem [resolvable:$true] %s337_s28 }
  0x1c   : > { %s4451_s29 = scalar_lea.vmem %s303_s23, 4096  ;;  %p4459_p5 = scmp.lt.s32.totalorder %s303_s23, %s303_s23 }
  0x1d   : > { %p4442_p12 = pneg %p4797_p11  ;;  %p4452_p13 = scmp.ne.s32.totalorder %s303_s23, %s4451_s29 }
  0x1e   : > { %p4460_p7 = scmp.lt.s32.totalorder %s4451_s29, %s4451_s29 }
  0x1f   : > { %p4454_p0 = pnand %p4452_p13, %p4442_p12 }
  0x20   : > { %p4461_p9 = por %p4460_p7, %p4459_p5 }
  0x21   : > { %p4455_p3 = pneg %p4454_p0 }
  0x23   : > { %p4462_p10 = pnand %p4461_p9, %p4455_p3 }
  0x25   : > { %4465 = shalt.err (!%p4462_p10)
}
  0x26   : > { %s6658_s30 = smov 128   ;;  %s6660_s11 = smov 8  }
  0x27   : > { %s6746_s2 = sld [smem:[#allocation100_spill]]  ;;  %s4477_s22 = scalar_lea.vmem %s319_s26, 4096 }
  0x28   : > { %p4478_p13 = scmp.ne.s32.totalorder %s319_s26, %s4477_s22  ;;  %p4485_p3 = scmp.lt.s32.totalorder %s319_s26, %s319_s26 }
  0x29   : > { %p4486_p10 = scmp.lt.s32.totalorder %s4477_s22, %s4477_s22 }
  0x2a   : > { %p4480_p0 = pnand %p4478_p13, %p4442_p12 }
  0x2b   : > { %p4487_p7 = por %p4486_p10, %p4485_p3 }
  0x2c   : > { %p4481_p5 = pneg %p4480_p0 }
  0x2d   : > { %3748 = dma.hbm_to_vmem [thread:$0]  (!%p4797_p11), %s6746_s2, 4096, %s303_s23, [#allocation6], %s6658_s30, %s6658_s30, %s6660_s11  }
  0x2e   : > { %p4488_p9 = pnand %p4487_p7, %p4481_p5 }
  0x30   : > { %4491 = shalt.err (!%p4488_p9)
}
  0x31   : > { %s6747_s4 = sld [smem:[#allocation101_spill]]  ;;  %s4503_s23 = scalar_lea.vmem %s338_s28, 4096 }
  0x32   : > { %p4504_p1 = scmp.ne.s32.totalorder %s338_s28, %s4503_s23  ;;  %p4511_p3 = scmp.lt.s32.totalorder %s338_s28, %s338_s28 }
  0x33   : > { %p4512_p5 = scmp.lt.s32.totalorder %s4503_s23, %s4503_s23 }
  0x34   : > { %p4506_p13 = pnand %p4504_p1, %p4442_p12 }
  0x35   : > { %p4513_p10 = por %p4512_p5, %p4511_p3 }
  0x36   : > { %p4507_p0 = pneg %p4506_p13 }
  0x37   : > { %3751 = dma.hbm_to_vmem [thread:$0]  (!%p4797_p11), %s6747_s4, 4096, %s319_s26, [#allocation9], %s6658_s30, %s6658_s30, %s6660_s11  }
  0x38   : > { %p4514_p7 = pnand %p4513_p10, %p4507_p0 }
  0x3a   : > { %4517 = shalt.err (!%p4514_p7)
}
  0x3b   : > { %s6748_s7 = sld [smem:[#allocation102_spill]]  ;;  %s4837_s26 = sadd.s32 1, %s4680_s16  }
  0x3c   : > { %6749 = sst [smem:[#allocation23_spill]] %s4837_s26  ;;  %s38_s24 = ssub.s32 %s4680_s16, %s4837_s26 }
  0x3d   : > { %s41_s18 = sadd.s32 1, %s4676_s15  ;;  %p39_p1 = scmp.eq.s32.totalorder %s38_s24, 0 }
  0x3e   : > { %p48_p12 = scmp.ne.s32.totalorder %s4676_s15, %s4672_s14  ;;  %p49_p9 = scmp.eq.s32.totalorder %s4680_s16, 0 }
  0x3f   : > { %p3772_p13 = scmp.lt.s32.totalorder %s4680_s16, 2  ;;  %s354_s27 = sand.u32 1, %s4676_s15  }
  0x40   : > { %s4847_s22 = scalar_select %p39_p1, %s4676_s15, %s41_s18  }
  0x41   : > { %3754 = dma.hbm_to_vmem [thread:$0]  (!%p4797_p11), %s6748_s7, 4096, %s338_s28, [#allocation9], %s6658_s30, %s6658_s30, %s6660_s11  }
  0x42   : > { %6750 = sst [smem:[#allocation24_spill]] %s4847_s22  ;;  %p50_p0 = por %p49_p9, %p48_p12 }
  0x43   : > { %p4851_p3 = por %p251_p2, %p48_p12  ;;  %s3686_s23 = sshll.u32 %s4680_s16, 11 }
  0x44   : > { %s4857_s28 = sshll.u32 %s354_s27, 7  ;;  %s6752_s0 = sld [smem:[#allocation99_spill]] }
  0x45   : > { %s6751_s25 = scalar_select %p4851_p3, 1, 0 }
  0x46   : > { %s358_s18 = scalar_lea.vmem [#allocation2], %s4857_s28  ;;  %p4865_p11 = pnand %p3772_p13, %p50_p0 }
  0x47   : > { %s366_s30 = sshll.u32 %s358_s18, 4  ;;  %s4874_s29 = scalar_lea.hbm %s6647_s1, %s3686_s23  ;;  %s4869_s30 = int_to_ptr.vmem [resolvable:$true] %s366_s30 }
  0x48   : > { %s4876_s12 = scalar_lea.sflag [#allocation3], %s354_s27  ;;  %p4520_p5 = pneg %p4865_p11 }
  0x4a   : > { %s4862_s24 = scalar_lea.hbm %s6752_s0, %s3686_s23  ;;  %s4523_s15 = scalar_lea.hbm %s6752_s0, 4096 }
  0x4b   : > { %s4518_s7 = scalar_lea.hbm %s4862_s24, 2048  ;;  %p4524_p1 = scmp.lt.s32.totalorder %s4862_s24, %s6752_s0 }
  0x4c   : > { %p4519_p2 = scmp.ne.s32.totalorder %s4862_s24, %s4518_s7  ;;  %p4525_p12 = scmp.lt.s32.totalorder %s4523_s15, %s4518_s7 }
  0x4e   : > { %p4521_p10 = pnand %p4520_p5, %p4519_p2  ;;  %p4526_p9 = por %p4525_p12, %p4524_p1 }
  0x50   : > { %p4522_p7 = pneg %p4521_p10 }
  0x52   : > { %p4527_p13 = pnand %p4526_p9, %p4522_p7 }
  0x54   : > { %4530 = shalt.err (!%p4527_p13)
}
  0x55   : > { %s4531_s2 = scalar_lea.vmem %s4869_s30, 2048  ;;  %s4687_s4 = smov [#allocation2]  }
  0x56   : > { %p4532_p0 = scmp.ne.s32.totalorder %s4869_s30, %s4531_s2  ;;  %s4536_s22 = sshll.u32 %s4687_s4, 4  ;;  %s4537_s22 = int_to_ptr.vmem [resolvable:$false] %s4536_s22 }
  0x57   : > { %s4538_s27 = scalar_lea.vmem %s4537_s22, 4096  ;;  %p4539_p6 = scmp.lt.s32.totalorder %s4869_s30, %s4537_s22 }
  0x58   : > { %p4534_p2 = pnand %p4532_p0, %p4520_p5  ;;  %p4540_p3 = scmp.lt.s32.totalorder %s4538_s27, %s4531_s2 }
  0x5a   : > { %p4535_p10 = pneg %p4534_p2  ;;  %p4541_p4 = por %p4540_p3, %p4539_p6 }
  0x5c   : > { %p4542_p1 = pnand %p4541_p4, %p4535_p10 }
  0x5e   : > { %4545 = shalt.err (!%p4542_p1)
}
  0x5f   : > { %s6754_s7 = smov 8   ;;  %s6755_s15 = smov 128  }
  0x60   : > { %3758 = dma.hbm_to_vmem [thread:$0]  (!%p4865_p11), %s4862_s24, 2048, %s4869_s30, %s4876_s12, %s6755_s15, %s6755_s15, %s6754_s7  }
  0x61   : > { %s380_s20 = scalar_lea.vmem [#allocation5], %s4857_s28  ;;  %s376_s23 = sand.u32 1, %s4680_s16  }
  0x62   : > { %s388_s26 = sshll.u32 %s380_s20, 4  ;;  %s377_s18 = scalar_lea.sflag [#allocation6], %s376_s23  ;;  %s4908_s26 = int_to_ptr.vmem [resolvable:$true] %s388_s26 }
  0x63   : > { %s4546_s2 = scalar_lea.hbm %s4874_s29, 2048  ;;  %s4551_s27 = scalar_lea.hbm %s6647_s1, 4096 }
  0x64   : > { %p4547_p4 = scmp.ne.s32.totalorder %s4874_s29, %s4546_s2  ;;  %p4552_p7 = scmp.lt.s32.totalorder %s4874_s29, %s6647_s1 }
  0x65   : > { %p4553_p12 = scmp.lt.s32.totalorder %s4551_s27, %s4546_s2 }
  0x66   : > { %p4549_p6 = pnand %p4547_p4, %p4520_p5 }
  0x67   : > { %p4554_p9 = por %p4553_p12, %p4552_p7 }
  0x68   : > { %p4550_p3 = pneg %p4549_p6 }
  0x6a   : > { %p4555_p13 = pnand %p4554_p9, %p4550_p3 }
  0x6c   : > { %4558 = shalt.err (!%p4555_p13)
}
  0x6d   : > { %s4559_s30 = scalar_lea.vmem %s4908_s26, 2048  ;;  %s4688_s28 = smov [#allocation5]  }
  0x6e   : > { %p4560_p0 = scmp.ne.s32.totalorder %s4908_s26, %s4559_s30  ;;  %s4564_s24 = sshll.u32 %s4688_s28, 4  ;;  %s4565_s24 = int_to_ptr.vmem [resolvable:$false] %s4564_s24 }
  0x6f   : > { %s4566_s12 = scalar_lea.vmem %s4565_s24, 4096  ;;  %p4567_p1 = scmp.lt.s32.totalorder %s4908_s26, %s4565_s24 }
  0x70   : > { %p4562_p2 = pnand %p4560_p0, %p4520_p5  ;;  %p4568_p4 = scmp.lt.s32.totalorder %s4566_s12, %s4559_s30 }
  0x72   : > { %p4563_p10 = pneg %p4562_p2  ;;  %p4569_p6 = por %p4568_p4, %p4567_p1 }
  0x74   : > { %p4570_p7 = pnand %p4569_p6, %p4563_p10 }
  0x76   : > { %4573 = shalt.err (!%p4570_p7)
}
  0x77   : > { %3761 = dma.hbm_to_vmem [thread:$0]  (!%p4865_p11), %s4874_s29, 2048, %s4908_s26, %s377_s18, %s6755_s15, %s6755_s15, %s6754_s7  }
  0x78   : > { %400 = sbr.rel (%p4788_p8) target bundleno = 1024 (0x400), region = 56 }
  0x7d   : > { %s4938_s0 = sand.u32 1, %s4672_s14   ;;  %p6756_p5 = scmp.ne.s32.totalorder %s6741_s19, 0 }
  0x7e   : > { %s4941_s13 = sshll.u32 %s4938_s0, 7  ;;  %s403_s20 = scalar_lea.sflag [#allocation3], %s4938_s0 }
  0x7f   : > { %s4945_s11 = scalar_lea.vmem [#allocation2], %s4941_s13 }
  0x80   : > { %4643 = dma.done.wait (%p6756_p5), %s403_s20, 2048  }
  0x81   : > { %4645 = vsyncadd (%p6756_p5), %s403_s20, 4294965248  ;;  %s411_s21 = sand.u32 1, %s4769_s17   ;;  %s4953_s7 = scalar_lea.vmem [#allocation5], %s4941_s13 }
  0x82   : > { %s412_s29 = scalar_lea.sflag [#allocation6], %s411_s21 }
  0x83   : > { %4647 = dma.done.wait (%p6756_p5), %s412_s29, 2048  }
  0x84   : > { %4649 = vsyncadd (%p6756_p5), %s412_s29, 4294965248  ;;  %p6757_p8 = scmp.eq.s32.totalorder %s4769_s17, 0 }
  0x86   : > { %4651 = dma.done.wait (%p6757_p8), [#allocation6], 4096   ;;  %p6758_p11 = pmov %p6757_p8 }
  0x87   : > { %p6759_p3 = pmov %p6757_p8 }
  0x88   : > { %4653 = vsyncadd (%p6758_p11), [#allocation6], 4294963200 }
  0x89   : > { %4655 = dma.done.wait (%p6759_p3), [#allocation9], 8192   ;;  %p6760_p12 = pmov %p6759_p3 }
  0x8a   : > { %v3816_v0 = vld [vmem:[#allocation7 + $0x74] ss:$8 sps:$4 sm:$0xff]   ;;  %v3820_v2 = vld [vmem:[#allocation7 + $0x70] ss:$8 sps:$4 sm:$0xff]   ;;  %v3822_v4 = vld [vmem:[#allocation7 + $0x64] ss:$8 sps:$4 sm:$0xff]  }
  0x8b   : > { %4657 = vsyncadd (%p6760_p12), [#allocation9], 4294959104  ;;  %v4967_v1 = vld [vmem:[#allocation8 + $0x74] ss:$8 sps:$4 sm:$0xff]   ;;  %811 = vmatprep.subr.bf16.mxu0 %v3816_v0  ;;  %v4969_v3 = vld [vmem:[#allocation8 + $0x70] ss:$8 sps:$4 sm:$0xff]  }
  0x8c   : > { %1401 = vmatprep.subr.bf16.mxu1 %v4967_v1  ;;  %812 = vmatpush1.bf16.msra.mxu0 %v3820_v2  ;;  %v4973_v5 = vld [vmem:[#allocation8 + $0x64] ss:$8 sps:$4 sm:$0xff]   ;;  %v3826_v6 = vld [vmem:[#allocation7 + $0x60] ss:$8 sps:$4 sm:$0xff]   ;;  %v3828_v8 = vld [vmem:[#allocation7 + $0x54] ss:$8 sps:$4 sm:$0xff]  }
  0x8d   : > { %1402 = vmatpush1.bf16.msra.mxu1 %v4969_v3  ;;  %813 = vmatprep.subr.bf16.mxu0 %v3822_v4  ;;  %v4975_v7 = vld [vmem:[#allocation8 + $0x60] ss:$8 sps:$4 sm:$0xff]   ;;  %v4978_v9 = vld [vmem:[#allocation8 + $0x54] ss:$8 sps:$4 sm:$0xff]   ;;  %v3832_v10 = vld [vmem:[#allocation7 + $0x50] ss:$8 sps:$4 sm:$0xff]  }
  0x8e   : > { %1403 = vmatprep.subr.bf16.mxu1 %v4973_v5  ;;  %v4980_v11 = vld [vmem:[#allocation8 + $0x50] ss:$8 sps:$4 sm:$0xff]   ;;  %v3834_v12 = vld [vmem:[#allocation7 + $0x44] ss:$8 sps:$4 sm:$0xff]   ;;  %v3838_v14 = vld [vmem:[#allocation7 + $0x40] ss:$8 sps:$4 sm:$0xff]  }
  0x8f   : > { %v4984_v13 = vld [vmem:[#allocation8 + $0x44] ss:$8 sps:$4 sm:$0xff]   ;;  %v4987_v15 = vld [vmem:[#allocation8 + $0x40] ss:$8 sps:$4 sm:$0xff]   ;;  %v3840_v16 = vld [vmem:[#allocation7 + $0x34] ss:$8 sps:$4 sm:$0xff]  }
  0x90   : > { %814 = vmatpush1.bf16.msra.mxu0 %v3826_v6  ;;  %v4990_v17 = vld [vmem:[#allocation8 + $0x34] ss:$8 sps:$4 sm:$0xff]   ;;  %v3844_v18 = vld [vmem:[#allocation7 + $0x30] ss:$8 sps:$4 sm:$0xff]   ;;  %v3846_v20 = vld [vmem:[#allocation7 + $0x24] ss:$8 sps:$4 sm:$0xff]  }
  0x91   : > { %1404 = vmatpush1.bf16.msra.mxu1 %v4975_v7  ;;  %815 = vmatprep.subr.bf16.mxu0 %v3828_v8  ;;  %v4992_v19 = vld [vmem:[#allocation8 + $0x30] ss:$8 sps:$4 sm:$0xff]   ;;  %v4996_v21 = vld [vmem:[#allocation8 + $0x24] ss:$8 sps:$4 sm:$0xff]   ;;  %v3850_v22 = vld [vmem:[#allocation7 + $0x20] ss:$8 sps:$4 sm:$0xff]  }
  0x92   : > { %1405 = vmatprep.subr.bf16.mxu1 %v4978_v9  ;;  %v4999_v23 = vld [vmem:[#allocation8 + $0x20] ss:$8 sps:$4 sm:$0xff]   ;;  %v3852_v24 = vld [vmem:[#allocation7 + $0x14] ss:$8 sps:$4 sm:$0xff]   ;;  %v3856_v26 = vld [vmem:[#allocation7 + $0x10] ss:$8 sps:$4 sm:$0xff]  }
  0x93   : > { %v5002_v25 = vld [vmem:[#allocation8 + $0x14] ss:$8 sps:$4 sm:$0xff]   ;;  %v5004_v27 = vld [vmem:[#allocation8 + $0x10] ss:$8 sps:$4 sm:$0xff]   ;;  %v3858_v28 = vld [vmem:[#allocation7 + $0x4] ss:$8 sps:$4 sm:$0xff]  }
  0x94   : > { %816 = vmatpush1.bf16.msra.mxu0 %v3832_v10  ;;  %v5008_v29 = vld [vmem:[#allocation8 + $0x4] ss:$8 sps:$4 sm:$0xff]   ;;  %v3862_v30 = vld [vmem:[#allocation7] ss:$8 sps:$4 sm:$0xff]   ;;  %v3864_v32 = vld [vmem:[#allocation7 + $0xf4] ss:$8 sps:$4 sm:$0xff]  }
  0x95   : > { %1406 = vmatpush1.bf16.msra.mxu1 %v4980_v11  ;;  %817 = vmatprep.subr.bf16.mxu0 %v3834_v12  ;;  %v5011_v31 = vld [vmem:[#allocation8] ss:$8 sps:$4 sm:$0xff]   ;;  %v5014_v33 = vld [vmem:[#allocation8 + $0xf4] ss:$8 sps:$4 sm:$0xff]   ;;  %v3868_v34 = vld [vmem:[#allocation7 + $0xf0] ss:$8 sps:$4 sm:$0xff]  }
  0x96   : > { %1407 = vmatprep.subr.bf16.mxu1 %v4984_v13  ;;  %v5016_v35 = vld [vmem:[#allocation8 + $0xf0] ss:$8 sps:$4 sm:$0xff]   ;;  %v3870_v36 = vld [vmem:[#allocation7 + $0xe4] ss:$8 sps:$4 sm:$0xff]   ;;  %v3874_v38 = vld [vmem:[#allocation7 + $0xe0] ss:$8 sps:$4 sm:$0xff]  }
  0x97   : > { %v5020_v37 = vld [vmem:[#allocation8 + $0xe4] ss:$8 sps:$4 sm:$0xff]   ;;  %v5023_v39 = vld [vmem:[#allocation8 + $0xe0] ss:$8 sps:$4 sm:$0xff]   ;;  %v3876_v40 = vld [vmem:[#allocation7 + $0xd4] ss:$8 sps:$4 sm:$0xff]  }
  0x98   : > { %818 = vmatpush1.bf16.msra.mxu0 %v3838_v14  ;;  %v5026_v41 = vld [vmem:[#allocation8 + $0xd4] ss:$8 sps:$4 sm:$0xff]   ;;  %v3880_v42 = vld [vmem:[#allocation7 + $0xd0] ss:$8 sps:$4 sm:$0xff]   ;;  %v3882_v44 = vld [vmem:[#allocation7 + $0xc4] ss:$8 sps:$4 sm:$0xff]  }
  0x99   : > { %1408 = vmatpush1.bf16.msra.mxu1 %v4987_v15  ;;  %819 = vmatprep.subr.bf16.mxu0 %v3840_v16  ;;  %v5028_v43 = vld [vmem:[#allocation8 + $0xd0] ss:$8 sps:$4 sm:$0xff]   ;;  %v5032_v45 = vld [vmem:[#allocation8 + $0xc4] ss:$8 sps:$4 sm:$0xff]   ;;  %v3886_v50 = vld [vmem:[#allocation7 + $0xc0] ss:$8 sps:$4 sm:$0xff]  }
  0x9a   : > { %1409 = vmatprep.subr.bf16.mxu1 %v4990_v17  ;;  %v5035_v46 = vld [vmem:[%s4945_s11] sm:$0xff]  ;;  %v5038_v47 = vld [vmem:[%s4945_s11 + $0x8] sm:$0xff]  ;;  %v3888_v55 = vld [vmem:[#allocation7 + $0xb4] ss:$8 sps:$4 sm:$0xff]   ;;  %s6088_s4 = scalar_lea.vmem [#allocation12], %s4941_s13  ;;  %s6509_s30 = scalar_lea.vmem [#allocation11], %s4941_s13 }
  0x9b   : > { %v5041_v48 = vld [vmem:[%s4953_s7] sm:$0xff]  ;;  %v5044_v49 = vld [vmem:[%s4953_s7 + $0x8] sm:$0xff]  ;;  %v5060_v56 = vld [vmem:[#allocation8 + $0xb4] ss:$8 sps:$4 sm:$0xff]   ;;  %v3484_v57 = vcombine.high %v5035_v46, %v5038_v47  ;;  %s3722_s28 = sshll.u32 %s4769_s17, 11  ;;  %s3194_s13 = scalar_lea.sflag [#allocation13], %s4938_s0 }
  0x9c   : > { %820 = vmatpush1.bf16.msra.mxu0 %v3844_v18  ;;  %v5047_v51 = vld [vmem:[#allocation8 + $0xc0] ss:$8 sps:$4 sm:$0xff]   ;;  %v5051_v52 = vadd.bf16 %v5041_v48, %v5035_v46  ;;  %v5055_v53 = vadd.bf16 %v5044_v49, %v5038_v47  ;;  %v3892_v60 = vld [vmem:[#allocation7 + $0xb0] ss:$8 sps:$4 sm:$0xff]   ;;  %v3894_v62 = vld [vmem:[#allocation7 + $0xa4] ss:$8 sps:$4 sm:$0xff]   ;;  %s6521_s20 = scalar_lea.hbm %s6656_s10, %s3722_s28 }
  0x9d   : > { %1410 = vmatpush1.bf16.msra.mxu1 %v4992_v19  ;;  %821 = vmatprep.subr.bf16.mxu0 %v3846_v20  ;;  %v5069_v61 = vld [vmem:[#allocation8 + $0xb0] ss:$8 sps:$4 sm:$0xff]   ;;  %v5072_v63 = vld [vmem:[#allocation8 + $0xa4] ss:$8 sps:$4 sm:$0xff]   ;;  %v3898_v0 = vld [vmem:[#allocation7 + $0xa0] ss:$8 sps:$4 sm:$0xff]  }
  0x9e   : > { %1411 = vmatprep.subr.bf16.mxu1 %v4996_v21  ;;  %v3404_v58 = vcombine.high %v5051_v52, %v5055_v53  ;;  %1433 = vmatprep.mubr.bf16.mxu1 %v3484_v57  ;;  %v5074_v2 = vld [vmem:[#allocation8 + $0xa0] ss:$8 sps:$4 sm:$0xff]   ;;  %v3900_v4 = vld [vmem:[#allocation7 + $0x94] ss:$8 sps:$4 sm:$0xff]   ;;  %v3904_v16 = vld [vmem:[#allocation7 + $0x90] ss:$8 sps:$4 sm:$0xff]  }
  0x9f   : > { %v5077_v6 = vld [vmem:[#allocation8 + $0x94] ss:$8 sps:$4 sm:$0xff]   ;;  %v5087_v12 = vld [vmem:[%s4953_s7 + $0x20] sm:$0xff]  ;;  %v5090_v14 = vld [vmem:[%s4953_s7 + $0x28] sm:$0xff]  ;;  %p6972_p13 = scmp.ne.s32.totalorder %s6751_s25, 0  ;;  %s4689_s29 = smov [#allocation12]  }
  0xa0   : > { %822 = vmatpush1.bf16.msra.mxu0 %v3850_v22  ;;  %843 = vmatprep.mubr.bf16.mxu0 %v3404_v58  ;;  %v5080_v8 = vld [vmem:[%s4953_s7 + $0x10] sm:$0xff]  ;;  %v5083_v10 = vld [vmem:[%s4953_s7 + $0x18] sm:$0xff]  ;;  %v5128_v57 = vld [vmem:[#allocation8 + $0x80] ss:$8 sps:$4 sm:$0xff]  }
  0xa1   : > { %1412 = vmatpush1.bf16.msra.mxu1 %v4999_v23  ;;  %823 = vmatprep.subr.bf16.mxu0 %v3852_v24  ;;  %v5092_v18 = vld [vmem:[#allocation8 + $0x90] ss:$8 sps:$4 sm:$0xff]   ;;  %v5131_v58 = vld [vmem:[%s4953_s7 + $0x60] sm:$0xff]  ;;  %v483_v22 = vld [vmem:[%s4945_s11 + $0x28] sm:$0xff] }
  0xa2   : > { %1413 = vmatprep.subr.bf16.mxu1 %v5002_v25  ;;  %v5095_v20 = vld [vmem:[%s4945_s11 + $0x10] sm:$0xff]  ;;  %v5146_v24 = vld [vmem:[%s4953_s7 + $0x78] sm:$0xff] }
  0xa4   : > { %824 = vmatpush1.bf16.msra.mxu0 %v3856_v26  ;;  %v3906_v26 = vld [vmem:[#allocation7 + $0x84] ss:$8 sps:$4 sm:$0xff]  }
  0xa5   : > { %1414 = vmatpush1.bf16.msra.mxu1 %v5004_v27  ;;  %825 = vmatprep.subr.bf16.mxu0 %v3858_v28  ;;  %v5101_v28 = vld [vmem:[#allocation8 + $0x84] ss:$8 sps:$4 sm:$0xff]  }
  0xa6   : > { %1415 = vmatprep.subr.bf16.mxu1 %v5008_v29 }
  0xa8   : > { %826 = vmatpush1.bf16.msra.mxu0 %v3862_v30  ;;  %v481_v30 = vld [vmem:[%s4945_s11 + $0x18] sm:$0xff] }
  0xa9   : > { %1416 = vmatpush1.bf16.msra.mxu1 %v5011_v31  ;;  %827 = vmatprep.subr.bf16.mxu0 %v3864_v32  ;;  %v5105_v32 = vld [vmem:[%s4953_s7 + $0x30] sm:$0xff] }
  0xaa   : > { %1417 = vmatprep.subr.bf16.mxu1 %v5014_v33 }
  0xac   : > { %828 = vmatpush2.bf16.msra.mxu0 %v3868_v34  ;;  %v5108_v34 = vld [vmem:[%s4953_s7 + $0x38] sm:$0xff] }
  0xad   : > { %1418 = vmatpush2.bf16.msra.mxu1 %v5016_v35  ;;  %829 = vmatprep.subr.bf16.mxu0 %v3870_v36  ;;  %v5112_v36 = vld [vmem:[%s4953_s7 + $0x40] sm:$0xff] }
  0xae   : > { %1419 = vmatprep.subr.bf16.mxu1 %v5020_v37 }
  0xb0   : > { %830 = vmatpush2.bf16.msra.mxu0 %v3874_v38  ;;  %v5115_v38 = vld [vmem:[%s4953_s7 + $0x48] sm:$0xff] }
  0xb1   : > { %1420 = vmatpush2.bf16.msra.mxu1 %v5023_v39  ;;  %831 = vmatprep.subr.bf16.mxu0 %v3876_v40  ;;  %v5143_v40 = vld [vmem:[%s4953_s7 + $0x70] sm:$0xff] }
  0xb2   : > { %1421 = vmatprep.subr.bf16.mxu1 %v5026_v41  ;;  %v3577_v59 = vcombine.low %v5143_v40, %v5146_v24 }
  0xb4   : > { %832 = vmatpush2.bf16.msra.mxu0 %v3880_v42  ;;  %v5121_v42 = vld [vmem:[%s4953_s7 + $0x50] sm:$0xff] }
  0xb5   : > { %1422 = vmatpush2.bf16.msra.mxu1 %v5028_v43  ;;  %833 = vmatprep.subr.bf16.mxu0 %v3882_v44  ;;  %v5124_v44 = vld [vmem:[%s4953_s7 + $0x58] sm:$0xff] }
  0xb6   : > { %1423 = vmatprep.subr.bf16.mxu1 %v5032_v45 }
  0xb8   : > { %834 = vmatpush2.bf16.msra.mxu0 %v3886_v50  ;;  %v482_v50 = vld [vmem:[%s4945_s11 + $0x20] sm:$0xff] }
  0xb9   : > { %1424 = vmatpush2.bf16.msra.mxu1 %v5047_v51  ;;  %835 = vmatprep.subr.bf16.mxu0 %v3888_v55  ;;  %v3910_v55 = vld [vmem:[#allocation7 + $0x80] ss:$8 sps:$4 sm:$0xff]  }
  0xba   : > { %1425 = vmatprep.subr.bf16.mxu1 %v5060_v56 }
  0xbc   : > { %836 = vmatpush2.bf16.msra.mxu0 %v3892_v60  ;;  %v5134_v60 = vld [vmem:[%s4953_s7 + $0x68] sm:$0xff]  ;;  %s4578_s7 = sshll.u32 %s4689_s29, 4  ;;  %s4579_s7 = int_to_ptr.vmem [resolvable:$false] %s4578_s7 }
  0xbd   : > { %1426 = vmatpush2.bf16.msra.mxu1 %v5069_v61  ;;  %837 = vmatprep.subr.bf16.mxu0 %v3894_v62  ;;  %v513_v62 = vadd.bf16 %v5083_v10, %v481_v30  ;;  %s4580_s19 = scalar_lea.vmem %s4579_s7, 4096 }
  0xbe   : > { %1427 = vmatprep.subr.bf16.mxu1 %v5072_v63 }
  0xc0   : > { %838 = vmatpush2.bf16.msra.mxu0 %v3898_v0  ;;  %v3403_v0 = vcombine.low %v5051_v52, %v5055_v53  ;;  %v514_v52 = vadd.bf16 %v5087_v12, %v482_v50 }
  0xc1   : > { %1428 = vmatpush2.bf16.msra.mxu1 %v5074_v2  ;;  %839 = vmatprep.subr.bf16.mxu0 %v3900_v4  ;;  %v512_v4 = vadd.bf16 %v5080_v8, %v5095_v20 }
  0xc2   : > { %1429 = vmatprep.subr.bf16.mxu1 %v5077_v6 }
  0xc3   : > { %v3406_v54 = vcombine.high %v512_v4, %v513_v62 }
  0xc4   : > { %840 = vmatpush2.bf16.msra.mxu0 %v3904_v16  ;;  %v3486_v16 = vcombine.high %v5095_v20, %v481_v30 }
  0xc5   : > { %1430 = vmatpush2.bf16.msra.mxu1 %v5092_v18  ;;  %841 = vmatprep.subr.bf16.mxu0 %v3906_v26  ;;  %v3483_v26 = vcombine.low %v5035_v46, %v5038_v47  ;;  %v515_v46 = vadd.bf16 %v5090_v14, %v483_v22  ;;  %v3405_v47 = vcombine.low %v512_v4, %v513_v62  ;;  %v487_v62 = vld [vmem:[%s4945_s11 + $0x48] sm:$0xff] }
  0xc6   : > { %1431 = vmatprep.subr.bf16.mxu1 %v5101_v28  ;;  %v519_v4 = vadd.bf16 %v5115_v38, %v487_v62 }
  0xc7   : > { %v3408_v53 = vcombine.high %v514_v52, %v515_v46 }
  0xc8   : > { %842 = vmatpush2.bf16.msra.mxu0 %v3910_v55  ;;  %v484_v55 = vld [vmem:[%s4945_s11 + $0x30] sm:$0xff] }
  0xc9   : > { %1432 = vmatpush2.bf16.msra.mxu1 %v5128_v57  ;;  %2022 = vmatprep.subr.bf16.mxu0 %v4967_v1  ;;  %v3485_v1 = vcombine.low %v5095_v20, %v481_v30  ;;  %v3487_v20 = vcombine.low %v482_v50, %v483_v22  ;;  %v486_v30 = vld [vmem:[%s4945_s11 + $0x40] sm:$0xff] }
  0xcb   : > { %844 = vmatmul.mubr.bf16.vlgmr.msra.gmra.mxu0 %v3403_v0  ;;  %v485_v0 = vld [vmem:[%s4945_s11 + $0x38] sm:$0xff] }
  0xcc   : > { %1434 = vmatmul.mubr.bf16.vlgmr.msra.gmra.mxu1 %v3483_v26  ;;  %2023 = vmatpush1.bf16.msra.mxu0 %v4969_v3  ;;  %v3488_v3 = vcombine.high %v482_v50, %v483_v22  ;;  %v3489_v22 = vcombine.low %v484_v55, %v485_v0  ;;  %v488_v50 = vld [vmem:[%s4945_s11 + $0x50] sm:$0xff] }
  0xcd   : > { %853 = vmatprep.mubr.bf16.mxu0 %v3406_v54  ;;  %2024 = vmatprep.subr.bf16.mxu0 %v4973_v5  ;;  %v516_v5 = vadd.bf16 %v5105_v32, %v484_v55  ;;  %v517_v54 = vadd.bf16 %v5108_v34, %v485_v0 }
  0xce   : > { %1443 = vmatprep.mubr.bf16.mxu1 %v3486_v16  ;;  %v489_v16 = vld [vmem:[%s4945_s11 + $0x58] sm:$0xff] }
  0xcf   : > { %v521_v26 = vadd.bf16 %v5124_v44, %v489_v16 }
  0xd0   : > { %2025 = vmatpush1.bf16.msra.mxu0 %v4975_v7  ;;  %v3407_v7 = vcombine.low %v514_v52, %v515_v46  ;;  %v3491_v52 = vcombine.low %v486_v30, %v487_v62  ;;  %v490_v46 = vld [vmem:[%s4945_s11 + $0x60] sm:$0xff] }
  0xd1   : > { %2026 = vmatprep.subr.bf16.mxu0 %v4978_v9  ;;  %v3410_v9 = vcombine.high %v516_v5, %v517_v54 }
  0xd3   : > { %854 = vmatmul.mubr.bf16.gmra.mxu0 %v3405_v47  ;;  %v491_v47 = vld [vmem:[%s4945_s11 + $0x68] sm:$0xff] }
  0xd4   : > { %1444 = vmatmul.mubr.bf16.gmra.mxu1 %v3485_v1  ;;  %2027 = vmatpush1.bf16.msra.mxu0 %v4980_v11  ;;  %v3490_v11 = vcombine.high %v484_v55, %v485_v0  ;;  %v523_v1 = vadd.bf16 %v5134_v60, %v491_v47  ;;  %v492_v55 = vld [vmem:[%s4945_s11 + $0x70] sm:$0xff]  ;;  %v493_v0 = vld [vmem:[%s4945_s11 + $0x78] sm:$0xff]  ;;  %s3225_s11 = sshll.u32 %s6088_s4, 4  ;;  %s6524_s11 = int_to_ptr.vmem [resolvable:$true] %s3225_s11 }
  0xd5   : > { %863 = vmatprep.mubr.bf16.mxu0 %v3408_v53  ;;  %2028 = vmatprep.subr.bf16.mxu0 %v4984_v13  ;;  %v518_v13 = vadd.bf16 %v5112_v36, %v486_v30  ;;  %v3493_v53 = vcombine.low %v488_v50, %v489_v16  ;;  %s4574_s21 = scalar_lea.vmem %s6524_s11, 2048  ;;  %p4581_p10 = scmp.lt.s32.totalorder %s6524_s11, %s4579_s7 }
  0xd6   : > { %1453 = vmatprep.mubr.bf16.mxu1 %v3488_v3  ;;  %v3496_v3 = vcombine.high %v490_v46, %v491_v47  ;;  %p4575_p9 = scmp.ne.s32.totalorder %s6524_s11, %s4574_s21  ;;  %p4582_p1 = scmp.lt.s32.totalorder %s4580_s19, %s4574_s21 }
  0xd8   : > { %2029 = vmatpush1.bf16.msra.mxu0 %v4987_v15  ;;  %v3409_v15 = vcombine.low %v516_v5, %v517_v54  ;;  %v3498_v54 = vcombine.high %v492_v55, %v493_v0  ;;  %p4576_p0 = pnand %p4575_p9, %p6972_p13  ;;  %p4583_p4 = por %p4582_p1, %p4581_p10 }
  0xd9   : > { %2030 = vmatprep.subr.bf16.mxu0 %v4990_v17  ;;  %v3412_v17 = vcombine.high %v518_v13, %v519_v4 }
  0xda   : > { %p4577_p2 = pneg %p4576_p0 }
  0xdb   : > { %864 = vmatmul.mubr.bf16.gmra.mxu0 %v3407_v7  ;;  %v3497_v7 = vcombine.low %v492_v55, %v493_v0 }
  0xdc   : > { %1454 = vmatmul.mubr.bf16.gmra.mxu1 %v3487_v20  ;;  %2031 = vmatpush1.bf16.msra.mxu0 %v4992_v19  ;;  %v3492_v19 = vcombine.high %v486_v30, %v487_v62  ;;  %p4584_p6 = pnand %p4583_p4, %p4577_p2 }
  0xdd   : > { %873 = vmatprep.mubr.bf16.mxu0 %v3410_v9  ;;  %2032 = vmatprep.subr.bf16.mxu0 %v4996_v21  ;;  %v520_v21 = vadd.bf16 %v5121_v42, %v488_v50 }
  0xde   : > { %1463 = vmatprep.mubr.bf16.mxu1 %v3490_v11 }
  0xe0   : > { %2033 = vmatpush1.bf16.msra.mxu0 %v4999_v23  ;;  %v3411_v23 = vcombine.low %v518_v13, %v519_v4 }
  0xe1   : > { %2034 = vmatprep.subr.bf16.mxu0 %v5002_v25  ;;  %v3414_v25 = vcombine.high %v520_v21, %v521_v26 }
  0xe3   : > { %874 = vmatmul.mubr.bf16.gmra.mxu0 %v3409_v15 }
  0xe4   : > { %1464 = vmatmul.mubr.bf16.gmra.mxu1 %v3489_v22  ;;  %2035 = vmatpush1.bf16.msra.mxu0 %v5004_v27  ;;  %v3494_v27 = vcombine.high %v488_v50, %v489_v16 }
  0xe5   : > { %883 = vmatprep.mubr.bf16.mxu0 %v3412_v17  ;;  %2036 = vmatprep.subr.bf16.mxu0 %v5008_v29  ;;  %v522_v29 = vadd.bf16 %v5131_v58, %v490_v46 }
  0xe6   : > { %1473 = vmatprep.mubr.bf16.mxu1 %v3492_v19 }
  0xe7   : > { %v3415_v5 = vcombine.low %v522_v29, %v523_v1 }
  0xe8   : > { %2037 = vmatpush1.bf16.msra.mxu0 %v5011_v31  ;;  %v3413_v31 = vcombine.low %v520_v21, %v521_v26 }
  0xe9   : > { %2038 = vmatprep.subr.bf16.mxu0 %v5014_v33  ;;  %v3416_v33 = vcombine.high %v522_v29, %v523_v1 }
  0xeb   : > { %884 = vmatmul.mubr.bf16.gmra.mxu0 %v3411_v23 }
  0xec   : > { %1474 = vmatmul.mubr.bf16.gmra.mxu1 %v3491_v52  ;;  %2039 = vmatpush2.bf16.msra.mxu0 %v5016_v35  ;;  %v524_v35 = vadd.bf16 %v5143_v40, %v492_v55 }
  0xed   : > { %893 = vmatprep.mubr.bf16.mxu0 %v3414_v25  ;;  %2040 = vmatprep.subr.bf16.mxu0 %v5020_v37  ;;  %v525_v37 = vadd.bf16 %v5146_v24, %v493_v0 }
  0xee   : > { %1483 = vmatprep.mubr.bf16.mxu1 %v3494_v27 }
  0xf0   : > { %2041 = vmatpush2.bf16.msra.mxu0 %v5023_v39  ;;  %v3495_v39 = vcombine.low %v490_v46, %v491_v47 }
  0xf1   : > { %2042 = vmatprep.subr.bf16.mxu0 %v5026_v41  ;;  %v3418_v41 = vcombine.high %v524_v35, %v525_v37 }
  0xf3   : > { %894 = vmatmul.mubr.bf16.gmra.mxu0 %v3413_v31  ;;  %v558_v31 = vld [vmem:[%s6649_s3] sm:$0x3] }
  0xf4   : > { %1484 = vmatmul.mubr.bf16.gmra.mxu1 %v3493_v53  ;;  %2043 = vmatpush2.bf16.msra.mxu0 %v5028_v43  ;;  %v3417_v43 = vcombine.low %v524_v35, %v525_v37 }
  0xf5   : > { %903 = vmatprep.mubr.bf16.mxu0 %v3416_v33  ;;  %2044 = vmatprep.subr.bf16.mxu0 %v5032_v45  ;;  %v6761_v45 = vcombine.high %v5041_v48, %v5044_v49 }
  0xf6   : > { %1493 = vmatprep.mubr.bf16.mxu1 %v3496_v3  ;;  %v559_v3 = vmul.f32 2.0, %v558_v31 }
  0xf8   : > { %2045 = vmatpush2.bf16.msra.mxu0 %v5047_v51  ;;  %v6762_v51 = vcombine.low %v5041_v48, %v5044_v49  ;;  %v6767_v48 = vcombine.high %v5105_v32, %v5108_v34  ;;  %v6768_v49 = vcombine.low %v5105_v32, %v5108_v34  ;;  %v561_v32 = vlaneseq }
  0xf9   : > { %2046 = vmatprep.subr.bf16.mxu0 %v5060_v56  ;;  %v6763_v56 = vcombine.high %v5080_v8, %v5083_v10 }
  0xfa   : > { %v562_v34 = vshrl.u32 %v561_v32, 7 }
  0xfb   : > { %904 = vmatmul.mubr.bf16.gmra.mxu0 %v3415_v5 }
  0xfc   : > { %1494 = vmatmul.mubr.bf16.gmra.mxu1 %v3495_v39  ;;  %2047 = vmatpush2.bf16.msra.mxu0 %v5069_v61  ;;  %v6764_v61 = vcombine.low %v5080_v8, %v5083_v10  ;;  %v6770_v8 = vcombine.low %v5112_v36, %v5115_v38  ;;  %v6771_v10 = vcombine.high %v5121_v42, %v5124_v44 }
  0xfd   : > { %913 = vmatprep.mubr.bf16.mxu0 %v3418_v41  ;;  %2048 = vmatprep.subr.bf16.mxu0 %v5072_v63  ;;  %v6765_v63 = vcombine.high %v5087_v12, %v5090_v14 }
  0xfe   : > { %1503 = vmatprep.mubr.bf16.mxu1 %v3498_v54 }
 0x100   : > { %2049 = vmatpush2.bf16.msra.mxu0 %v5074_v2  ;;  %v6766_v2 = vcombine.low %v5087_v12, %v5090_v14  ;;  %v6772_v12 = vcombine.low %v5121_v42, %v5124_v44  ;;  %v6773_v14 = vcombine.high %v5131_v58, %v5134_v60  ;;  %v5283_v42 = vsub.s32 1, %v562_v34 }
 0x101   : > { %2050 = vmatprep.subr.bf16.mxu0 %v5077_v6  ;;  %v6769_v6 = vcombine.high %v5112_v36, %v5115_v38  ;;  %v1149_v36 = vld [vmem:[%s6651_s5] sm:$0x3]  ;;  %v5281_v38 = vsub.s32 0, %v562_v34 }
 0x102   : > { %6777 = vst [vmem:[#allocation26_spill] sm:$0xff] %v5283_v42 }
 0x103   : > { %914 = vmatmul.mubr.bf16.gmra.mxu0 %v3417_v43  ;;  %6776 = vst [vmem:[#allocation25_spill] sm:$0xff] %v5281_v38  ;;  %v5286_v44 = vrot.slane %v1149_v36, %v5281_v38  ;;  %v5353_v39 = vrot.slane %v559_v3, %v5281_v38 }
 0x104   : > { %1504 = vmatmul.mubr.bf16.gmra.mxu1 %v3497_v7  ;;  %2051 = vmatpush2.bf16.msra.mxu0 %v5092_v18  ;;  %v6774_v18 = vcombine.low %v5131_v58, %v5134_v60 }
 0x105   : > { %2054 = vmatprep.mubr.bf16.mxu0 %v6761_v45  ;;  %2052 = vmatprep.subr.bf16.mxu0 %v5101_v28  ;;  %v6775_v28 = vcombine.high %v5143_v40, %v5146_v24 }
 0x108   : > { %2053 = vmatpush2.bf16.msra.mxu0 %v5128_v57  ;;  %v5289_v57 = vrot.slane %v1149_v36, %v5283_v42 }
 0x10b   : > { %2055 = vmatmul.mubr.bf16.vlgmr.msra.gmra.mxu0 %v6762_v51 }
 0x10c   : > { %2064 = vmatprep.mubr.bf16.mxu0 %v6763_v56 }
 0x113   : > { %2065 = vmatmul.mubr.bf16.gmra.mxu0 %v6764_v61 }
 0x114   : > { %2074 = vmatprep.mubr.bf16.mxu0 %v6765_v63 }
 0x11b   : > { %2075 = vmatmul.mubr.bf16.gmra.mxu0 %v6766_v2 }
 0x11c   : > { %2084 = vmatprep.mubr.bf16.mxu0 %v6767_v48  ;;  %v5372_v48 = vrot.slane %v559_v3, %v5283_v42 }
 0x123   : > { %2085 = vmatmul.mubr.bf16.gmra.mxu0 %v6768_v49 }
 0x124   : > { %2094 = vmatprep.mubr.bf16.mxu0 %v6769_v6 }
 0x12b   : > { %2095 = vmatmul.mubr.bf16.gmra.mxu0 %v6770_v8 }
 0x12c   : > { %2104 = vmatprep.mubr.bf16.mxu0 %v6771_v10 }
 0x133   : > { %2105 = vmatmul.mubr.bf16.gmra.mxu0 %v6772_v12 }
 0x134   : > { %2114 = vmatprep.mubr.bf16.mxu0 %v6773_v14 }
 0x13b   : > { %2115 = vmatmul.mubr.bf16.gmra.mxu0 %v6774_v18 }
 0x13c   : > { %2124 = vmatprep.mubr.bf16.mxu0 %v6775_v28 }
 0x143   : > { %2125 = vmatmul.mubr.bf16.gmra.mxu0 %v3577_v59 }
 0x18b   : > { %v5291_v58 = vpop.f32.mrf.mxu0 }
 0x18c   : > { %v1435_v24 = vpop.f32.mrf.mxu1 }
 0x18d   : > { %v5294_v59 = vadd.f32 %v1435_v24, %v5286_v44  ;;  %v5296_v40 = vpop.f32.mrf.mxu0 }
 0x18e   : > { %v1437_v60 = vpop.f32.mrf.mxu1 }
 0x18f   : > { %v5299_v20 = vadd.f32 %v1437_v60, %v5289_v57  ;;  %v5301_v9 = vpop.f32.mrf.mxu0  ;;  %v1514_v62 = vmul.f32 %v5294_v59, %v5294_v59 }
 0x190   : > { %v1439_v30 = vpop.f32.mrf.mxu1 }
 0x191   : > { %v5306_v11 = vadd.f32 %v1439_v30, %v5286_v44  ;;  %v5308_v13 = vpop.f32.mrf.mxu0  ;;  %v1515_v15 = vmul.f32 %v5299_v20, %v5299_v20 }
 0x192   : > { %v1441_v4 = vpop.f32.mrf.mxu1 }
 0x193   : > { %v1516_v22 = vmul.f32 %v5306_v11, %v5306_v11  ;;  %v5315_v17 = vadd.f32 %v1441_v4, %v5289_v57  ;;  %v5317_v50 = vpop.f32.mrf.mxu0  ;;  %v1546_v19 = vadd.f32 %v1515_v15, %v1514_v62 }
 0x194   : > { %v1445_v16 = vpop.f32.mrf.mxu1 }
 0x195   : > { %6778 = vst [vmem:[#allocation27_spill] sm:$0xff] %v5315_v17  ;;  %v5320_v21 = vadd.f32 %v1445_v16, %v5286_v44  ;;  %v1517_v26 = vmul.f32 %v5315_v17, %v5315_v17  ;;  %1547 = vadd.xlane.f32.xlu0 %v1546_v19  ;;  %v5324_v23 = vpop.f32.mrf.mxu0 }
 0x196   : > { %v1447_v52 = vpop.f32.mrf.mxu1 }
 0x197   : > { %6779 = vst [vmem:[#allocation28_spill] sm:$0xff] %v5320_v21  ;;  %v1518_v25 = vmul.f32 %v5320_v21, %v5320_v21  ;;  %v5329_v46 = vadd.f32 %v1447_v52, %v5289_v57  ;;  %v5331_v47 = vpop.f32.mrf.mxu0  ;;  %v1549_v27 = vadd.f32 %v1517_v26, %v1516_v22 }
 0x198   : > { %v5342_v55 = vpop.f32.mrf.mxu1 }
 0x199   : > { %6780 = vst [vmem:[#allocation29_spill] sm:$0xff] %v5329_v46  ;;  %v1519_v29 = vmul.f32 %v5329_v46, %v5329_v46  ;;  %1550 = vadd.xlane.f32.xlu0 %v1549_v27  ;;  %v5335_v1 = vpop.f32.mrf.mxu0 }
 0x19a   : > { %v5348_v37 = vpop.f32.mrf.mxu1 }
 0x19b   : > { %v5340_v53 = vpop.f32.mrf.mxu0  ;;  %v1552_v33 = vadd.f32 %v1519_v29, %v1518_v25 }
 0x19c   : > { %v5355_v54 = vpop.f32.mrf.mxu1 }
 0x19d   : > { %1553 = vadd.xlane.f32.xlu0 %v1552_v33  ;;  %v5344_v0 = vpop.f32.mrf.mxu0 }
 0x19e   : > { %v5362_v51 = vpop.f32.mrf.mxu1 }
 0x19f   : > { %v5346_v35 = vpop.f32.mrf.mxu0 }
 0x1a0   : > { %v5369_v2 = vpop.f32.mrf.mxu1 }
 0x1a1   : > { %v5350_v5 = vpop.f32.mrf.mxu0 }
 0x1a2   : > { %v5380_v12 = vpop.f32.mrf.mxu1 }
 0x1a3   : > { %v875_v41 = vpop.f32.mrf.mxu0 }
 0x1a4   : > { %v5358_v43 = vadd.f32 %v875_v41, %v5353_v39  ;;  %v5388_v34 = vpop.f32.mrf.mxu1 }
 0x1a5   : > { %v5360_v7 = vpop.f32.mrf.mxu0 }
 0x1a6   : > { %v5396_v62 = vpop.f32.mrf.mxu1 }
 0x1a7   : > { %v879_v45 = vpop.f32.mrf.mxu0 }
 0x1a8   : > { %v5365_v56 = vadd.f32 %v879_v45, %v5353_v39  ;;  %v5404_v19 = vpop.f32.mrf.mxu1 }
 0x1a9   : > { %v5367_v61 = vpop.f32.mrf.mxu0 }
 0x1aa   : > { %v5412_v29 = vpop.f32.mrf.mxu1 }
 0x1ab   : > { %v885_v63 = vpop.f32.mrf.mxu0 }
 0x1ac   : > { %v5375_v49 = vadd.f32 %v885_v63, %v5353_v39  ;;  %v5420_v45 = vpop.f32.mrf.mxu1 }
 0x1ad   : > { %v887_v6 = vpop.f32.mrf.mxu0 }
 0x1ae   : > { %v5378_v8 = vadd.f32 %v887_v6, %v5372_v48 }
 0x1af   : > { %v889_v10 = vpop.f32.mrf.mxu0 }
 0x1b0   : > { %v5383_v14 = vadd.f32 %v889_v10, %v5353_v39 }
 0x1b1   : > { %v891_v18 = vpop.f32.mrf.mxu0 }
 0x1b2   : > { %v5386_v28 = vadd.f32 %v891_v18, %v5372_v48 }
 0x1b3   : > { %v895_v32 = vpop.f32.mrf.mxu0 }
 0x1b4   : > { %v5391_v36 = vadd.f32 %v895_v32, %v5353_v39  ;;  %v5428_v32 = vpop.f32.mrf.mxu1 }
 0x1b5   : > { %v897_v24 = vpop.f32.mrf.mxu0 }
 0x1b6   : > { %v5394_v60 = vadd.f32 %v897_v24, %v5372_v48 }
 0x1b7   : > { %v899_v30 = vpop.f32.mrf.mxu0 }
 0x1b8   : > { %v5399_v4 = vadd.f32 %v899_v30, %v5353_v39 }
 0x1b9   : > { %v901_v15 = vpop.f32.mrf.mxu0 }
 0x1ba   : > { %v5402_v22 = vadd.f32 %v901_v15, %v5372_v48 }
 0x1bb   : > { %v905_v16 = vpop.f32.mrf.mxu0 }
 0x1bc   : > { %v5407_v26 = vadd.f32 %v905_v16, %v5353_v39 }
 0x1bd   : > { %v907_v52 = vpop.f32.mrf.mxu0 }
 0x1be   : > { %v5410_v25 = vadd.f32 %v907_v52, %v5372_v48  ;;  %v5436_v52 = vpop.f32.mrf.mxu1 }
 0x1bf   : > { %v909_v27 = vpop.f32.mrf.mxu0 }
 0x1c0   : > { %v5415_v31 = vadd.f32 %v909_v27, %v5353_v39 }
 0x1c1   : > { %v911_v33 = vpop.f32.mrf.mxu0 }
 0x1c2   : > { %6781 = vst [vmem:[#allocation30_spill] sm:$0xff] %v5415_v31  ;;  %v5418_v3 = vadd.f32 %v911_v33, %v5372_v48 }
 0x1c3   : > { %v915_v41 = vpop.f32.mrf.mxu0 }
 0x1c4   : > { %6782 = vst [vmem:[#allocation31_spill] sm:$0xff] %v5418_v3  ;;  %v5423_v63 = vadd.f32 %v915_v41, %v5353_v39 }
 0x1c5   : > { %v917_v6 = vpop.f32.mrf.mxu0 }
 0x1c6   : > { %6783 = vst [vmem:[#allocation32_spill] sm:$0xff] %v5423_v63  ;;  %v5426_v10 = vadd.f32 %v917_v6, %v5372_v48 }
 0x1c7   : > { %v919_v18 = vpop.f32.mrf.mxu0 }
 0x1c8   : > { %6784 = vst [vmem:[#allocation33_spill] sm:$0xff] %v5426_v10  ;;  %v5431_v24 = vadd.f32 %v919_v18, %v5353_v39  ;;  %v5444_v10 = vpop.f32.mrf.mxu1 }
 0x1c9   : > { %v921_v30 = vpop.f32.mrf.mxu0 }
 0x1ca   : > { %6785 = vst [vmem:[#allocation34_spill] sm:$0xff] %v5431_v24  ;;  %v5434_v15 = vadd.f32 %v921_v30, %v5372_v48  ;;  %v5464_v21 = vpop.f32.mrf.mxu1 }
 0x1cb   : > { %v2056_v16 = vpop.f32.mrf.mxu0 }
 0x1cc   : > { %6786 = vst [vmem:[#allocation35_spill] sm:$0xff] %v5434_v15  ;;  %v5439_v27 = vadd.f32 %v2056_v16, %v5286_v44  ;;  %v5455_v16 = vadd.f32 %v5342_v55, %v5286_v44  ;;  %v5488_v46 = vpop.f32.mrf.mxu1 }
 0x1cd   : > { %v2058_v33 = vpop.f32.mrf.mxu0 }
 0x1ce   : > { %6787 = vst [vmem:[#allocation36_spill] sm:$0xff] %v5439_v27  ;;  %v5442_v41 = vadd.f32 %v2058_v33, %v5289_v57  ;;  %v2135_v30 = vmul.f32 %v5439_v27, %v5439_v27  ;;  %6790 = vst [vmem:[#allocation39_spill] sm:$0xff] %v5455_v16  ;;  %v5459_v33 = vadd.f32 %v5348_v37, %v5289_v57  ;;  %v5512_v17 = vpop.f32.mrf.mxu1 }
 0x1cf   : > { %v2060_v6 = vpop.f32.mrf.mxu0  ;;  %v5475_v37 = vadd.f32 %v5355_v54, %v5286_v44 }
 0x1d0   : > { %6788 = vst [vmem:[#allocation37_spill] sm:$0xff] %v5442_v41  ;;  %v5447_v18 = vadd.f32 %v2060_v6, %v5286_v44  ;;  %v2136_v15 = vmul.f32 %v5442_v41, %v5442_v41  ;;  %6791 = vst [vmem:[#allocation40_spill] sm:$0xff] %v5459_v33 }
 0x1d1   : > { %v2062_v24 = vpop.f32.mrf.mxu0  ;;  %6794 = vst [vmem:[#allocation43_spill] sm:$0xff] %v5475_v37 }
 0x1d2   : > { %6789 = vst [vmem:[#allocation38_spill] sm:$0xff] %v5447_v18  ;;  %v5462_v63 = vadd.f32 %v2062_v24, %v5289_v57  ;;  %v2167_v6 = vadd.f32 %v2136_v15, %v2135_v30  ;;  %v2137_v27 = vmul.f32 %v5447_v18, %v5447_v18  ;;  %v5479_v24 = vadd.f32 %v5362_v51, %v5289_v57 }
 0x1d3   : > { %v2066_v3 = vpop.f32.mrf.mxu0  ;;  %v1520_v30 = vmul.f32 %v5455_v16, %v5455_v16  ;;  %v1521_v18 = vmul.f32 %v5459_v33, %v5459_v33  ;;  %v1522_v16 = vmul.f32 %v5475_v37, %v5475_v37 }
 0x1d4   : > { %6792 = vst [vmem:[#allocation41_spill] sm:$0xff] %v5462_v63  ;;  %v2138_v41 = vmul.f32 %v5462_v63, %v5462_v63  ;;  %v5471_v55 = vadd.f32 %v2066_v3, %v5286_v44  ;;  %2168 = vadd.xlane.f32.xlu1 %v2167_v6  ;;  %6795 = vst [vmem:[#allocation44_spill] sm:$0xff] %v5479_v24 }
 0x1d5   : > { %v2068_v15 = vpop.f32.mrf.mxu0 }
 0x1d6   : > { %6793 = vst [vmem:[#allocation42_spill] sm:$0xff] %v5471_v55  ;;  %v5486_v63 = vadd.f32 %v2068_v15, %v5289_v57  ;;  %v2170_v3 = vadd.f32 %v2138_v41, %v2137_v27  ;;  %v2139_v54 = vmul.f32 %v5471_v55, %v5471_v55  ;;  %v1523_v15 = vmul.f32 %v5479_v24, %v5479_v24 }
 0x1d7   : > { %v2070_v6 = vpop.f32.mrf.mxu0  ;;  %v5503_v27 = vadd.f32 %v5369_v2, %v5286_v44  ;;  %v5507_v55 = vadd.f32 %v5380_v12, %v5289_v57 }
 0x1d8   : > { %6796 = vst [vmem:[#allocation45_spill] sm:$0xff] %v5486_v63  ;;  %v2140_v51 = vmul.f32 %v5486_v63, %v5486_v63  ;;  %v5495_v31 = vadd.f32 %v2070_v6, %v5286_v44  ;;  %2171 = vadd.xlane.f32.xlu1 %v2170_v3  ;;  %v1555_v3 = vadd.f32 %v1521_v18, %v1520_v30 }
 0x1d9   : > { %6798 = vst [vmem:[#allocation47_spill] sm:$0xff] %v5503_v27  ;;  %v2072_v41 = vpop.f32.mrf.mxu0  ;;  %6799 = vst [vmem:[#allocation48_spill] sm:$0xff] %v5507_v55  ;;  %v1524_v12 = vmul.f32 %v5503_v27, %v5503_v27  ;;  %v5525_v18 = vadd.f32 %v5388_v34, %v5286_v44 }
 0x1da   : > { %6797 = vst [vmem:[#allocation46_spill] sm:$0xff] %v5495_v31  ;;  %v5510_v63 = vadd.f32 %v2072_v41, %v5289_v57  ;;  %v2173_v6 = vadd.f32 %v2140_v51, %v2139_v54  ;;  %v2141_v24 = vmul.f32 %v5495_v31, %v5495_v31  ;;  %v1558_v54 = vadd.f32 %v1523_v15, %v1522_v16  ;;  %v5536_v31 = vpop.f32.mrf.mxu1 }
 0x1db   : > { %v2076_v33 = vpop.f32.mrf.mxu0  ;;  %6802 = vst [vmem:[#allocation51_spill] sm:$0xff] %v5525_v18  ;;  %v1525_v51 = vmul.f32 %v5507_v55, %v5507_v55  ;;  %v5531_v41 = vadd.f32 %v5396_v62, %v5289_v57  ;;  %v1526_v62 = vmul.f32 %v5525_v18, %v5525_v18  ;;  %v3944_v55 = vld [vmem:[#allocation10 + $0x70] ss:$8 sps:$4 sm:$0xff]  }
 0x1dc   : > { %6800 = vst [vmem:[#allocation49_spill] sm:$0xff] %v5510_v63  ;;  %v2142_v2 = vmul.f32 %v5510_v63, %v5510_v63  ;;  %v5519_v37 = vadd.f32 %v2076_v33, %v5286_v44  ;;  %2174 = vadd.xlane.f32.xlu0 %v2173_v6  ;;  %1556 = vadd.xlane.f32.xlu1 %v1555_v3  ;;  %v5560_v18 = vpop.f32.mrf.mxu1 }
 0x1dd   : > { %v2078_v30 = vpop.f32.mrf.mxu0 }
 0x1de   : > { %6801 = vst [vmem:[#allocation50_spill] sm:$0xff] %v5519_v37  ;;  %v5534_v33 = vadd.f32 %v2078_v30, %v5289_v57  ;;  %v2176_v6 = vadd.f32 %v2142_v2, %v2141_v24  ;;  %v2143_v34 = vmul.f32 %v5519_v37, %v5519_v37  ;;  %v5549_v24 = vadd.f32 %v5404_v19, %v5286_v44 }
 0x1df   : > { %v2080_v3 = vpop.f32.mrf.mxu0  ;;  %v5553_v2 = vadd.f32 %v5412_v29, %v5289_v57  ;;  %v1527_v37 = vmul.f32 %v5531_v41, %v5531_v41 }
 0x1e0   : > { %6803 = vst [vmem:[#allocation52_spill] sm:$0xff] %v5534_v33  ;;  %v2144_v16 = vmul.f32 %v5534_v33, %v5534_v33  ;;  %v5543_v15 = vadd.f32 %v2080_v3, %v5286_v44  ;;  %1559 = vadd.xlane.f32.xlu0 %v1558_v54  ;;  %2177 = vadd.xlane.f32.xlu1 %v2176_v6  ;;  %6805 = vst [vmem:[#allocation54_spill] sm:$0xff] %v5549_v24  ;;  %v3946_v33 = vld [vmem:[#allocation10 + $0x74] ss:$8 sps:$4 sm:$0xff]  }
 0x1e1   : > { %6806 = vst [vmem:[#allocation55_spill] sm:$0xff] %v5553_v2  ;;  %v2082_v30 = vpop.f32.mrf.mxu0  ;;  %v1561_v6 = vadd.f32 %v1525_v51, %v1524_v12  ;;  %v1529_v12 = vmul.f32 %v5553_v2, %v5553_v2  ;;  %v5575_v51 = vadd.f32 %v5420_v45, %v5286_v44  ;;  %2963 = vmatprep.subr.bf16.mxu1 %v3946_v33  ;;  %v3947_v2 = vld [vmem:[#allocation10 + $0x60] ss:$8 sps:$4 sm:$0xff]  }
 0x1e2   : > { %6804 = vst [vmem:[#allocation53_spill] sm:$0xff] %v5543_v15  ;;  %v5558_v3 = vadd.f32 %v2082_v30, %v5289_v57  ;;  %v2179_v54 = vadd.f32 %v2144_v16, %v2143_v34  ;;  %v2145_v19 = vmul.f32 %v5543_v15, %v5543_v15  ;;  %v1528_v34 = vmul.f32 %v5549_v24, %v5549_v24  ;;  %v3949_v24 = vld [vmem:[#allocation10 + $0x64] ss:$8 sps:$4 sm:$0xff]  }
 0x1e3   : > { %v2086_v27 = vpop.f32.mrf.mxu0  ;;  %6809 = vst [vmem:[#allocation58_spill] sm:$0xff] %v5575_v51  ;;  %v5579_v30 = vadd.f32 %v5428_v32, %v5289_v57  ;;  %2964 = vmatpush1.bf16.msra.mxu1 %v3944_v55  ;;  %v5597_v55 = vadd.f32 %v5436_v52, %v5286_v44  ;;  %v3950_v52 = vld [vmem:[#allocation10 + $0x50] ss:$8 sps:$4 sm:$0xff]  }
 0x1e4   : > { %6807 = vst [vmem:[#allocation56_spill] sm:$0xff] %v5558_v3  ;;  %v2146_v29 = vmul.f32 %v5558_v3, %v5558_v3  ;;  %v5567_v63 = vadd.f32 %v2086_v27, %v5286_v44  ;;  %2180 = vadd.xlane.f32.xlu0 %v2179_v54  ;;  %1562 = vadd.xlane.f32.xlu1 %v1561_v6  ;;  %v5584_v3 = vpop.f32.mrf.mxu1 }
 0x1e5   : > { %v2088_v16 = vpop.f32.mrf.mxu0  ;;  %6810 = vst [vmem:[#allocation59_spill] sm:$0xff] %v5579_v30  ;;  %v1564_v54 = vadd.f32 %v1527_v37, %v1526_v62  ;;  %v1530_v37 = vmul.f32 %v5575_v51, %v5575_v51  ;;  %6812 = vst [vmem:[#allocation61_spill] sm:$0xff] %v5597_v55  ;;  %2965 = vmatprep.subr.bf16.mxu1 %v3949_v24 }
 0x1e6   : > { %6808 = vst [vmem:[#allocation57_spill] sm:$0xff] %v5567_v63  ;;  %v5582_v27 = vadd.f32 %v2088_v16, %v5289_v57  ;;  %v2182_v6 = vadd.f32 %v2146_v29, %v2145_v19  ;;  %v2147_v45 = vmul.f32 %v5567_v63, %v5567_v63  ;;  %v1567_v19 = vadd.f32 %v1529_v12, %v1528_v34  ;;  %v5608_v51 = vpop.f32.mrf.mxu1 }
 0x1e7   : > { %v2090_v15 = vpop.f32.mrf.mxu0  ;;  %v1531_v29 = vmul.f32 %v5579_v30, %v5579_v30  ;;  %v5603_v16 = vadd.f32 %v5444_v10, %v5289_v57  ;;  %2966 = vmatpush1.bf16.msra.mxu1 %v3947_v2  ;;  %v1532_v10 = vmul.f32 %v5597_v55, %v5597_v55  ;;  %v5621_v2 = vadd.f32 %v5464_v21, %v5286_v44  ;;  %v3953_v21 = vld [vmem:[#allocation10 + $0x40] ss:$8 sps:$4 sm:$0xff]  }
 0x1e8   : > { %v2148_v33 = vmul.f32 %v5582_v27, %v5582_v27  ;;  %v5591_v32 = vadd.f32 %v2090_v15, %v5286_v44  ;;  %1565 = vadd.xlane.f32.xlu0 %v1564_v54  ;;  %2183 = vadd.xlane.f32.xlu1 %v2182_v6  ;;  %v3952_v6 = vld [vmem:[#allocation10 + $0x54] ss:$8 sps:$4 sm:$0xff]   ;;  %v1501_v30 = vpop.f32.mrf.mxu1 }
 0x1e9   : > { %v2092_v62 = vpop.f32.mrf.mxu0  ;;  %6815 = vst [vmem:[#allocation64_spill] sm:$0xff] %v5621_v2  ;;  %2967 = vmatprep.subr.bf16.mxu1 %v3952_v6 }
 0x1ea   : > { %6811 = vst [vmem:[#allocation60_spill] sm:$0xff] %v5591_v32  ;;  %v5606_v15 = vadd.f32 %v2092_v62, %v5289_v57  ;;  %v2185_v54 = vadd.f32 %v2148_v33, %v2147_v45  ;;  %v2149_v24 = vmul.f32 %v5591_v32, %v5591_v32  ;;  %v5625_v45 = vadd.f32 %v5488_v46, %v5289_v57  ;;  %v3955_v32 = vld [vmem:[#allocation10 + $0x44] ss:$8 sps:$4 sm:$0xff]  }
 0x1eb   : > { %v2096_v63 = vpop.f32.mrf.mxu0  ;;  %v1533_v62 = vmul.f32 %v5603_v16, %v5603_v16  ;;  %2968 = vmatpush1.bf16.msra.mxu1 %v3950_v52  ;;  %v5645_v52 = vadd.f32 %v5512_v17, %v5286_v44 }
 0x1ec   : > { %6813 = vst [vmem:[#allocation62_spill] sm:$0xff] %v5606_v15  ;;  %v2150_v34 = vmul.f32 %v5606_v15, %v5606_v15  ;;  %v5615_v12 = vadd.f32 %v2096_v63, %v5286_v44  ;;  %2186 = vadd.xlane.f32.xlu0 %v2185_v54  ;;  %1568 = vadd.xlane.f32.xlu1 %v1567_v19  ;;  %6816 = vst [vmem:[#allocation65_spill] sm:$0xff] %v5625_v45 }
 0x1ed   : > { %v2098_v33 = vpop.f32.mrf.mxu0  ;;  %v1570_v19 = vadd.f32 %v1531_v29, %v1530_v37  ;;  %v1534_v37 = vmul.f32 %v5621_v2, %v5621_v2  ;;  %v1535_v29 = vmul.f32 %v5625_v45, %v5625_v45  ;;  %2969 = vmatprep.subr.bf16.mxu1 %v3955_v32  ;;  %v3956_v45 = vld [vmem:[#allocation10 + $0x30] ss:$8 sps:$4 sm:$0xff]  }
 0x1ee   : > { %6814 = vst [vmem:[#allocation63_spill] sm:$0xff] %v5615_v12  ;;  %v5630_v63 = vadd.f32 %v2098_v33, %v5289_v57  ;;  %v2188_v54 = vadd.f32 %v2150_v34, %v2149_v24  ;;  %v2151_v15 = vmul.f32 %v5615_v12, %v5615_v12  ;;  %v5649_v34 = vadd.f32 %v5536_v31, %v5289_v57 }
 0x1ef   : > { %v2100_v55 = vpop.f32.mrf.mxu0  ;;  %2970 = vmatpush1.bf16.msra.mxu1 %v3953_v21  ;;  %v1536_v31 = vmul.f32 %v5645_v52, %v5645_v52 }
 0x1f0   : > { %6817 = vst [vmem:[#allocation66_spill] sm:$0xff] %v5630_v63  ;;  %v2152_v46 = vmul.f32 %v5630_v63, %v5630_v63  ;;  %v5637_v6 = vadd.f32 %v2100_v55, %v5286_v44  ;;  %1571 = vadd.xlane.f32.xlu0 %v1570_v19  ;;  %2189 = vadd.xlane.f32.xlu1 %v2188_v54  ;;  %v3958_v54 = vld [vmem:[#allocation10 + $0x34] ss:$8 sps:$4 sm:$0xff]   ;;  %v1505_v63 = vpop.f32.mrf.mxu1 }
 0x1f1   : > { %v2102_v24 = vpop.f32.mrf.mxu0  ;;  %v1573_v19 = vadd.f32 %v1533_v62, %v1532_v10  ;;  %v1576_v62 = vadd.f32 %v1535_v29, %v1534_v37  ;;  %2971 = vmatprep.subr.bf16.mxu1 %v3958_v54  ;;  %v1537_v21 = vmul.f32 %v5649_v34, %v5649_v34 }
 0x1f2   : > { %6818 = vst [vmem:[#allocation67_spill] sm:$0xff] %v5637_v6  ;;  %v5652_v55 = vadd.f32 %v2102_v24, %v5289_v57  ;;  %v2191_v33 = vadd.f32 %v2152_v46, %v2151_v15  ;;  %v2153_v17 = vmul.f32 %v5637_v6, %v5637_v6  ;;  %v5665_v15 = vadd.f32 %v5560_v18, %v5286_v44  ;;  %v1507_v6 = vpop.f32.mrf.mxu1  ;;  %v3959_v18 = vld [vmem:[#allocation10 + $0x20] ss:$8 sps:$4 sm:$0xff]  }
 0x1f3   : > { %v2106_v12 = vpop.f32.mrf.mxu0  ;;  %v5671_v46 = vadd.f32 %v5584_v3, %v5289_v57  ;;  %2972 = vmatpush1.bf16.msra.mxu1 %v3956_v45  ;;  %v5687_v45 = vadd.f32 %v5608_v51, %v5286_v44 }
 0x1f4   : > { %6819 = vst [vmem:[#allocation68_spill] sm:$0xff] %v5652_v55  ;;  %v2154_v32 = vmul.f32 %v5652_v55, %v5652_v55  ;;  %v5659_v2 = vadd.f32 %v2106_v12, %v5286_v44  ;;  %2192 = vadd.xlane.f32.xlu0 %v2191_v33  ;;  %1574 = vadd.xlane.f32.xlu1 %v1573_v19  ;;  %6821 = vst [vmem:[#allocation70_spill] sm:$0xff] %v5665_v15  ;;  %v3961_v33 = vld [vmem:[#allocation10 + $0x24] ss:$8 sps:$4 sm:$0xff]   ;;  %v3962_v55 = vld [vmem:[#allocation10 + $0x10] ss:$8 sps:$4 sm:$0xff]  }
 0x1f5   : > { %v2108_v10 = vpop.f32.mrf.mxu0  ;;  %v1538_v3 = vmul.f32 %v5665_v15, %v5665_v15  ;;  %6824 = vst [vmem:[#allocation73_spill] sm:$0xff] %v5687_v45  ;;  %2973 = vmatprep.subr.bf16.mxu1 %v3961_v33 }
 0x1f6   : > { %6820 = vst [vmem:[#allocation69_spill] sm:$0xff] %v5659_v2  ;;  %v5674_v12 = vadd.f32 %v2108_v10, %v5289_v57  ;;  %v2194_v24 = vadd.f32 %v2154_v32, %v2153_v17  ;;  %v2155_v37 = vmul.f32 %v5659_v2, %v5659_v2  ;;  %v5690_v17 = vadd.f32 %v1501_v30, %v5289_v57  ;;  %v3964_v2 = vld [vmem:[#allocation10 + $0x14] ss:$8 sps:$4 sm:$0xff]  }
 0x1f7   : > { %v2110_v19 = vpop.f32.mrf.mxu0  ;;  %v1539_v10 = vmul.f32 %v5671_v46, %v5671_v46  ;;  %2974 = vmatpush1.bf16.msra.mxu1 %v3959_v18 }
 0x1f8   : > { %6822 = vst [vmem:[#allocation71_spill] sm:$0xff] %v5674_v12  ;;  %v2156_v29 = vmul.f32 %v5674_v12, %v5674_v12  ;;  %v5681_v54 = vadd.f32 %v2110_v19, %v5286_v44  ;;  %1577 = vadd.xlane.f32.xlu0 %v1576_v62  ;;  %2195 = vadd.xlane.f32.xlu1 %v2194_v24  ;;  %6825 = vst [vmem:[#allocation74_spill] sm:$0xff] %v5690_v17  ;;  %v1509_v12 = vpop.f32.mrf.mxu1 }
 0x1f9   : > { %v2112_v32 = vpop.f32.mrf.mxu0  ;;  %v1579_v24 = vadd.f32 %v1537_v21, %v1536_v31  ;;  %v1541_v31 = vmul.f32 %v5690_v17, %v5690_v17  ;;  %v5709_v21 = vadd.f32 %v1505_v63, %v5286_v44  ;;  %2975 = vmatprep.subr.bf16.mxu1 %v3964_v2 }
 0x1fa   : > { %6823 = vst [vmem:[#allocation72_spill] sm:$0xff] %v5681_v54  ;;  %v5695_v19 = vadd.f32 %v2112_v32, %v5289_v57  ;;  %v2197_v62 = vadd.f32 %v2156_v29, %v2155_v37  ;;  %v2157_v51 = vmul.f32 %v5681_v54, %v5681_v54  ;;  %v1540_v37 = vmul.f32 %v5687_v45, %v5687_v45  ;;  %v1511_v45 = vpop.f32.mrf.mxu1 }
 0x1fb   : > { %v2116_v15 = vpop.f32.mrf.mxu0  ;;  %6828 = vst [vmem:[#allocation77_spill] sm:$0xff] %v5709_v21  ;;  %v5712_v29 = vadd.f32 %v1507_v6, %v5289_v57  ;;  %2976 = vmatpush1.bf16.msra.mxu1 %v3962_v55  ;;  %v1542_v6 = vmul.f32 %v5709_v21, %v5709_v21  ;;  %v5727_v55 = vadd.f32 %v1509_v12, %v5286_v44 }
 0x1fc   : > { %6826 = vst [vmem:[#allocation75_spill] sm:$0xff] %v5695_v19  ;;  %v2158_v30 = vmul.f32 %v5695_v19, %v5695_v19  ;;  %v5702_v33 = vadd.f32 %v2116_v15, %v5286_v44  ;;  %2198 = vadd.xlane.f32.xlu0 %v2197_v62  ;;  %1580 = vadd.xlane.f32.xlu1 %v1579_v24  ;;  %v3967_v24 = vld [vmem:[#allocation10 + $0x4] ss:$8 sps:$4 sm:$0xff]   ;;  %v3965_v19 = vld [vmem:[#allocation10] ss:$8 sps:$4 sm:$0xff]  }
 0x1fd   : > { %v2118_v18 = vpop.f32.mrf.mxu0  ;;  %6829 = vst [vmem:[#allocation78_spill] sm:$0xff] %v5712_v29  ;;  %v1582_v15 = vadd.f32 %v1539_v10, %v1538_v3  ;;  %6832 = vst [vmem:[#allocation81_spill] sm:$0xff] %v5727_v55  ;;  %v1585_v10 = vadd.f32 %v1541_v31, %v1540_v37  ;;  %2977 = vmatprep.subr.bf16.mxu1 %v3967_v24 }
 0x1fe   : > { %6827 = vst [vmem:[#allocation76_spill] sm:$0xff] %v5702_v33  ;;  %v5715_v32 = vadd.f32 %v2118_v18, %v5289_v57  ;;  %v2200_v62 = vadd.f32 %v2158_v30, %v2157_v51  ;;  %v2159_v17 = vmul.f32 %v5702_v33, %v5702_v33  ;;  %v1543_v51 = vmul.f32 %v5712_v29, %v5712_v29  ;;  %v3968_v33 = vld [vmem:[#allocation10 + $0xf0] ss:$8 sps:$4 sm:$0xff]  }
 0x1ff   : > { %v2120_v54 = vpop.f32.mrf.mxu0  ;;  %v5732_v30 = vadd.f32 %v1511_v45, %v5289_v57  ;;  %2978 = vmatpush1.bf16.msra.mxu1 %v3965_v19  ;;  %v1544_v45 = vmul.f32 %v5727_v55, %v5727_v55 }
 0x200   : > { %6830 = vst [vmem:[#allocation79_spill] sm:$0xff] %v5715_v32  ;;  %v2160_v63 = vmul.f32 %v5715_v32, %v5715_v32  ;;  %v5722_v2 = vadd.f32 %v2120_v54, %v5286_v44  ;;  %1583 = vadd.xlane.f32.xlu0 %v1582_v15  ;;  %2201 = vadd.xlane.f32.xlu1 %v2200_v62  ;;  %v3970_v15 = vld [vmem:[#allocation10 + $0xf4] ss:$8 sps:$4 sm:$0xff]  }
 0x201   : > { %v2122_v3 = vpop.f32.mrf.mxu0  ;;  %6833 = vst [vmem:[#allocation82_spill] sm:$0xff] %v5732_v30  ;;  %2979 = vmatprep.subr.bf16.mxu1 %v3970_v15 }
 0x202   : > { %6831 = vst [vmem:[#allocation80_spill] sm:$0xff] %v5722_v2  ;;  %v5735_v54 = vadd.f32 %v2122_v3, %v5289_v57  ;;  %v2203_v18 = vadd.f32 %v2160_v63, %v2159_v17  ;;  %v2161_v12 = vmul.f32 %v5722_v2, %v5722_v2  ;;  %v1545_v17 = vmul.f32 %v5732_v30, %v5732_v30  ;;  %v3973_v2 = vld [vmem:[#allocation10 + $0xe4] ss:$8 sps:$4 sm:$0xff]  }
 0x203   : > { %v2126_v62 = vpop.f32.mrf.mxu0  ;;  %v1588_v63 = vadd.f32 %v1543_v51, %v1542_v6  ;;  %2980 = vmatpush2.bf16.msra.mxu1 %v3968_v33 }
 0x204   : > { %6834 = vst [vmem:[#allocation83_spill] sm:$0xff] %v5735_v54  ;;  %v2162_v37 = vmul.f32 %v5735_v54, %v5735_v54  ;;  %v5742_v31 = vadd.f32 %v2126_v62, %v5286_v44  ;;  %2204 = vadd.xlane.f32.xlu0 %v2203_v18  ;;  %1586 = vadd.xlane.f32.xlu1 %v1585_v10  ;;  %v3971_v62 = vld [vmem:[#allocation10 + $0xe0] ss:$8 sps:$4 sm:$0xff]  }
 0x205   : > { %v2128_v24 = vpop.f32.mrf.mxu0  ;;  %2981 = vmatprep.subr.bf16.mxu1 %v3973_v2  ;;  %v1591_v51 = vadd.f32 %v1545_v17, %v1544_v45  ;;  %v3977_v2 = vld [vmem:[#allocation10 + $0xc0] ss:$8 sps:$4 sm:$0xff]   ;;  %v846_v45 = vadd.f32 %v5291_v58, %v5353_v39  ;;  %v848_v17 = vadd.f32 %v5296_v40, %v5372_v48  ;;  %v856_v40 = vadd.f32 %v5317_v50, %v5353_v39 }
 0x206   : > { %6835 = vst [vmem:[#allocation84_spill] sm:$0xff] %v5742_v31  ;;  %v5749_v19 = vadd.f32 %v2128_v24, %v5289_v57  ;;  %v2206_v3 = vadd.f32 %v2162_v37, %v2161_v12  ;;  %v2163_v10 = vmul.f32 %v5742_v31, %v5742_v31  ;;  %v3976_v12 = vld [vmem:[#allocation10 + $0xd4] ss:$8 sps:$4 sm:$0xff]   ;;  %v3974_v37 = vld [vmem:[#allocation10 + $0xd0] ss:$8 sps:$4 sm:$0xff]   ;;  %v862_v50 = vadd.f32 %v5335_v1, %v5372_v48 }
 0x207   : > { %v2130_v29 = vpop.f32.mrf.mxu0  ;;  %2982 = vmatpush2.bf16.msra.mxu1 %v3971_v62  ;;  %v3451_v62 = vmul.f32 -1.442695, %v846_v45 }
 0x208   : > { %6836 = vst [vmem:[#allocation85_spill] sm:$0xff] %v5749_v19  ;;  %v2164_v18 = vmul.f32 %v5749_v19, %v5749_v19  ;;  %v5756_v15 = vadd.f32 %v2130_v29, %v5286_v44  ;;  %1589 = vadd.xlane.f32.xlu0 %v1588_v63  ;;  %2207 = vadd.xlane.f32.xlu1 %v2206_v3  ;;  %v3979_v29 = vld [vmem:[#allocation10 + $0xc4] ss:$8 sps:$4 sm:$0xff]   ;;  %v3983_v3 = vld [vmem:[#allocation10 + $0xa0] ss:$8 sps:$4 sm:$0xff]  }
 0x209   : > { %v2132_v55 = vpop.f32.mrf.mxu0  ;;  %2983 = vmatprep.subr.bf16.mxu1 %v3976_v12  ;;  %v3985_v63 = vld [vmem:[#allocation10 + $0xa4] ss:$8 sps:$4 sm:$0xff]   ;;  %3992 = vpow2.f32 %v3451_v62  ;;  %v3458_v45 = vmul.f32 -1.442695, %v862_v50  ;;  %v870_v62 = vadd.f32 %v5346_v35, %v5353_v39 }
 0x20a   : > { %6837 = vst [vmem:[#allocation86_spill] sm:$0xff] %v5756_v15  ;;  %v5759_v6 = vadd.f32 %v2132_v55, %v5289_v57  ;;  %v2209_v33 = vadd.f32 %v2164_v18, %v2163_v10  ;;  %v2165_v24 = vmul.f32 %v5756_v15, %v5756_v15  ;;  %v3982_v57 = vld [vmem:[#allocation10 + $0xb4] ss:$8 sps:$4 sm:$0xff]   ;;  %v3980_v55 = vld [vmem:[#allocation10 + $0xb0] ss:$8 sps:$4 sm:$0xff]   ;;  %v852_v18 = vadd.f32 %v5308_v13, %v5372_v48 }
 0x20b   : > { %2984 = vmatpush2.bf16.msra.mxu1 %v3974_v37  ;;  %v3452_v10 = vmul.f32 -1.442695, %v848_v17  ;;  %v3991_v37 = vld [vmem:[#allocation10 + $0x84] ss:$8 sps:$4 sm:$0xff]   ;;  %v3455_v13 = vmul.f32 -1.442695, %v856_v40  ;;  %v868_v17 = vadd.f32 %v5344_v0, %v5372_v48  ;;  %v878_v40 = vadd.f32 %v5360_v7, %v5372_v48 }
 0x20c   : > { %6838 = vst [vmem:[#allocation87_spill] sm:$0xff] %v5759_v6  ;;  %v2166_v31 = vmul.f32 %v5759_v6, %v5759_v6  ;;  %2210 = vadd.xlane.f32.xlu0 %v2209_v33  ;;  %1592 = vadd.xlane.f32.xlu1 %v1591_v51  ;;  %v3988_v33 = vld [vmem:[#allocation10 + $0x94] ss:$8 sps:$4 sm:$0xff]   ;;  %v3986_v51 = vld [vmem:[#allocation10 + $0x90] ss:$8 sps:$4 sm:$0xff]  }
 0x20d   : > { %2985 = vmatprep.subr.bf16.mxu1 %v3979_v29  ;;  %3994 = vpow2.f32 %v3452_v10  ;;  %v3454_v12 = vmul.f32 -1.442695, %v852_v18  ;;  %v3460_v1 = vmul.f32 -1.442695, %v868_v17  ;;  %v3465_v7 = vmul.f32 -1.442695, %v5365_v56 }
 0x20e   : > { %v2212_v44 = vadd.f32 %v2166_v31, %v2165_v24  ;;  %v850_v31 = vadd.f32 %v5301_v9, %v5353_v39  ;;  %v858_v9 = vadd.f32 %v5324_v23, %v5372_v48  ;;  %v3989_v24 = vld [vmem:[#allocation10 + $0x80] ss:$8 sps:$4 sm:$0xff]   ;;  %v866_v23 = vadd.f32 %v5340_v53, %v5353_v39 }
 0x20f   : > { %2986 = vmatpush2.bf16.msra.mxu1 %v3977_v2 }
 0x210   : > { %2213 = vadd.xlane.f32.xlu1 %v2212_v44  ;;  %2987 = vmatprep.subr.bf16.mxu1 %v3982_v57  ;;  %v3453_v58 = vmul.f32 -1.442695, %v850_v31  ;;  %v860_v44 = vadd.f32 %v5331_v47, %v5353_v39  ;;  %v3456_v29 = vmul.f32 -1.442695, %v858_v9 }
 0x212   : > { %3996 = vpow2.f32 %v3453_v58  ;;  %v3457_v2 = vmul.f32 -1.442695, %v860_v44 }
 0x213   : > { %2988 = vmatpush2.bf16.msra.mxu1 %v3980_v55  ;;  %3998 = vpow2.f32 %v3454_v12 }
 0x214   : > { %2989 = vmatprep.subr.bf16.mxu1 %v3985_v63  ;;  %4000 = vpow2.f32 %v3455_v13  ;;  %v882_v13 = vadd.f32 %v5367_v61, %v5372_v48 }
 0x215   : > { %4002 = vpow2.f32 %v3456_v29 }
 0x216   : > { %v3993_v57 = vpop.eup %3992  ;;  %4004 = vpow2.f32 %v3457_v2 }
 0x217   : > { %2990 = vmatpush2.bf16.msra.mxu1 %v3983_v3  ;;  %v1020_v47 = vadd.f32 1.0, %v3993_v57  ;;  %v3459_v3 = vmul.f32 -1.442695, %v866_v23  ;;  %4006 = vpow2.f32 %v3458_v45  ;;  %v3466_v57 = vmul.f32 -1.442695, %v882_v13 }
 0x218   : > { %2991 = vmatprep.subr.bf16.mxu1 %v3988_v33  ;;  %v872_v33 = vadd.f32 %v5350_v5, %v5372_v48  ;;  %v3467_v23 = vmul.f32 -1.442695, %v5375_v49  ;;  %v3468_v48 = vmul.f32 -1.442695, %v5378_v8  ;;  %v3473_v13 = vmul.f32 -1.442695, %v5399_v4 }
 0x219   : > { %4008 = vrcp.f32 %v1020_v47  ;;  %v3475_v4 = vmul.f32 -1.442695, %v5407_v26 }
 0x21a   : > { %v3995_v55 = vpop.eup %3994  ;;  %4010 = vpow2.f32 %v3459_v3  ;;  %v3462_v35 = vmul.f32 -1.442695, %v872_v33  ;;  %v3469_v3 = vmul.f32 -1.442695, %v5383_v14  ;;  %v3471_v33 = vmul.f32 -1.442695, %v5391_v36 }
 0x21b   : > { %2992 = vmatpush2.bf16.msra.mxu1 %v3986_v51  ;;  %v1021_v10 = vadd.f32 1.0, %v3995_v55  ;;  %v3461_v51 = vmul.f32 -1.442695, %v870_v62  ;;  %v3472_v36 = vmul.f32 -1.442695, %v5394_v60 }
 0x21c   : > { %2993 = vmatprep.subr.bf16.mxu1 %v3991_v37  ;;  %v3463_v37 = vmul.f32 -1.442695, %v5358_v43 }
 0x21d   : > { %4012 = vrcp.f32 %v1021_v10  ;;  %v3470_v10 = vmul.f32 -1.442695, %v5386_v28 }
 0x21e   : > { %v1548_v31 = vpop.xlane.xlu0 %1547  ;;  %4014 = vpow2.f32 %v3460_v1 }
 0x21f   : > { %2994 = vmatpush2.bf16.msra.mxu1 %v3989_v24  ;;  %v3997_v63 = vpop.eup %3996  ;;  %v3464_v24 = vmul.f32 -1.442695, %v878_v40  ;;  %v1595_v29 = vmul.f32 0.00390625, %v1548_v31 }
 0x220   : > { %v3999_v18 = vpop.eup %3998  ;;  %v1022_v53 = vadd.f32 1.0, %v3997_v63 }
 0x221   : > { %v4001_v58 = vpop.eup %4000  ;;  %v1023_v0 = vadd.f32 1.0, %v3999_v18  ;;  %v1611_v45 = vadd.f32 0.001, %v1595_v29 }
 0x222   : > { %v1551_v39 = vpop.xlane.xlu0 %1550  ;;  %v4003_v12 = vpop.eup %4002  ;;  %4016 = vrcp.f32 %v1022_v53  ;;  %v1024_v9 = vadd.f32 1.0, %v4001_v58 }
 0x223   : > { %4018 = vpow2.f32 %v3461_v51  ;;  %v4005_v5 = vpop.eup %4004  ;;  %v1025_v44 = vadd.f32 1.0, %v4003_v12  ;;  %v1596_v43 = vmul.f32 0.00390625, %v1551_v39 }
 0x224   : > { %4020 = vrcp.f32 %v1023_v0  ;;  %v1026_v2 = vadd.f32 1.0, %v4005_v5  ;;  %v4007_v55 = vpop.eup %4006 }
 0x225   : > { %4022 = vpow2.f32 %v3462_v35  ;;  %v1612_v47 = vadd.f32 0.001, %v1596_v43  ;;  %v1027_v1 = vadd.f32 1.0, %v4007_v55 }
 0x226   : > { %4024 = vpow2.f32 %v3463_v37  ;;  %v1554_v50 = vpop.xlane.xlu0 %1553  ;;  %v5796_v61 = vpop.eup %4008 }
 0x227   : > { %4026 = vrcp.f32 %v1024_v9  ;;  %v1597_v17 = vmul.f32 0.00390625, %v1554_v50  ;;  %v4011_v56 = vpop.eup %4010  ;;  %v1116_v50 = vld [vmem:[%s6652_s6] sm:$0x3] }
 0x228   : > { %4028 = vpow2.f32 %v3464_v24  ;;  %v1028_v51 = vadd.f32 1.0, %v4011_v56 }
 0x229   : > { %4030 = vrcp.f32 %v1025_v44  ;;  %v1613_v49 = vadd.f32 0.001, %v1597_v17 }
 0x22a   : > { %4032 = vpow2.f32 %v3465_v7  ;;  %v5799_v63 = vpop.eup %4012 }
 0x22b   : > { %4034 = vrcp.f32 %v1026_v2  ;;  %v4015_v62 = vpop.eup %4014  ;;  %v3474_v2 = vmul.f32 -1.442695, %v5402_v22 }
 0x22c   : > { %4036 = vpow2.f32 %v3466_v57  ;;  %v1029_v58 = vadd.f32 1.0, %v4015_v62  ;;  %v3476_v62 = vmul.f32 -1.442695, %v5410_v25 }
 0x22d   : > { %4038 = vpow2.f32 %v3467_v23 }
 0x22e   : > { %4040 = vrsqrt.f32 %v1611_v45  ;;  %v5822_v45 = vrot.slane %v1116_v50, %v5281_v38 }
 0x22f   : > { %v5802_v31 = vpop.eup %4016  ;;  %4042 = vpow2.f32 %v3468_v48 }
 0x230   : > { %v4019_v18 = vpop.eup %4018  ;;  %4044 = vrsqrt.f32 %v1612_v47  ;;  %v5827_v47 = vrot.slane %v1116_v50, %v5283_v42 }
 0x231   : > { %v5805_v8 = vpop.eup %4020  ;;  %4046 = vpow2.f32 %v3469_v3  ;;  %v1030_v40 = vadd.f32 1.0, %v4019_v18  ;;  %v6841_v18 = vld [vmem:[#allocation27_spill] sm:$0xff] }
 0x232   : > { %v4023_v53 = vpop.eup %4022  ;;  %4048 = vrsqrt.f32 %v1613_v49 }
 0x233   : > { %v4025_v14 = vpop.eup %4024  ;;  %4050 = vpow2.f32 %v3470_v10  ;;  %v1031_v28 = vadd.f32 1.0, %v4023_v53 }
 0x234   : > { %v5808_v0 = vpop.eup %4026  ;;  %4052 = vrcp.f32 %v1027_v1  ;;  %v1032_v12 = vadd.f32 1.0, %v4025_v14 }
 0x235   : > { %6839 = vst [vmem:[#allocation88_spill] sm:$0xff] %v5808_v0  ;;  %v4029_v35 = vpop.eup %4028  ;;  %4054 = vpow2.f32 %v3471_v33  ;;  %v6842_v33 = vld [vmem:[#allocation30_spill] sm:$0xff] }
 0x236   : > { %v5810_v39 = vpop.eup %4030  ;;  %4056 = vrcp.f32 %v1028_v51  ;;  %v1033_v5 = vadd.f32 1.0, %v4029_v35  ;;  %v3477_v53 = vmul.f32 -1.442695, %v6842_v33  ;;  %v6843_v51 = vld [vmem:[#allocation29_spill] sm:$0xff] }
 0x237   : > { %v4033_v37 = vpop.eup %4032  ;;  %4058 = vrcp.f32 %v1029_v58 }
 0x238   : > { %v5813_v9 = vpop.eup %4034  ;;  %4060 = vrcp.f32 %v1030_v40  ;;  %v1034_v7 = vadd.f32 1.0, %v4033_v37 }
 0x239   : > { %6840 = vst [vmem:[#allocation89_spill] sm:$0xff] %v5813_v9  ;;  %v4037_v24 = vpop.eup %4036  ;;  %4062 = vrcp.f32 %v1031_v28 }
 0x23a   : > { %v4039_v44 = vpop.eup %4038  ;;  %4064 = vrcp.f32 %v1032_v12  ;;  %v1035_v57 = vadd.f32 1.0, %v4037_v24  ;;  %v6847_v12 = vld [vmem:[#allocation31_spill] sm:$0xff] }
 0x23b   : > { %v4041_v29 = vpop.eup %4040  ;;  %4066 = vpow2.f32 %v3472_v36  ;;  %v1036_v23 = vadd.f32 1.0, %v4039_v44  ;;  %v3478_v37 = vmul.f32 -1.442695, %v6847_v12 }
 0x23c   : > { %v4043_v60 = vpop.eup %4042  ;;  %4068 = vrcp.f32 %v1033_v5  ;;  %v1643_v17 = vmul.f32 %v4041_v29, %v5294_v59  ;;  %v1644_v56 = vmul.f32 %v4041_v29, %v5299_v20 }
 0x23d   : > { %v4045_v43 = vpop.eup %4044  ;;  %4070 = vpow2.f32 %v3473_v13  ;;  %v1037_v48 = vadd.f32 1.0, %v4043_v60 }
 0x23e   : > { %v4047_v55 = vpop.eup %4046  ;;  %4072 = vrcp.f32 %v1034_v7  ;;  %v1645_v49 = vmul.f32 %v4045_v43, %v5306_v11  ;;  %v1646_v59 = vmul.f32 %v4045_v43, %v6841_v18  ;;  %v5836_v20 = vmul.f32 %v5822_v45, %v1643_v17  ;;  %v6845_v11 = vld [vmem:[#allocation28_spill] sm:$0xff] }
 0x23f   : > { %v4049_v22 = vpop.eup %4048  ;;  %4074 = vpow2.f32 %v3474_v2  ;;  %v1038_v10 = vadd.f32 1.0, %v4047_v55  ;;  %v5843_v35 = vmul.f32 %v5827_v47, %v1644_v56 }
 0x240   : > { %v4051_v3 = vpop.eup %4050  ;;  %4076 = vrcp.f32 %v1035_v57  ;;  %v1648_v14 = vmul.f32 %v4049_v22, %v6843_v51  ;;  %v1647_v40 = vmul.f32 %v4049_v22, %v6845_v11  ;;  %v5849_v36 = vmul.f32 %v5822_v45, %v1645_v49  ;;  %v6856_v51 = vld [vmem:[#allocation33_spill] sm:$0xff] }
 0x241   : > { %v5831_v26 = vpop.eup %4052  ;;  %4078 = vrcp.f32 %v1036_v23  ;;  %v1039_v25 = vadd.f32 1.0, %v4051_v3  ;;  %v5854_v13 = vmul.f32 %v5827_v47, %v1646_v59  ;;  %v3531_v7 = vmul.f32 -1.442695, %v5836_v20 }
 0x242   : > { %v4055_v1 = vpop.eup %4054  ;;  %4080 = vpow2.f32 %v3475_v4  ;;  %v5860_v29 = vmul.f32 %v5827_v47, %v1648_v14  ;;  %v3532_v50 = vmul.f32 -1.442695, %v5843_v35  ;;  %v5866_v60 = vmul.f32 %v5822_v45, %v1647_v40 }
 0x243   : > { %v5839_v58 = vpop.eup %4056  ;;  %4082 = vrcp.f32 %v1037_v48  ;;  %v1040_v24 = vadd.f32 1.0, %v4055_v1  ;;  %v3533_v43 = vmul.f32 -1.442695, %v5849_v36  ;;  %v3534_v55 = vmul.f32 -1.442695, %v5854_v13 }
 0x244   : > { %6844 = vst [vmem:[#allocation27_spill] sm:$0xff] %v5839_v58  ;;  %v5845_v28 = vpop.eup %4058  ;;  %4084 = vpow2.f32 %v3476_v62  ;;  %v3536_v17 = vmul.f32 -1.442695, %v5860_v29  ;;  %v3535_v56 = vmul.f32 -1.442695, %v5866_v60 }
 0x245   : > { %6846 = vst [vmem:[#allocation30_spill] sm:$0xff] %v5845_v28  ;;  %v5851_v5 = vpop.eup %4060  ;;  %4086 = vrcp.f32 %v1038_v10  ;;  %v6854_v10 = vld [vmem:[#allocation32_spill] sm:$0xff]  ;;  %v3480_v14 = vmul.f32 -1.442695, %v6856_v51 }
 0x246   : > { %6848 = vst [vmem:[#allocation29_spill] sm:$0xff] %v5851_v5  ;;  %v5856_v44 = vpop.eup %4062  ;;  %4088 = vpow2.f32 %v3477_v53  ;;  %v3479_v18 = vmul.f32 -1.442695, %v6854_v10 }
 0x247   : > { %6849 = vst [vmem:[#allocation28_spill] sm:$0xff] %v5856_v44  ;;  %v5862_v2 = vpop.eup %4064  ;;  %4090 = vrcp.f32 %v1039_v25 }
 0x248   : > { %6850 = vst [vmem:[#allocation31_spill] sm:$0xff] %v5862_v2  ;;  %v4067_v57 = vpop.eup %4066  ;;  %4092 = vpow2.f32 %v3478_v37 }
 0x249   : > { %v5869_v23 = vpop.eup %4068  ;;  %4094 = vrcp.f32 %v1040_v24  ;;  %v1041_v1 = vadd.f32 1.0, %v4067_v57 }
 0x24a   : > { %6851 = vst [vmem:[#allocation90_spill] sm:$0xff] %v5869_v23  ;;  %v4071_v4 = vpop.eup %4070  ;;  %4096 = vpow2.f32 %v3531_v7  ;;  %v6859_v7 = vld [vmem:[#allocation34_spill] sm:$0xff] }
 0x24b   : > { %v5873_v22 = vpop.eup %4072  ;;  %4098 = vpow2.f32 %v3532_v50  ;;  %v1042_v37 = vadd.f32 1.0, %v4071_v4  ;;  %v3481_v50 = vmul.f32 -1.442695, %v6859_v7 }
 0x24c   : > { %6852 = vst [vmem:[#allocation91_spill] sm:$0xff] %v5873_v22  ;;  %v4075_v3 = vpop.eup %4074  ;;  %4100 = vpow2.f32 %v3533_v43 }
 0x24d   : > { %v5876_v49 = vpop.eup %4076  ;;  %4102 = vpow2.f32 %v3534_v55  ;;  %v1043_v55 = vadd.f32 1.0, %v4075_v3 }
 0x24e   : > { %6853 = vst [vmem:[#allocation92_spill] sm:$0xff] %v5876_v49  ;;  %v5879_v59 = vpop.eup %4078  ;;  %4104 = vpow2.f32 %v3536_v17 }
 0x24f   : > { %6855 = vst [vmem:[#allocation32_spill] sm:$0xff] %v5879_v59  ;;  %v4081_v53 = vpop.eup %4080  ;;  %4106 = vpow2.f32 %v3535_v56 }
 0x250   : > { %v5882_v11 = vpop.eup %4082  ;;  %v1044_v3 = vadd.f32 1.0, %v4081_v53 }
 0x251   : > { %6857 = vst [vmem:[#allocation33_spill] sm:$0xff] %v5882_v11  ;;  %v4085_v12 = vpop.eup %4084 }
 0x252   : > { %v5884_v24 = vpop.eup %4086  ;;  %v1045_v38 = vadd.f32 1.0, %v4085_v12 }
 0x253   : > { %6858 = vst [vmem:[#allocation93_spill] sm:$0xff] %v5884_v24  ;;  %v5887_v43 = vpop.eup %4088 }
 0x254   : > { %6860 = vst [vmem:[#allocation34_spill] sm:$0xff] %v5887_v43  ;;  %v5889_v56 = vpop.eup %4090 }
 0x255   : > { %6861 = vst [vmem:[#allocation94_spill] sm:$0xff] %v5889_v56 }
 0x25d   : > { %v2169_v48 = vpop.xlane.xlu1 %2168 }
 0x25e   : > { %v2215_v62 = vmul.f32 0.00390625, %v2169_v48 }
 0x260   : > { %v2231_v33 = vadd.f32 0.001, %v2215_v62 }
 0x261   : > { %v2172_v25 = vpop.xlane.xlu1 %2171 }
 0x262   : > { %4108 = vrsqrt.f32 %v2231_v33  ;;  %v2216_v40 = vmul.f32 0.00390625, %v2172_v25  ;;  %v4093_v33 = vpop.eup %4092 }
 0x263   : > { %4110 = vpow2.f32 %v3479_v18  ;;  %v5891_v4 = vpop.eup %4094  ;;  %v6863_v18 = vld [vmem:[#allocation35_spill] sm:$0xff] }
 0x264   : > { %4112 = vrcp.f32 %v1041_v1  ;;  %v2232_v57 = vadd.f32 0.001, %v2216_v40  ;;  %6862 = vst [vmem:[#allocation95_spill] sm:$0xff] %v5891_v4  ;;  %v3482_v1 = vmul.f32 -1.442695, %v6863_v18  ;;  %v4097_v40 = vpop.eup %4096 }
 0x265   : > { %4114 = vpow2.f32 %v3480_v14  ;;  %v2175_v17 = vpop.xlane.xlu0 %2174  ;;  %v1557_v48 = vpop.xlane.xlu1 %1556 }
 0x266   : > { %4116 = vrsqrt.f32 %v2232_v57  ;;  %v2217_v62 = vmul.f32 0.00390625, %v2175_v17  ;;  %v1598_v10 = vmul.f32 0.00390625, %v1557_v48  ;;  %v4099_v42 = vpop.eup %4098  ;;  %v1047_v17 = vadd.f32 1.0, %v4093_v33  ;;  %v6865_v33 = vld [vmem:[#allocation36_spill] sm:$0xff] }
 0x267   : > { %4118 = vrcp.f32 %v1042_v37  ;;  %v4101_v57 = vpop.eup %4100  ;;  %v1814_v37 = vadd.f32 1.0, %v4097_v40 }
 0x268   : > { %4120 = vpow2.f32 %v3481_v50  ;;  %v2233_v51 = vadd.f32 0.001, %v2217_v62  ;;  %v1614_v25 = vadd.f32 0.001, %v1598_v10  ;;  %v4103_v48 = vpop.eup %4102  ;;  %v1815_v62 = vadd.f32 1.0, %v4099_v42 }
 0x269   : > { %4122 = vrcp.f32 %v1043_v55  ;;  %v1560_v14 = vpop.xlane.xlu0 %1559  ;;  %v2178_v7 = vpop.xlane.xlu1 %2177  ;;  %v1816_v55 = vadd.f32 1.0, %v4101_v57  ;;  %v1817_v12 = vadd.f32 1.0, %v4103_v48 }
 0x26a   : > { %4124 = vrsqrt.f32 %v2233_v51  ;;  %v4105_v4 = vpop.eup %4104  ;;  %v1599_v53 = vmul.f32 0.00390625, %v1560_v14  ;;  %v2218_v15 = vmul.f32 0.00390625, %v2178_v7 }
 0x26b   : > { %4126 = vrsqrt.f32 %v1614_v25  ;;  %v4107_v10 = vpop.eup %4106  ;;  %v1819_v24 = vadd.f32 1.0, %v4105_v4 }
 0x26c   : > { %4128 = vpow2.f32 %v3482_v1  ;;  %v6866_v1 = vld [vmem:[#allocation37_spill] sm:$0xff]  ;;  %v1615_v14 = vadd.f32 0.001, %v1599_v53 }
 0x26d   : > { %4130 = vrcp.f32 %v1044_v3  ;;  %v2181_v50 = vpop.xlane.xlu0 %2180  ;;  %v1563_v18 = vpop.xlane.xlu1 %1562 }
 0x26e   : > { %4132 = vrcp.f32 %v1045_v38  ;;  %v1818_v38 = vadd.f32 1.0, %v4107_v10  ;;  %v2219_v7 = vmul.f32 0.00390625, %v2181_v50 }
 0x26f   : > { %v4109_v43 = vpop.eup %4108  ;;  %4134 = vrcp.f32 %v1047_v17 }
 0x270   : > { %v5894_v51 = vpop.eup %4110  ;;  %4136 = vrcp.f32 %v1814_v37  ;;  %v2263_v25 = vmul.f32 %v4109_v43, %v6865_v33  ;;  %v2264_v40 = vmul.f32 %v4109_v43, %v6866_v1  ;;  %v2234_v37 = vadd.f32 0.001, %v2218_v15  ;;  %v6870_v1 = vld [vmem:[#allocation38_spill] sm:$0xff] }
 0x271   : > { %6864 = vst [vmem:[#allocation35_spill] sm:$0xff] %v5894_v51  ;;  %v5898_v3 = vpop.eup %4112  ;;  %v1566_v59 = vpop.xlane.xlu0 %1565  ;;  %4138 = vrcp.f32 %v1815_v62  ;;  %v1600_v33 = vmul.f32 0.00390625, %v1563_v18  ;;  %v6871_v51 = vld [vmem:[#allocation41_spill] sm:$0xff] }
 0x272   : > { %6867 = vst [vmem:[#allocation36_spill] sm:$0xff] %v5898_v3  ;;  %v2184_v42 = vpop.xlane.xlu1 %2183  ;;  %v5900_v57 = vpop.eup %4114  ;;  %4140 = vrcp.f32 %v1816_v55  ;;  %v5903_v17 = vmul.f32 %v2263_v25, %v5822_v45  ;;  %v5906_v43 = vmul.f32 %v2264_v40, %v5827_v47  ;;  %v1601_v10 = vmul.f32 0.00390625, %v1566_v59 }
 0x273   : > { %6868 = vst [vmem:[#allocation37_spill] sm:$0xff] %v5900_v57  ;;  %v4117_v48 = vpop.eup %4116  ;;  %4142 = vrcp.f32 %v1817_v12  ;;  %v2235_v12 = vadd.f32 0.001, %v2219_v7  ;;  %v2220_v40 = vmul.f32 0.00390625, %v2184_v42 }
 0x274   : > { %v5908_v4 = vpop.eup %4118  ;;  %v2265_v62 = vmul.f32 %v4117_v48, %v6870_v1  ;;  %v2266_v57 = vmul.f32 %v4117_v48, %v6871_v51  ;;  %4144 = vrcp.f32 %v1819_v24  ;;  %v3579_v25 = vmul.f32 -1.442695, %v5903_v17 }
 0x275   : > { %6869 = vst [vmem:[#allocation96_spill] sm:$0xff] %v5908_v4  ;;  %v5912_v55 = vpop.eup %4120  ;;  %v2187_v50 = vpop.xlane.xlu0 %2186  ;;  %v3580_v15 = vmul.f32 -1.442695, %v5906_v43  ;;  %4146 = vrcp.f32 %v1818_v38  ;;  %v1616_v24 = vadd.f32 0.001, %v1600_v33 }
 0x276   : > { %6872 = vst [vmem:[#allocation38_spill] sm:$0xff] %v5912_v55  ;;  %v1569_v53 = vpop.xlane.xlu1 %1568  ;;  %v5916_v18 = vpop.eup %4122  ;;  %4148 = vrsqrt.f32 %v1615_v14  ;;  %v5919_v1 = vmul.f32 %v2265_v62, %v5822_v45  ;;  %v2221_v51 = vmul.f32 0.00390625, %v2187_v50  ;;  %v1617_v55 = vadd.f32 0.001, %v1601_v10  ;;  %v6877_v50 = vld [vmem:[#allocation45_spill] sm:$0xff] }
 0x277   : > { %6873 = vst [vmem:[#allocation41_spill] sm:$0xff] %v5916_v18  ;;  %v5921_v59 = vpop.eup %4124  ;;  %4150 = vrsqrt.f32 %v2234_v37  ;;  %v5924_v4 = vmul.f32 %v2266_v57, %v5827_v47  ;;  %v6875_v18 = vld [vmem:[#allocation40_spill] sm:$0xff]  ;;  %v2236_v37 = vadd.f32 0.001, %v2220_v40  ;;  %v1602_v33 = vmul.f32 0.00390625, %v1569_v53 }
 0x278   : > { %v4127_v48 = vpop.eup %4126  ;;  %4152 = vpow2.f32 %v3579_v25  ;;  %v3581_v62 = vmul.f32 -1.442695, %v5919_v1  ;;  %v2268_v10 = vmul.f32 %v5921_v59, %v6877_v50  ;;  %v2237_v25 = vadd.f32 0.001, %v2221_v51 }
 0x279   : > { %v5926_v38 = vpop.eup %4128  ;;  %v1650_v14 = vmul.f32 %v4127_v48, %v6875_v18  ;;  %v1572_v7 = vpop.xlane.xlu0 %1571  ;;  %4154 = vpow2.f32 %v3580_v15 }
 0x27a   : > { %6874 = vst [vmem:[#allocation97_spill] sm:$0xff] %v5926_v38  ;;  %v2190_v42 = vpop.xlane.xlu1 %2189  ;;  %v5930_v3 = vpop.eup %4130  ;;  %4156 = vrsqrt.f32 %v2235_v12  ;;  %v1603_v38 = vmul.f32 0.00390625, %v1572_v7  ;;  %v5944_v7 = vmul.f32 %v2268_v10, %v5827_v47 }
 0x27b   : > { %6876 = vst [vmem:[#allocation40_spill] sm:$0xff] %v5930_v3  ;;  %v5934_v57 = vpop.eup %4132  ;;  %4158 = vrsqrt.f32 %v1616_v24  ;;  %v5937_v18 = vmul.f32 %v5827_v47, %v1650_v14  ;;  %v2222_v15 = vmul.f32 0.00390625, %v2190_v42  ;;  %v3582_v3 = vmul.f32 -1.442695, %v5924_v4 }
 0x27c   : > { %6878 = vst [vmem:[#allocation45_spill] sm:$0xff] %v5934_v57  ;;  %v5939_v6 = vpop.eup %4134  ;;  %4160 = vrsqrt.f32 %v1617_v55  ;;  %v1618_v24 = vadd.f32 0.001, %v1602_v33  ;;  %v3584_v33 = vmul.f32 -1.442695, %v5944_v7 }
 0x27d   : > { %6879 = vst [vmem:[#allocation98_spill] sm:$0xff] %v5939_v6  ;;  %v4137_v12 = vpop.eup %4136  ;;  %v2193_v40 = vpop.xlane.xlu0 %2192  ;;  %4162 = vpow2.f32 %v3581_v62  ;;  %v3538_v50 = vmul.f32 -1.442695, %v5937_v18  ;;  %v1619_v6 = vadd.f32 0.001, %v1603_v38 }
 0x27e   : > { %v1575_v53 = vpop.xlane.xlu1 %1574  ;;  %v4139_v19 = vpop.eup %4138  ;;  %4164 = vrsqrt.f32 %v2236_v37  ;;  %v2223_v51 = vmul.f32 0.00390625, %v2193_v40  ;;  %v2238_v57 = vadd.f32 0.001, %v2222_v15  ;;  %v6880_v15 = vld [vmem:[#allocation39_spill] sm:$0xff] }
 0x27f   : > { %v4141_v14 = vpop.eup %4140  ;;  %4166 = vrsqrt.f32 %v2237_v25  ;;  %v1604_v55 = vmul.f32 0.00390625, %v1575_v53 }
 0x280   : > { %v4143_v42 = vpop.eup %4142  ;;  %4168 = vpow2.f32 %v3582_v3  ;;  %v2239_v11 = vadd.f32 0.001, %v2223_v51  ;;  %v1649_v3 = vmul.f32 %v4127_v48, %v6880_v15 }
 0x281   : > { %v4145_v56 = vpop.eup %4144  ;;  %v1578_v22 = vpop.xlane.xlu0 %1577  ;;  %4170 = vpow2.f32 %v3538_v50  ;;  %v1620_v40 = vadd.f32 0.001, %v1604_v55  ;;  %v5951_v50 = vmul.f32 %v4137_v12, %v5836_v20  ;;  %v5962_v20 = vmul.f32 %v4143_v42, %v5854_v13 }
 0x282   : > { %v2196_v62 = vpop.xlane.xlu1 %2195  ;;  %v5946_v2 = vpop.eup %4146  ;;  %4172 = vrsqrt.f32 %v1618_v24  ;;  %v1605_v37 = vmul.f32 0.00390625, %v1578_v22 }
 0x283   : > { %v4149_v10 = vpop.eup %4148  ;;  %4174 = vrsqrt.f32 %v1619_v6  ;;  %v2224_v25 = vmul.f32 0.00390625, %v2196_v62 }
 0x284   : > { %v4151_v38 = vpop.eup %4150  ;;  %4176 = vrsqrt.f32 %v2238_v57  ;;  %v1621_v51 = vadd.f32 0.001, %v1605_v37  ;;  %v5956_v57 = vmul.f32 %v4139_v19, %v5843_v35  ;;  %v5959_v37 = vmul.f32 %v4141_v14, %v5849_v36  ;;  %v6881_v19 = vld [vmem:[#allocation49_spill] sm:$0xff] }
 0x285   : > { %v4153_v53 = vpop.eup %4152  ;;  %4178 = vrsqrt.f32 %v2239_v11  ;;  %v2199_v30 = vpop.xlane.xlu0 %2198  ;;  %v2240_v55 = vadd.f32 0.001, %v2224_v25  ;;  %v2270_v35 = vmul.f32 %v4151_v38, %v6881_v19 }
 0x286   : > { %v1581_v21 = vpop.xlane.xlu1 %1580  ;;  %v4155_v24 = vpop.eup %4154  ;;  %v2225_v22 = vmul.f32 0.00390625, %v2199_v30  ;;  %v2423_v32 = vadd.f32 1.0, %v4153_v53  ;;  %4180 = vpow2.f32 %v3584_v33  ;;  %v5967_v33 = vmul.f32 %v4145_v56, %v5860_v29 }
 0x287   : > { %v1606_v54 = vmul.f32 0.00390625, %v1581_v21  ;;  %v5953_v6 = vpop.eup %4156  ;;  %4182 = vrsqrt.f32 %v1620_v40  ;;  %v2424_v48 = vadd.f32 1.0, %v4155_v24  ;;  %v5971_v40 = vmul.f32 %v5822_v45, %v1649_v3  ;;  %v6884_v24 = vld [vmem:[#allocation42_spill] sm:$0xff] }
 0x288   : > { %v4159_v11 = vpop.eup %4158  ;;  %v2241_v62 = vadd.f32 0.001, %v2225_v22  ;;  %4184 = vrcp.f32 %v2423_v32  ;;  %v6883_v32 = vld [vmem:[#allocation43_spill] sm:$0xff]  ;;  %v2267_v29 = vmul.f32 %v5921_v59, %v6884_v24  ;;  %v6885_v22 = vld [vmem:[#allocation44_spill] sm:$0xff] }
 0x289   : > { %v5964_v21 = vpop.eup %4160  ;;  %v1584_v30 = vpop.xlane.xlu0 %1583  ;;  %4186 = vrcp.f32 %v2424_v48  ;;  %6882 = vst [vmem:[#allocation39_spill] sm:$0xff] %v5971_v40  ;;  %v1622_v36 = vadd.f32 0.001, %v1606_v54  ;;  %v5976_v53 = vmul.f32 %v4149_v10, %v6883_v32  ;;  %v1652_v3 = vmul.f32 %v4149_v10, %v6885_v22 }
 0x28a   : > { %v2202_v12 = vpop.xlane.xlu1 %2201  ;;  %v4163_v25 = vpop.eup %4162  ;;  %4188 = vrsqrt.f32 %v1621_v51  ;;  %v1607_v14 = vmul.f32 0.00390625, %v1584_v30  ;;  %v6886_v51 = vld [vmem:[#allocation46_spill] sm:$0xff] }
 0x28b   : > { %v2226_v13 = vmul.f32 0.00390625, %v2202_v12  ;;  %v5973_v42 = vpop.eup %4164  ;;  %4190 = vrsqrt.f32 %v2240_v55  ;;  %v2425_v15 = vadd.f32 1.0, %v4163_v25  ;;  %v2269_v54 = vmul.f32 %v4151_v38, %v6886_v51  ;;  %v6887_v12 = vld [vmem:[#allocation48_spill] sm:$0xff] }
 0x28c   : > { %v5980_v56 = vpop.eup %4166  ;;  %4192 = vrsqrt.f32 %v2241_v62  ;;  %v1623_v48 = vadd.f32 0.001, %v1607_v14  ;;  %v1654_v19 = vmul.f32 %v4159_v11, %v6887_v12  ;;  %v5986_v55 = vmul.f32 %v2270_v35, %v5827_v47 }
 0x28d   : > { %v4169_v30 = vpop.eup %4168  ;;  %v2242_v49 = vadd.f32 0.001, %v2226_v13  ;;  %v2205_v23 = vpop.xlane.xlu0 %2204  ;;  %4194 = vrcp.f32 %v2425_v15  ;;  %v3537_v38 = vmul.f32 -1.442695, %v5971_v40  ;;  %v5992_v14 = vmul.f32 %v2267_v29, %v5822_v45 }
 0x28e   : > { %v1587_v32 = vpop.xlane.xlu1 %1586  ;;  %v4171_v25 = vpop.eup %4170  ;;  %4196 = vrsqrt.f32 %v1622_v36  ;;  %v2227_v59 = vmul.f32 0.00390625, %v2205_v23  ;;  %v2426_v5 = vadd.f32 1.0, %v4169_v30  ;;  %v5997_v35 = vmul.f32 %v2269_v54, %v5822_v45 }
 0x28f   : > { %v1608_v24 = vmul.f32 0.00390625, %v1587_v32  ;;  %v5988_v10 = vpop.eup %4172  ;;  %4198 = vrsqrt.f32 %v1623_v48  ;;  %v1821_v62 = vadd.f32 1.0, %v4171_v25  ;;  %v3586_v48 = vmul.f32 -1.442695, %v5986_v55  ;;  %v6891_v32 = vld [vmem:[#allocation47_spill] sm:$0xff] }
 0x290   : > { %v5994_v13 = vpop.eup %4174  ;;  %v2243_v15 = vadd.f32 0.001, %v2227_v59  ;;  %4200 = vrcp.f32 %v2426_v5  ;;  %6888 = vst [vmem:[#allocation49_spill] sm:$0xff] %v5997_v35  ;;  %v6003_v30 = vmul.f32 %v5827_v47, %v1652_v3  ;;  %v6006_v29 = vmul.f32 %v5827_v47, %v1654_v19  ;;  %v6892_v3 = vld [vmem:[#allocation52_spill] sm:$0xff] }
 0x291   : > { %v1624_v22 = vadd.f32 0.001, %v1608_v24  ;;  %v5999_v23 = vpop.eup %4176  ;;  %4202 = vrsqrt.f32 %v2242_v49  ;;  %v1590_v36 = vpop.xlane.xlu0 %1589  ;;  %v1653_v5 = vmul.f32 %v4159_v11, %v6891_v32  ;;  %v6013_v49 = vmul.f32 %v5964_v21, %v5531_v41  ;;  %v6893_v32 = vld [vmem:[#allocation56_spill] sm:$0xff] }
 0x292   : > { %v2208_v51 = vpop.xlane.xlu1 %2207  ;;  %6889 = vst [vmem:[#allocation43_spill] sm:$0xff] %v6003_v30  ;;  %6890 = vst [vmem:[#allocation42_spill] sm:$0xff] %v6006_v29  ;;  %v6008_v12 = vpop.eup %4178  ;;  %v1609_v25 = vmul.f32 0.00390625, %v1590_v36  ;;  %4204 = vrcp.f32 %v1821_v62  ;;  %v3583_v24 = vmul.f32 -1.442695, %v5992_v14  ;;  %v2272_v58 = vmul.f32 %v5953_v6, %v6892_v3 }
 0x293   : > { %v2228_v54 = vmul.f32 0.00390625, %v2208_v51  ;;  %v4181_v59 = vpop.eup %4180  ;;  %4206 = vrsqrt.f32 %v2243_v15  ;;  %v3585_v11 = vmul.f32 -1.442695, %v5997_v35  ;;  %v3540_v41 = vmul.f32 -1.442695, %v6003_v30 }
 0x294   : > { %v6018_v19 = vpop.eup %4182  ;;  %4208 = vrsqrt.f32 %v1624_v22  ;;  %v1625_v44 = vadd.f32 0.001, %v1609_v25  ;;  %v3542_v15 = vmul.f32 -1.442695, %v6006_v29  ;;  %v2274_v9 = vmul.f32 %v5973_v42, %v6893_v32 }
 0x295   : > { %v2244_v28 = vadd.f32 0.001, %v2228_v54  ;;  %v4185_v36 = vpop.eup %4184  ;;  %v2211_v62 = vpop.xlane.xlu0 %2210  ;;  %4210 = vpow2.f32 %v3586_v48  ;;  %v2428_v25 = vadd.f32 1.0, %v4181_v59  ;;  %v6030_v48 = vmul.f32 %v2272_v58, %v5827_v47 }
 0x296   : > { %v1593_v51 = vpop.xlane.xlu1 %1592  ;;  %v4187_v0 = vpop.eup %4186  ;;  %v2229_v3 = vmul.f32 0.00390625, %v2211_v62  ;;  %v2519_v22 = vmul.f32 %v4185_v36, %v5903_v17  ;;  %4212 = vrsqrt.f32 %v1625_v44  ;;  %v6034_v29 = vmul.f32 %v5822_v45, %v5976_v53  ;;  %v6895_v36 = vld [vmem:[#allocation55_spill] sm:$0xff] }
 0x297   : > { %v1610_v40 = vmul.f32 0.00390625, %v1593_v51  ;;  %v6026_v54 = vpop.eup %4188  ;;  %v2520_v35 = vmul.f32 %v4187_v0, %v5906_v43  ;;  %4214 = vrsqrt.f32 %v2244_v28  ;;  %v1658_v44 = vmul.f32 %v5988_v10, %v6895_v36 }
 0x298   : > { %v6036_v30 = vpop.eup %4190  ;;  %v2245_v62 = vadd.f32 0.001, %v2229_v3  ;;  %v2551_v17 = vsub.f32 %v5951_v50, %v2519_v22  ;;  %4216 = vpow2.f32 %v3537_v38  ;;  %v6045_v43 = vmul.f32 %v2274_v9, %v5827_v47 }
 0x299   : > { %v1626_v51 = vadd.f32 0.001, %v1610_v40  ;;  %v6039_v59 = vpop.eup %4192  ;;  %v2552_v58 = vsub.f32 %v5956_v57, %v2520_v35  ;;  %4218 = vrcp.f32 %v2428_v25  ;;  %v6896_v40 = vld [vmem:[#allocation50_spill] sm:$0xff]  ;;  %v3588_v57 = vmul.f32 -1.442695, %v6030_v48 }
 0x29a   : > { %6894 = vst [vmem:[#allocation44_spill] sm:$0xff] %v6039_v59  ;;  %v2214_v0 = vpop.xlane.xlu1 %2213  ;;  %v4195_v53 = vpop.eup %4194  ;;  %v2583_v28 = vmul.f32 %v5796_v61, %v2551_v17  ;;  %v2271_v50 = vmul.f32 %v5953_v6, %v6896_v40  ;;  %4220 = vrsqrt.f32 %v2245_v62  ;;  %v6897_v61 = vld [vmem:[#allocation53_spill] sm:$0xff] }
 0x29b   : > { %v2230_v32 = vmul.f32 0.00390625, %v2214_v0  ;;  %v6050_v3 = vpop.eup %4196  ;;  %v2521_v36 = vmul.f32 %v4195_v53, %v5919_v1  ;;  %v2584_v59 = vmul.f32 %v5799_v63, %v2552_v58  ;;  %4222 = vrsqrt.f32 %v1626_v51 }
 0x29c   : > { %v6055_v38 = vpop.eup %4198  ;;  %v6057_v0 = vadd.f32 %v2583_v28, %v2519_v22  ;;  %v2273_v25 = vmul.f32 %v5973_v42, %v6897_v61  ;;  %4224 = vpow2.f32 %v3583_v24  ;;  %v6063_v1 = vmul.f32 %v5822_v45, %v1653_v5  ;;  %v6898_v28 = vld [vmem:[#allocation62_spill] sm:$0xff] }
 0x29d   : > { %v2246_v9 = vadd.f32 0.001, %v2230_v32  ;;  %v4201_v17 = vpop.eup %4200  ;;  %v2553_v6 = vsub.f32 %v5959_v37, %v2521_v36  ;;  %v2616_v40 = vadd.f32 %v2584_v59, %v2520_v35  ;;  %v3590_v22 = vmul.f32 -1.442695, %v6045_v43 }
 0x29e   : > { %v6065_v63 = vpop.eup %4202  ;;  %v2522_v62 = vmul.f32 %v4201_v17, %v5924_v4  ;;  %v6070_v51 = vmul.f32 %v2271_v50, %v5822_v45  ;;  %v3539_v5 = vmul.f32 -1.442695, %v6034_v29  ;;  %v6081_v4 = vmul.f32 %v2273_v25, %v5822_v45  ;;  %v6899_v17 = vld [vmem:[#allocation51_spill] sm:$0xff] }
 0x29f   : > { %4226 = vrsqrt.f32 %v2246_v9  ;;  %v6072_v42 = vpop.eup %4204  ;;  %v2585_v37 = vmul.f32 %v5802_v31, %v2553_v6  ;;  %v3689_v35 = vpack.c.bf16 %v2616_v40, %v6057_v0  ;;  %v2276_v58 = vmul.f32 %v5980_v56, %v5582_v27 }
 0x2a0   : > { %4228 = vpow2.f32 %v3585_v11  ;;  %v6077_v24 = vpop.eup %4206  ;;  %v2554_v59 = vsub.f32 %v5962_v20, %v2522_v62  ;;  %v3541_v31 = vmul.f32 -1.442695, %v6063_v1  ;;  %v6094_v20 = vmul.f32 %v5827_v47, %v6013_v49 }
 0x2a1   : > { %4230 = vpow2.f32 %v3540_v41  ;;  %v6085_v53 = vpop.eup %4208  ;;  %v2617_v32 = vadd.f32 %v2585_v37, %v2521_v36  ;;  %2743 = vst [vmem:[%s6088_s4] sm:$0xff] %v3689_v35  ;;  %v3587_v27 = vmul.f32 -1.442695, %v6070_v51  ;;  %v2278_v50 = vmul.f32 %v5999_v23, %v6898_v28 }
 0x2a2   : > { %4232 = vpow2.f32 %v3542_v15  ;;  %v4211_v11 = vpop.eup %4210  ;;  %v2586_v41 = vmul.f32 %v5805_v8, %v2554_v59  ;;  %v6102_v15 = vmul.f32 %v5827_v47, %v1658_v44  ;;  %v3589_v25 = vmul.f32 -1.442695, %v6081_v4  ;;  %v6900_v59 = vld [vmem:[#allocation54_spill] sm:$0xff] }
 0x2a3   : > { %4234 = vpow2.f32 %v3588_v57  ;;  %v2647_v36 = vpack.c.bf16 %v2617_v32, %v6057_v0  ;;  %v2430_v9 = vadd.f32 1.0, %v4211_v11  ;;  %v6104_v61 = vpop.eup %4212  ;;  %v6108_v8 = vmul.f32 %v2276_v58, %v5827_v47 }
 0x2a4   : > { %4236 = vpow2.f32 %v3590_v22  ;;  %v2618_v49 = vadd.f32 %v2586_v41, %v2522_v62  ;;  %v6110_v57 = vpop.eup %4214  ;;  %v1655_v6 = vmul.f32 %v5964_v21, %v6899_v17  ;;  %v6116_v44 = vmul.f32 %v5946_v2, %v5866_v60  ;;  %v6902_v2 = vld [vmem:[#allocation58_spill] sm:$0xff]  ;;  %v6906_v17 = vld [vmem:[#allocation65_spill] sm:$0xff] }
 0x2a5   : > { %4238 = vpow2.f32 %v3539_v5  ;;  %v3544_v0 = vmul.f32 -1.442695, %v6094_v20  ;;  %v4217_v62 = vpop.eup %4216  ;;  %v6120_v35 = vmul.f32 %v2278_v50, %v5827_v47  ;;  %v1657_v58 = vmul.f32 %v5988_v10, %v6900_v59  ;;  %v6904_v10 = vld [vmem:[#allocation61_spill] sm:$0xff] }
 0x2a6   : > { %4240 = vrcp.f32 %v2430_v9  ;;  %v2648_v22 = vpack.c.bf16 %v2618_v49, %v2616_v40  ;;  %v3690_v37 = vpack.c.bf16 %v2618_v49, %v2617_v32  ;;  %v4219_v5 = vpop.eup %4218  ;;  %v1820_v21 = vadd.f32 1.0, %v4217_v62  ;;  %v6903_v40 = vld [vmem:[#allocation59_spill] sm:$0xff]  ;;  %v6905_v9 = vld [vmem:[#allocation64_spill] sm:$0xff] }
 0x2a7   : > { %4242 = vpow2.f32 %v3541_v31  ;;  %v3546_v11 = vmul.f32 -1.442695, %v6102_v15  ;;  %v6125_v41 = vpop.eup %4220  ;;  %v6129_v60 = vmul.f32 %v5994_v13, %v6902_v2  ;;  %v1660_v32 = vmul.f32 %v5994_v13, %v6903_v40 }
 0x2a8   : > { %4244 = vpow2.f32 %v3587_v27  ;;  %6901 = vst [vmem:[#allocation46_spill] sm:$0xff] %v6125_v41  ;;  %2744 = vst [vmem:[%s6088_s4 + $0x8] sm:$0xff] %v3690_v37  ;;  %2995 = vmatprep.mubr.bf16.mxu1 %v2648_v22  ;;  %v3592_v31 = vmul.f32 -1.442695, %v6108_v8  ;;  %v6135_v28 = vpop.eup %4222  ;;  %v6139_v27 = vmul.f32 %v6018_v19, %v6904_v10  ;;  %v1662_v50 = vmul.f32 %v6018_v19, %v5603_v16  ;;  %v6907_v22 = vld [vmem:[#allocation57_spill] sm:$0xff] }
 0x2a9   : > { %4246 = vpow2.f32 %v3589_v25  ;;  %v6145_v49 = vmul.f32 %v6026_v54, %v6905_v9  ;;  %2996 = vmatmul.mubr.bf16.vlgmr.msra.gmra.mxu1 %v2647_v36  ;;  %v4225_v13 = vpop.eup %4224  ;;  %v6149_v25 = vmul.f32 %v6026_v54, %v6906_v17  ;;  %v3594_v62 = vmul.f32 -1.442695, %v6120_v35  ;;  %v6910_v17 = vld [vmem:[#allocation66_spill] sm:$0xff] }
 0x2aa   : > { %4248 = vrcp.f32 %v1820_v21  ;;  %v2275_v37 = vmul.f32 %v5980_v56, %v6907_v22  ;;  %v2524_v16 = vmul.f32 %v4219_v5, %v5944_v7  ;;  %v2427_v19 = vadd.f32 1.0, %v4225_v13  ;;  %v6909_v56 = vld [vmem:[#allocation60_spill] sm:$0xff] }
 0x2ab   : > { %4250 = vpow2.f32 %v3544_v0  ;;  %v6158_v36 = vmul.f32 %v5822_v45, %v1655_v6  ;;  %v6162_v54 = vmul.f32 %v6050_v3, %v5645_v52  ;;  %v6166_v0 = vmul.f32 %v6050_v3, %v5649_v34 }
 0x2ac   : > { %v6154_v59 = vpop.eup %4226  ;;  %4252 = vpow2.f32 %v3546_v11  ;;  %v2277_v2 = vmul.f32 %v5999_v23, %v6909_v56  ;;  %v6172_v7 = vmul.f32 %v6055_v38, %v5671_v46  ;;  %v6175_v5 = vmul.f32 %v5822_v45, %v1657_v58 }
 0x2ad   : > { %6908 = vst [vmem:[#allocation48_spill] sm:$0xff] %v6154_v59  ;;  %v4229_v21 = vpop.eup %4228  ;;  %4254 = vpow2.f32 %v3592_v31  ;;  %v1917_v11 = vmul.f32 %v6072_v42, %v5937_v18  ;;  %v6180_v3 = vmul.f32 %v2275_v37, %v5822_v45  ;;  %v2556_v31 = vsub.f32 %v5967_v33, %v2524_v16 }
 0x2ae   : > { %v4231_v40 = vpop.eup %4230  ;;  %v2429_v6 = vadd.f32 1.0, %v4229_v21  ;;  %4256 = vrcp.f32 %v2427_v19  ;;  %v3543_v10 = vmul.f32 -1.442695, %v6158_v36  ;;  %v6185_v13 = vmul.f32 %v2277_v2, %v5822_v45 }
 0x2af   : > { %v4233_v52 = vpop.eup %4232  ;;  %v1823_v34 = vadd.f32 1.0, %v4231_v40  ;;  %4258 = vpow2.f32 %v3594_v62  ;;  %v2280_v18 = vmul.f32 %v6008_v12, %v6910_v17  ;;  %v3545_v22 = vmul.f32 -1.442695, %v6175_v5 }
 0x2b0   : > { %v4235_v23 = vpop.eup %4234  ;;  %4260 = vrcp.f32 %v2429_v6  ;;  %v1825_v46 = vadd.f32 1.0, %v4233_v52  ;;  %v6191_v33 = vmul.f32 %v5827_v47, %v1660_v32  ;;  %v3591_v21 = vmul.f32 -1.442695, %v6180_v3  ;;  %v6911_v52 = vld [vmem:[#allocation68_spill] sm:$0xff] }
 0x2b1   : > { %v4237_v9 = vpop.eup %4236  ;;  %4262 = vrcp.f32 %v1823_v34  ;;  %v2432_v58 = vadd.f32 1.0, %v4235_v23  ;;  %v6195_v56 = vmul.f32 %v5827_v47, %v1662_v50  ;;  %v2588_v6 = vmul.f32 %v5810_v39, %v2556_v31 }
 0x2b2   : > { %v4239_v42 = vpop.eup %4238  ;;  %4264 = vrcp.f32 %v1825_v46  ;;  %v2434_v62 = vadd.f32 1.0, %v4237_v9  ;;  %v2282_v34 = vmul.f32 %v6036_v30, %v6911_v52  ;;  %v3593_v46 = vmul.f32 -1.442695, %v6185_v13 }
 0x2b3   : > { %v4241_v37 = vpop.eup %4240  ;;  %4266 = vrcp.f32 %v2432_v58  ;;  %v1822_v19 = vadd.f32 1.0, %v4239_v42  ;;  %v6203_v9 = vmul.f32 %v2280_v18, %v5827_v47  ;;  %v3548_v42 = vmul.f32 -1.442695, %v6191_v33 }
 0x2b4   : > { %v4243_v2 = vpop.eup %4242  ;;  %v2526_v40 = vmul.f32 %v4241_v37, %v5986_v55  ;;  %4268 = vrcp.f32 %v2434_v62  ;;  %v6207_v55 = vmul.f32 %v5822_v45, %v6129_v60  ;;  %v3550_v62 = vmul.f32 -1.442695, %v6195_v56 }
 0x2b5   : > { %v4245_v23 = vpop.eup %4244  ;;  %v1824_v32 = vadd.f32 1.0, %v4243_v2  ;;  %4270 = vrcp.f32 %v1822_v19  ;;  %v6212_v18 = vadd.f32 %v2588_v6, %v2524_v16  ;;  %v3596_v2 = vmul.f32 -1.442695, %v6203_v9 }
 0x2b6   : > { %v4247_v58 = vpop.eup %4246  ;;  %v2558_v50 = vsub.f32 %v1917_v11, %v2526_v40  ;;  %v2431_v17 = vadd.f32 1.0, %v4245_v23  ;;  %4272 = vpow2.f32 %v3543_v10  ;;  %6912 = vst [vmem:[#allocation47_spill] sm:$0xff] %v6207_v55  ;;  %v6215_v11 = vmul.f32 %v2282_v34, %v5827_v47  ;;  %v6914_v34 = vld [vmem:[#allocation63_spill] sm:$0xff] }
 0x2b7   : > { %v4249_v39 = vpop.eup %4248  ;;  %4274 = vrcp.f32 %v1824_v32  ;;  %v2433_v31 = vadd.f32 1.0, %v4247_v58  ;;  %v6220_v52 = vmul.f32 %v5822_v45, %v6139_v27 }
 0x2b8   : > { %v4251_v37 = vpop.eup %4250  ;;  %v2590_v19 = vmul.f32 %v5831_v26, %v2558_v50  ;;  %4276 = vrcp.f32 %v2431_v17  ;;  %v6225_v26 = vmul.f32 -1.442695, %v6207_v55  ;;  %v2279_v50 = vmul.f32 %v6008_v12, %v6914_v34  ;;  %v6915_v17 = vld [vmem:[#allocation67_spill] sm:$0xff] }
 0x2b9   : > { %v4253_v10 = vpop.eup %4252  ;;  %4278 = vrcp.f32 %v2433_v31  ;;  %v1827_v60 = vadd.f32 1.0, %v4251_v37  ;;  %6913 = vst [vmem:[#allocation52_spill] sm:$0xff] %v6220_v52  ;;  %v2281_v31 = vmul.f32 %v6036_v30, %v6915_v17  ;;  %v3549_v12 = vmul.f32 -1.442695, %v6220_v52  ;;  %v6916_v30 = vld [vmem:[#allocation39_spill] sm:$0xff]  ;;  %v6917_v17 = vld [vmem:[#allocation49_spill] sm:$0xff] }
 0x2ba   : > { %v4255_v23 = vpop.eup %4254  ;;  %v6222_v32 = vadd.f32 %v2590_v19, %v2526_v40  ;;  %v1829_v58 = vadd.f32 1.0, %v4253_v10  ;;  %4280 = vpow2.f32 %v3545_v22  ;;  %v6236_v22 = vmul.f32 %v5827_v47, %v6149_v25  ;;  %v6921_v52 = vld [vmem:[#allocation89_spill] sm:$0xff] }
 0x2bb   : > { %v4257_v16 = vpop.eup %4256  ;;  %4282 = vrcp.f32 %v1827_v60  ;;  %v2436_v6 = vadd.f32 1.0, %v4255_v23  ;;  %v3598_v60 = vmul.f32 -1.442695, %v6215_v11  ;;  %v1916_v34 = vmul.f32 %v4249_v39, %v6916_v30  ;;  %v6918_v39 = vld [vmem:[#allocation88_spill] sm:$0xff] }
 0x2bc   : > { %v4259_v37 = vpop.eup %4258  ;;  %v2650_v27 = vpack.c.bf16 %v6222_v32, %v6212_v18  ;;  %v2523_v40 = vmul.f32 %v4257_v16, %v5992_v14  ;;  %4284 = vrcp.f32 %v1829_v58  ;;  %v6244_v25 = vmul.f32 %v2279_v50, %v5822_v45  ;;  %v6920_v50 = vld [vmem:[#allocation42_spill] sm:$0xff] }
 0x2bd   : > { %v4261_v19 = vpop.eup %4260  ;;  %v2438_v10 = vadd.f32 1.0, %v4259_v37  ;;  %4286 = vrcp.f32 %v2436_v6  ;;  %v6247_v16 = vmul.f32 %v2281_v31, %v5822_v45  ;;  %v6251_v6 = vmul.f32 %v5827_v47, %v6166_v0 }
 0x2be   : > { %v4263_v23 = vpop.eup %4262  ;;  %3005 = vmatprep.mubr.bf16.mxu1 %v2650_v27  ;;  %v2525_v59 = vmul.f32 %v4261_v19, %v6917_v17  ;;  %v2555_v14 = vsub.f32 %v6116_v44, %v2523_v40  ;;  %4288 = vpow2.f32 %v3591_v21  ;;  %v6255_v44 = vmul.f32 -1.442695, %v6236_v22  ;;  %v6919_v19 = vld [vmem:[#allocation43_spill] sm:$0xff] }
 0x2bf   : > { %v4265_v58 = vpop.eup %4264  ;;  %4290 = vrcp.f32 %v2438_v10  ;;  %v1919_v10 = vmul.f32 %v4263_v23, %v6919_v19  ;;  %v3597_v23 = vmul.f32 -1.442695, %v6247_v16 }
 0x2c0   : > { %v4267_v37 = vpop.eup %4266  ;;  %v2557_v27 = vsub.f32 %v1916_v34, %v2525_v59  ;;  %v2587_v30 = vmul.f32 %v6918_v39, %v2555_v14  ;;  %4292 = vpow2.f32 %v3593_v46  ;;  %v1921_v17 = vmul.f32 %v4265_v58, %v6920_v50 }
 0x2c1   : > { %v4269_v21 = vpop.eup %4268  ;;  %v2528_v31 = vmul.f32 %v4267_v37, %v6030_v48  ;;  %4294 = vpow2.f32 %v3548_v42  ;;  %v3595_v39 = vmul.f32 -1.442695, %v6244_v25 }
 0x2c2   : > { %v4271_v41 = vpop.eup %4270  ;;  %v2589_v0 = vmul.f32 %v6921_v52, %v2557_v27  ;;  %v2619_v55 = vadd.f32 %v2587_v30, %v2523_v40  ;;  %v2530_v34 = vmul.f32 %v4269_v21, %v6045_v43  ;;  %4296 = vpow2.f32 %v3550_v62  ;;  %v6922_v52 = vld [vmem:[#allocation30_spill] sm:$0xff]  ;;  %v6923_v62 = vld [vmem:[#allocation71_spill] sm:$0xff] }
 0x2c3   : > { %v4273_v14 = vpop.eup %4272  ;;  %v2560_v46 = vsub.f32 %v1919_v10, %v2528_v31  ;;  %4298 = vpow2.f32 %v3596_v2  ;;  %v1918_v43 = vmul.f32 %v4271_v41, %v6034_v29  ;;  %v6924_v2 = vld [vmem:[#allocation44_spill] sm:$0xff] }
 0x2c4   : > { %v4275_v19 = vpop.eup %4274  ;;  %v2621_v58 = vadd.f32 %v2589_v0, %v2525_v59  ;;  %v3691_v48 = vpack.c.bf16 %v6212_v18, %v2619_v55  ;;  %v2562_v42 = vsub.f32 %v1921_v17, %v2530_v34  ;;  %v1826_v37 = vadd.f32 1.0, %v4273_v14  ;;  %v6925_v59 = vld [vmem:[#allocation28_spill] sm:$0xff] }
 0x2c5   : > { %v4277_v50 = vpop.eup %4276  ;;  %v2592_v40 = vmul.f32 %v6922_v52, %v2560_v46  ;;  %4300 = vpow2.f32 %v3598_v60  ;;  %v2284_v27 = vmul.f32 %v6924_v2, %v6923_v62  ;;  %v1920_v46 = vmul.f32 %v4275_v19, %v6063_v1 }
 0x2c6   : > { %v4279_v30 = vpop.eup %4278  ;;  %v2649_v21 = vpack.c.bf16 %v2621_v58, %v2619_v55  ;;  %v3692_v10 = vpack.c.bf16 %v6222_v32, %v2621_v58  ;;  %2745 = vst [vmem:[%s6088_s4 + $0x10] sm:$0xff] %v3691_v48  ;;  %v2594_v0 = vmul.f32 %v6925_v59, %v2562_v42  ;;  %v2527_v18 = vmul.f32 %v4277_v50, %v6070_v51  ;;  %v6926_v48 = vld [vmem:[#allocation75_spill] sm:$0xff]  ;;  %v6928_v50 = vld [vmem:[#allocation29_spill] sm:$0xff] }
 0x2c7   : > { %v4281_v17 = vpop.eup %4280  ;;  %v2624_v14 = vadd.f32 %v2592_v40, %v2528_v31  ;;  %v2529_v52 = vmul.f32 %v4279_v30, %v6081_v4  ;;  %4302 = vrcp.f32 %v1826_v37  ;;  %v3554_v51 = vmul.f32 -1.442695, %v6251_v6  ;;  %v6927_v4 = vld [vmem:[#allocation27_spill] sm:$0xff] }
 0x2c8   : > { %v4283_v29 = vpop.eup %4282  ;;  %2746 = vst [vmem:[%s6088_s4 + $0x18] sm:$0xff] %v3692_v10  ;;  %3006 = vmatmul.mubr.bf16.gmra.mxu1 %v2649_v21  ;;  %v2626_v41 = vadd.f32 %v2594_v0, %v2530_v34  ;;  %v2559_v60 = vsub.f32 %v1918_v43, %v2527_v18  ;;  %v1828_v55 = vadd.f32 1.0, %v4281_v17  ;;  %4304 = vpow2.f32 %v6225_v26 }
 0x2c9   : > { %v4285_v32 = vpop.eup %4284  ;;  %v2561_v58 = vsub.f32 %v1920_v46, %v2529_v52  ;;  %4306 = vpow2.f32 %v3549_v12  ;;  %v2286_v31 = vmul.f32 %v6065_v63, %v6926_v48  ;;  %v6282_v37 = vmul.f32 %v2284_v27, %v5827_v47 }
 0x2ca   : > { %v4287_v1 = vpop.eup %4286  ;;  %v2652_v19 = vpack.c.bf16 %v2626_v41, %v2624_v14  ;;  %v2591_v42 = vmul.f32 %v6927_v4, %v2559_v60  ;;  %4308 = vrcp.f32 %v1828_v55  ;;  %v1923_v26 = vmul.f32 %v4283_v29, %v6094_v20  ;;  %v6929_v29 = vld [vmem:[#allocation90_spill] sm:$0xff]  ;;  %v6932_v4 = vld [vmem:[#allocation72_spill] sm:$0xff] }
 0x2cb   : > { %v4289_v34 = vpop.eup %4288  ;;  %v2593_v40 = vmul.f32 %v6928_v50, %v2561_v58  ;;  %v2532_v12 = vmul.f32 %v4287_v1, %v6108_v8  ;;  %4310 = vpow2.f32 %v3595_v39  ;;  %v1925_v30 = vmul.f32 %v4285_v32, %v6102_v15  ;;  %v6931_v1 = vld [vmem:[#allocation69_spill] sm:$0xff] }
 0x2cc   : > { %v4291_v43 = vpop.eup %4290  ;;  %3015 = vmatprep.mubr.bf16.mxu1 %v2652_v19  ;;  %v2623_v62 = vadd.f32 %v2591_v42, %v2527_v18  ;;  %v2435_v21 = vadd.f32 1.0, %v4289_v34  ;;  %4312 = vpow2.f32 %v3597_v23  ;;  %v6291_v39 = vmul.f32 %v2286_v31, %v5827_v47 }
 0x2cd   : > { %v4293_v10 = vpop.eup %4292  ;;  %v2625_v59 = vadd.f32 %v2593_v40, %v2529_v52  ;;  %v2534_v27 = vmul.f32 %v4291_v43, %v6120_v35  ;;  %v2564_v0 = vsub.f32 %v1923_v26, %v2532_v12  ;;  %4314 = vpow2.f32 %v6255_v44  ;;  %v6934_v43 = vld [vmem:[#allocation74_spill] sm:$0xff] }
 0x2ce   : > { %v4295_v17 = vpop.eup %4294  ;;  %v3693_v20 = vpack.c.bf16 %v2624_v14, %v2623_v62  ;;  %v2437_v8 = vadd.f32 1.0, %v4293_v10  ;;  %4316 = vrcp.f32 %v2435_v21  ;;  %v6297_v44 = vmul.f32 %v5822_v45, %v6145_v49  ;;  %v6930_v14 = vld [vmem:[#allocation92_spill] sm:$0xff]  ;;  %v6935_v21 = vld [vmem:[#allocation79_spill] sm:$0xff] }
 0x2cf   : > { %v4297_v18 = vpop.eup %4296  ;;  %v2651_v15 = vpack.c.bf16 %v2625_v59, %v2623_v62  ;;  %v3694_v46 = vpack.c.bf16 %v2626_v41, %v2625_v59  ;;  %v2566_v23 = vsub.f32 %v1925_v30, %v2534_v27  ;;  %v2596_v60 = vmul.f32 %v6929_v29, %v2564_v0  ;;  %v6938_v29 = vld [vmem:[#allocation77_spill] sm:$0xff] }
 0x2d0   : > { %v4299_v52 = vpop.eup %4298  ;;  %2747 = vst [vmem:[%s6088_s4 + $0x20] sm:$0xff] %v3693_v20  ;;  %4318 = vrcp.f32 %v2437_v8  ;;  %v1831_v35 = vadd.f32 1.0, %v4295_v17  ;;  %v1833_v55 = vadd.f32 1.0, %v4297_v18  ;;  %v3600_v41 = vmul.f32 -1.442695, %v6282_v37  ;;  %v6936_v8 = vld [vmem:[#allocation83_spill] sm:$0xff] }
 0x2d1   : > { %2748 = vst [vmem:[%s6088_s4 + $0x28] sm:$0xff] %v3694_v46  ;;  %3016 = vmatmul.mubr.bf16.gmra.mxu1 %v2651_v15  ;;  %v2598_v32 = vmul.f32 %v6930_v14, %v2566_v23  ;;  %v2440_v58 = vadd.f32 1.0, %v4299_v52  ;;  %4320 = vpow2.f32 %v3554_v51  ;;  %v3602_v31 = vmul.f32 -1.442695, %v6291_v39  ;;  %v6933_v51 = vld [vmem:[#allocation70_spill] sm:$0xff]  ;;  %v6937_v46 = vld [vmem:[#allocation73_spill] sm:$0xff] }
 0x2d2   : > { %v4301_v48 = vpop.eup %4300  ;;  %4322 = vrcp.f32 %v1831_v35  ;;  %v2283_v19 = vmul.f32 %v6924_v2, %v6931_v1  ;;  %v2285_v42 = vmul.f32 %v6065_v63, %v6932_v4  ;;  %v6307_v49 = vadd.f32 %v2596_v60, %v2532_v12 }
 0x2d3   : > { %v6309_v34 = vadd.f32 %v2598_v32, %v2534_v27  ;;  %4324 = vrcp.f32 %v1833_v55  ;;  %v2442_v50 = vadd.f32 1.0, %v4301_v48  ;;  %v1667_v26 = vmul.f32 %v6055_v38, %v6933_v51 }
 0x2d4   : > { %v4303_v40 = vpop.eup %4302  ;;  %v1670_v62 = vmul.f32 %v6085_v53, %v6934_v43  ;;  %4326 = vrcp.f32 %v2440_v58  ;;  %v6317_v2 = vmul.f32 %v5822_v45, %v6162_v54  ;;  %v3551_v12 = vmul.f32 -1.442695, %v6297_v44  ;;  %v6940_v43 = vld [vmem:[#allocation82_spill] sm:$0xff] }
 0x2d5   : > { %v4305_v30 = vpop.eup %4304  ;;  %v2654_v63 = vpack.c.bf16 %v6309_v34, %v6307_v49  ;;  %4328 = vrcp.f32 %v2442_v50  ;;  %v2288_v10 = vmul.f32 %v6077_v24, %v6935_v21  ;;  %v6325_v27 = vmul.f32 %v2283_v19, %v5822_v45 }
 0x2d6   : > { %v4307_v59 = vpop.eup %4306  ;;  %v1830_v38 = vadd.f32 1.0, %v4305_v30  ;;  %4330 = vpow2.f32 %v3600_v41  ;;  %v6329_v54 = vmul.f32 %v5827_v47, %v6172_v7  ;;  %v6332_v20 = vmul.f32 %v2285_v42, %v5822_v45  ;;  %v6939_v7 = vld [vmem:[#allocation78_spill] sm:$0xff] }
 0x2d7   : > { %v4309_v0 = vpop.eup %4308  ;;  %3025 = vmatprep.mubr.bf16.mxu1 %v2654_v63  ;;  %v1832_v17 = vadd.f32 1.0, %v4307_v59  ;;  %4332 = vpow2.f32 %v3602_v31  ;;  %v2290_v18 = vmul.f32 %v6110_v57, %v6936_v8  ;;  %v1669_v23 = vmul.f32 %v6085_v53, %v6937_v46 }
 0x2d8   : > { %v4311_v15 = vpop.eup %4310  ;;  %v6340_v60 = vmul.f32 %v6104_v61, %v6938_v29  ;;  %v6344_v52 = vmul.f32 %v6104_v61, %v6939_v7  ;;  %4334 = vrcp.f32 %v1830_v38  ;;  %v6347_v14 = vmul.f32 %v5827_v47, %v1670_v62  ;;  %v6941_v38 = vld [vmem:[#allocation76_spill] sm:$0xff] }
 0x2d9   : > { %v4313_v35 = vpop.eup %4312  ;;  %4336 = vrcp.f32 %v1832_v17  ;;  %v2439_v55 = vadd.f32 1.0, %v4311_v15  ;;  %v6350_v32 = vmul.f32 %v2288_v10, %v5827_v47  ;;  %v3553_v41 = vmul.f32 -1.442695, %v6317_v2  ;;  %v6942_v15 = vld [vmem:[#allocation31_spill] sm:$0xff]  ;;  %v6943_v7 = vld [vmem:[#allocation80_spill] sm:$0xff] }
 0x2da   : > { %v4315_v58 = vpop.eup %4314  ;;  %v2441_v53 = vadd.f32 1.0, %v4313_v35  ;;  %4338 = vpow2.f32 %v3551_v12  ;;  %v3599_v48 = vmul.f32 -1.442695, %v6325_v27  ;;  %v3601_v61 = vmul.f32 -1.442695, %v6332_v20 }
 0x2db   : > { %v4317_v31 = vpop.eup %4316  ;;  %4340 = vrcp.f32 %v2439_v55  ;;  %v3556_v1 = vmul.f32 -1.442695, %v6329_v54  ;;  %v6357_v19 = vmul.f32 %v2290_v18, %v5827_v47  ;;  %v1922_v4 = vmul.f32 %v4303_v40, %v6158_v36  ;;  %v6944_v55 = vld [vmem:[#allocation91_spill] sm:$0xff] }
 0x2dc   : > { %v2531_v42 = vmul.f32 %v4317_v31, %v6180_v3  ;;  %4342 = vrcp.f32 %v2441_v53  ;;  %v6362_v50 = vmul.f32 %v5822_v45, %v1667_v26  ;;  %v6366_v62 = vmul.f32 %v6135_v28, %v6940_v43 }
 0x2dd   : > { %v4319_v51 = vpop.eup %4318  ;;  %v1835_v30 = vadd.f32 1.0, %v4315_v58  ;;  %v3558_v63 = vmul.f32 -1.442695, %v6347_v14  ;;  %v3604_v12 = vmul.f32 -1.442695, %v6350_v32  ;;  %v1924_v10 = vmul.f32 %v4309_v0, %v6175_v5 }
 0x2de   : > { %v4321_v21 = vpop.eup %4320  ;;  %v2533_v36 = vmul.f32 %v4319_v51, %v6185_v13  ;;  %v2563_v3 = vsub.f32 %v1922_v4, %v2531_v42  ;;  %4344 = vpow2.f32 %v3553_v41  ;;  %v3606_v26 = vmul.f32 -1.442695, %v6357_v19 }
 0x2df   : > { %v4323_v40 = vpop.eup %4322  ;;  %4346 = vpow2.f32 %v3599_v48  ;;  %v6374_v59 = vmul.f32 %v5822_v45, %v1669_v23  ;;  %v2287_v17 = vmul.f32 %v6077_v24, %v6941_v38  ;;  %v3555_v5 = vmul.f32 -1.442695, %v6362_v50 }
 0x2e0   : > { %v4325_v8 = vpop.eup %4324  ;;  %v2565_v18 = vsub.f32 %v1924_v10, %v2533_v36  ;;  %v2595_v46 = vmul.f32 %v6942_v15, %v2563_v3  ;;  %4348 = vpow2.f32 %v3601_v61  ;;  %v1927_v0 = vmul.f32 %v4323_v40, %v6191_v33  ;;  %v6946_v3 = vld [vmem:[#allocation94_spill] sm:$0xff] }
 0x2e1   : > { %v4327_v13 = vpop.eup %4326  ;;  %v1837_v29 = vadd.f32 1.0, %v4321_v21  ;;  %4350 = vrcp.f32 %v1835_v30  ;;  %v2289_v35 = vmul.f32 %v6110_v57, %v6943_v7  ;;  %v1929_v48 = vmul.f32 %v4325_v8, %v6195_v56  ;;  %v6945_v21 = vld [vmem:[#allocation33_spill] sm:$0xff] }
 0x2e2   : > { %v4329_v23 = vpop.eup %4328  ;;  %v2597_v58 = vmul.f32 %v6944_v55, %v2565_v18  ;;  %v2627_v53 = vadd.f32 %v2595_v46, %v2531_v42  ;;  %v2536_v24 = vmul.f32 %v4327_v13, %v6203_v9  ;;  %4352 = vpow2.f32 %v3556_v1 }
 0x2e3   : > { %v4331_v41 = vpop.eup %4330  ;;  %v2538_v31 = vmul.f32 %v4329_v23, %v6215_v11  ;;  %4354 = vpow2.f32 %v3558_v63  ;;  %v6388_v33 = vmul.f32 %v2287_v17, %v5822_v45  ;;  %v3557_v56 = vmul.f32 -1.442695, %v6374_v59  ;;  %v6947_v17 = vld [vmem:[#allocation47_spill] sm:$0xff] }
 0x2e4   : > { %v4333_v61 = vpop.eup %4332  ;;  %v2629_v4 = vadd.f32 %v2597_v58, %v2533_v36  ;;  %v3695_v57 = vpack.c.bf16 %v6307_v49, %v2627_v53  ;;  %v2568_v51 = vsub.f32 %v1927_v0, %v2536_v24  ;;  %v2444_v43 = vadd.f32 1.0, %v4331_v41  ;;  %v6950_v41 = vld [vmem:[#allocation46_spill] sm:$0xff] }
 0x2e5   : > { %v4335_v42 = vpop.eup %4334  ;;  %v2570_v30 = vsub.f32 %v1929_v48, %v2538_v31  ;;  %v2446_v9 = vadd.f32 1.0, %v4333_v61  ;;  %4356 = vpow2.f32 %v3604_v12  ;;  %v6397_v40 = vmul.f32 %v2289_v35, %v5822_v45  ;;  %v6952_v61 = vld [vmem:[#allocation48_spill] sm:$0xff] }
 0x2e6   : > { %v4337_v1 = vpop.eup %4336  ;;  %v2653_v11 = vpack.c.bf16 %v2629_v4, %v2627_v53  ;;  %v3696_v63 = vpack.c.bf16 %v6309_v34, %v2629_v4  ;;  %2749 = vst [vmem:[%s6088_s4 + $0x30] sm:$0xff] %v3695_v57  ;;  %v2600_v10 = vmul.f32 %v6945_v21, %v2568_v51  ;;  %4358 = vrcp.f32 %v1837_v29  ;;  %v6948_v29 = vld [vmem:[#allocation52_spill] sm:$0xff]  ;;  %v6949_v53 = vld [vmem:[#allocation85_spill] sm:$0xff] }
 0x2e7   : > { %v4339_v36 = vpop.eup %4338  ;;  %v2602_v49 = vmul.f32 %v6946_v3, %v2570_v30  ;;  %4360 = vrcp.f32 %v2444_v43  ;;  %v6401_v12 = vmul.f32 %v5827_v47, %v6344_v52  ;;  %v1926_v34 = vmul.f32 %v4335_v42, %v6947_v17  ;;  %v6953_v57 = vld [vmem:[#allocation32_spill] sm:$0xff] }
 0x2e8   : > { %v4341_v38 = vpop.eup %4340  ;;  %2750 = vst [vmem:[%s6088_s4 + $0x38] sm:$0xff] %v3696_v63  ;;  %3026 = vmatmul.mubr.bf16.gmra.mxu1 %v2653_v11  ;;  %4362 = vrcp.f32 %v2446_v9  ;;  %v1834_v8 = vadd.f32 1.0, %v4339_v36  ;;  %v3603_v18 = vmul.f32 -1.442695, %v6388_v33  ;;  %v2632_v46 = vadd.f32 %v2600_v10, %v2536_v24  ;;  %v6955_v9 = vld [vmem:[#allocation93_spill] sm:$0xff] }
 0x2e9   : > { %v4343_v15 = vpop.eup %4342  ;;  %v2634_v13 = vadd.f32 %v2602_v49, %v2538_v31  ;;  %v2535_v0 = vmul.f32 %v4341_v38, %v6244_v25  ;;  %4364 = vpow2.f32 %v3606_v26  ;;  %v1928_v7 = vmul.f32 %v4337_v1, %v6948_v29  ;;  %v6951_v26 = vld [vmem:[#allocation87_spill] sm:$0xff] }
 0x2ea   : > { %v2537_v52 = vmul.f32 %v4343_v15, %v6247_v16  ;;  %4366 = vrcp.f32 %v1834_v8  ;;  %v6411_v35 = vmul.f32 %v5827_v47, %v6366_v62  ;;  %v2292_v24 = vmul.f32 %v6950_v41, %v6949_v53 }
 0x2eb   : > { %v4345_v23 = vpop.eup %4344  ;;  %v2656_v55 = vpack.c.bf16 %v2634_v13, %v2632_v46  ;;  %v2567_v58 = vsub.f32 %v1926_v34, %v2535_v0  ;;  %4368 = vpow2.f32 %v3555_v5  ;;  %v2294_v4 = vmul.f32 %v6952_v61, %v6951_v26  ;;  %v6954_v5 = vld [vmem:[#allocation81_spill] sm:$0xff] }
 0x2ec   : > { %v4347_v48 = vpop.eup %4346  ;;  %v2569_v31 = vsub.f32 %v1928_v7, %v2537_v52  ;;  %v1836_v25 = vadd.f32 1.0, %v4345_v23  ;;  %4370 = vpow2.f32 %v3557_v56  ;;  %v3605_v43 = vmul.f32 -1.442695, %v6397_v40 }
 0x2ed   : > { %v4349_v16 = vpop.eup %4348  ;;  %3035 = vmatprep.mubr.bf16.mxu1 %v2656_v55  ;;  %v2599_v51 = vmul.f32 %v6953_v57, %v2567_v58  ;;  %v2443_v62 = vadd.f32 1.0, %v4347_v48  ;;  %4372 = vpow2.f32 %v3603_v18  ;;  %v1673_v30 = vmul.f32 %v6135_v28, %v6954_v5  ;;  %v6957_v55 = vld [vmem:[#allocation86_spill] sm:$0xff]  ;;  %v6959_v5 = vld [vmem:[#allocation41_spill] sm:$0xff] }
 0x2ee   : > { %v4351_v42 = vpop.eup %4350  ;;  %v2601_v1 = vmul.f32 %v6955_v9, %v2569_v31  ;;  %4374 = vrcp.f32 %v1836_v25  ;;  %v2445_v11 = vadd.f32 1.0, %v4349_v16  ;;  %v3560_v21 = vmul.f32 -1.442695, %v6401_v12 }
 0x2ef   : > { %v4353_v56 = vpop.eup %4352  ;;  %v2631_v63 = vadd.f32 %v2599_v51, %v2535_v0  ;;  %4376 = vrcp.f32 %v2443_v62  ;;  %v6424_v10 = vmul.f32 %v2292_v24, %v5827_v47  ;;  %v6427_v38 = vmul.f32 %v2294_v4, %v5827_v47 }
 0x2f0   : > { %v4355_v36 = vpop.eup %4354  ;;  %v2633_v3 = vadd.f32 %v2601_v1, %v2537_v52  ;;  %4378 = vrcp.f32 %v2445_v11  ;;  %v1839_v49 = vadd.f32 1.0, %v4353_v56  ;;  %v3562_v34 = vmul.f32 -1.442695, %v6411_v35 }
 0x2f1   : > { %v3697_v28 = vpack.c.bf16 %v2632_v46, %v2631_v63  ;;  %v1841_v17 = vadd.f32 1.0, %v4355_v36  ;;  %4380 = vpow2.f32 %v3605_v43  ;;  %v6432_v0 = vmul.f32 %v5822_v45, %v6340_v60  ;;  %v6956_v46 = vld [vmem:[#allocation84_spill] sm:$0xff] }
 0x2f2   : > { %v4357_v8 = vpop.eup %4356  ;;  %v2655_v18 = vpack.c.bf16 %v2633_v3, %v2631_v63  ;;  %v3698_v15 = vpack.c.bf16 %v2634_v13, %v2633_v3  ;;  %4382 = vrcp.f32 %v1839_v49  ;;  %v3608_v47 = vmul.f32 -1.442695, %v6424_v10 }
 0x2f3   : > { %v4359_v29 = vpop.eup %4358  ;;  %2751 = vst [vmem:[%s6088_s4 + $0x40] sm:$0xff] %v3697_v28  ;;  %4384 = vrcp.f32 %v1841_v17  ;;  %v2448_v7 = vadd.f32 1.0, %v4357_v8  ;;  %v2291_v52 = vmul.f32 %v6950_v41, %v6956_v46  ;;  %v3610_v13 = vmul.f32 -1.442695, %v6427_v38 }
 0x2f4   : > { %v4361_v23 = vpop.eup %4360  ;;  %2752 = vst [vmem:[%s6088_s4 + $0x48] sm:$0xff] %v3698_v15  ;;  %3036 = vmatmul.mubr.bf16.gmra.mxu1 %v2655_v18  ;;  %4386 = vpow2.f32 %v3560_v21  ;;  %v2293_v58 = vmul.f32 %v6952_v61, %v6957_v55  ;;  %v1931_v53 = vmul.f32 %v4351_v42, %v6236_v22  ;;  %v6445_v48 = vmul.f32 %v5822_v45, %v1673_v30 }
 0x2f5   : > { %v4363_v60 = vpop.eup %4362  ;;  %v2540_v24 = vmul.f32 %v4361_v23, %v6282_v37  ;;  %4388 = vrcp.f32 %v2448_v7  ;;  %v1933_v41 = vmul.f32 %v4359_v29, %v6251_v6  ;;  %v3559_v26 = vmul.f32 -1.442695, %v6432_v0  ;;  %v6958_v6 = vld [vmem:[#allocation36_spill] sm:$0xff] }
 0x2f6   : > { %v4365_v31 = vpop.eup %4364  ;;  %v2542_v25 = vmul.f32 %v4363_v60, %v6291_v39  ;;  %4390 = vpow2.f32 %v3562_v34  ;;  %v6451_v22 = vmul.f32 %v2291_v52, %v5822_v45  ;;  %v6454_v51 = vmul.f32 %v2293_v58, %v5822_v45  ;;  %v6960_v52 = vld [vmem:[#allocation34_spill] sm:$0xff]  ;;  %v6962_v60 = vld [vmem:[#allocation96_spill] sm:$0xff] }
 0x2f7   : > { %v4367_v4 = vpop.eup %4366  ;;  %v2572_v16 = vsub.f32 %v1931_v53, %v2540_v24  ;;  %v2450_v61 = vadd.f32 1.0, %v4365_v31  ;;  %4392 = vpow2.f32 %v3608_v47  ;;  %v3561_v1 = vmul.f32 -1.442695, %v6445_v48 }
 0x2f8   : > { %v4369_v37 = vpop.eup %4368  ;;  %v2574_v57 = vsub.f32 %v1933_v41, %v2542_v25  ;;  %4394 = vpow2.f32 %v3610_v13  ;;  %v3607_v63 = vmul.f32 -1.442695, %v6451_v22  ;;  %v3609_v3 = vmul.f32 -1.442695, %v6454_v51 }
 0x2f9   : > { %v4371_v62 = vpop.eup %4370  ;;  %v2604_v43 = vmul.f32 %v6958_v6, %v2572_v16  ;;  %4396 = vrcp.f32 %v2450_v61  ;;  %v1838_v39 = vadd.f32 1.0, %v4369_v37  ;;  %v1930_v28 = vmul.f32 %v4367_v4, %v6297_v44 }
 0x2fa   : > { %v4373_v42 = vpop.eup %4372  ;;  %v2606_v30 = vmul.f32 %v6959_v5, %v2574_v57  ;;  %v1840_v9 = vadd.f32 1.0, %v4371_v62  ;;  %4398 = vpow2.f32 %v3559_v26  ;;  %v1046_v23 = vadd.f32 1.0, %v6960_v52  ;;  %v6967_v52 = vld [vmem:[#allocation35_spill] sm:$0xff] }
 0x2fb   : > { %v4375_v11 = vpop.eup %4374  ;;  %4400 = vrcp.f32 %v1838_v39  ;;  %v2447_v56 = vadd.f32 1.0, %v4373_v42  ;;  %v2636_v45 = vadd.f32 %v2604_v43, %v2540_v24 }
 0x2fc   : > { %v4377_v21 = vpop.eup %4376  ;;  %v2638_v36 = vadd.f32 %v2606_v30, %v2542_v25  ;;  %4402 = vrcp.f32 %v1840_v9  ;;  %v1932_v18 = vmul.f32 %v4375_v11, %v6317_v2 }
 0x2fd   : > { %v4379_v49 = vpop.eup %4378  ;;  %v2539_v17 = vmul.f32 %v4377_v21, %v6325_v27  ;;  %4404 = vrcp.f32 %v2447_v56  ;;  %v6961_v27 = vld [vmem:[#allocation95_spill] sm:$0xff]  ;;  %v6965_v56 = vld [vmem:[#allocation45_spill] sm:$0xff] }
 0x2fe   : > { %v4381_v34 = vpop.eup %4380  ;;  %v2658_v8 = vpack.c.bf16 %v2638_v36, %v2636_v45  ;;  %v2541_v15 = vmul.f32 %v4379_v49, %v6332_v20  ;;  %4406 = vpow2.f32 %v3561_v1  ;;  %v6964_v1 = vld [vmem:[#allocation97_spill] sm:$0xff] }
 0x2ff   : > { %v4383_v29 = vpop.eup %4382  ;;  %v2571_v7 = vsub.f32 %v1930_v28, %v2539_v17  ;;  %v2449_v47 = vadd.f32 1.0, %v4381_v34  ;;  %4408 = vpow2.f32 %v3607_v63  ;;  %v1051_v11 = vadd.f32 1.0, %v6964_v1  ;;  %v6966_v28 = vld [vmem:[#allocation98_spill] sm:$0xff] }
 0x300   : > { %v4385_v46 = vpop.eup %4384  ;;  %3045 = vmatprep.mubr.bf16.mxu1 %v2658_v8  ;;  %v2573_v13 = vsub.f32 %v1932_v18, %v2541_v15  ;;  %4410 = vpow2.f32 %v3609_v3  ;;  %v1935_v31 = vmul.f32 %v4383_v29, %v6329_v54  ;;  %v6963_v54 = vld [vmem:[#allocation37_spill] sm:$0xff] }
 0x301   : > { %v4387_v44 = vpop.eup %4386  ;;  %v2603_v55 = vmul.f32 %v6961_v27, %v2571_v7  ;;  %4412 = vrcp.f32 %v2449_v47  ;;  %v1049_v5 = vadd.f32 1.0, %v6963_v54 }
 0x302   : > { %v4389_v58 = vpop.eup %4388  ;;  %v2605_v2 = vmul.f32 %v6962_v60, %v2573_v13  ;;  %v1843_v53 = vadd.f32 1.0, %v4387_v44  ;;  %4414 = vrcp.f32 %v1046_v23  ;;  %v1048_v23 = vadd.f32 1.0, %v6967_v52 }
 0x303   : > { %v4391_v20 = vpop.eup %4390  ;;  %v2635_v24 = vadd.f32 %v2603_v55, %v2539_v17  ;;  %v2544_v41 = vmul.f32 %v4389_v58, %v6350_v32  ;;  %v1937_v32 = vmul.f32 %v4385_v46, %v6347_v14  ;;  %v6969_v58 = vld [vmem:[#allocation38_spill] sm:$0xff] }
 0x304   : > { %v4393_v25 = vpop.eup %4392  ;;  %v2637_v26 = vadd.f32 %v2605_v2, %v2541_v15  ;;  %v1845_v4 = vadd.f32 1.0, %v4391_v20  ;;  %4416 = vrcp.f32 %v1843_v53  ;;  %v1050_v60 = vadd.f32 1.0, %v6969_v58 }
 0x305   : > { %v4395_v16 = vpop.eup %4394  ;;  %v3699_v61 = vpack.c.bf16 %v2636_v45, %v2635_v24  ;;  %v2576_v37 = vsub.f32 %v1935_v31, %v2544_v41  ;;  %v2452_v57 = vadd.f32 1.0, %v4393_v25 }
 0x306   : > { %v4397_v62 = vpop.eup %4396  ;;  %v2657_v6 = vpack.c.bf16 %v2637_v26, %v2635_v24  ;;  %v3700_v43 = vpack.c.bf16 %v2638_v36, %v2637_v26  ;;  %4418 = vrcp.f32 %v1845_v4  ;;  %v2454_v39 = vadd.f32 1.0, %v4395_v16 }
 0x307   : > { %v4399_v42 = vpop.eup %4398  ;;  %2753 = vst [vmem:[%s6088_s4 + $0x50] sm:$0xff] %v3699_v61  ;;  %v2546_v30 = vmul.f32 %v4397_v62, %v6357_v19  ;;  %4420 = vrcp.f32 %v2452_v57  ;;  %v2608_v63 = vmul.f32 %v6965_v56, %v2576_v37 }
 0x308   : > { %v4401_v9 = vpop.eup %4400  ;;  %2754 = vst [vmem:[%s6088_s4 + $0x58] sm:$0xff] %v3700_v43  ;;  %3046 = vmatmul.mubr.bf16.gmra.mxu1 %v2657_v6  ;;  %4422 = vrcp.f32 %v2454_v39  ;;  %v1842_v36 = vadd.f32 1.0, %v4399_v42 }
 0x309   : > { %v4403_v21 = vpop.eup %4402  ;;  %v2578_v45 = vsub.f32 %v1937_v32, %v2546_v30  ;;  %4424 = vrcp.f32 %v1049_v5  ;;  %v1934_v14 = vmul.f32 %v4401_v9, %v6362_v50  ;;  %v2640_v8 = vadd.f32 %v2608_v63, %v2544_v41 }
 0x30a   : > { %v4405_v3 = vpop.eup %4404  ;;  %4426 = vrcp.f32 %v1051_v11  ;;  %v1936_v13 = vmul.f32 %v4403_v21, %v6374_v59 }
 0x30b   : > { %v4407_v49 = vpop.eup %4406  ;;  %v2610_v17 = vmul.f32 %v6966_v28, %v2578_v45  ;;  %v2543_v19 = vmul.f32 %v4405_v3, %v6388_v33  ;;  %4428 = vrcp.f32 %v1842_v36  ;;  %v6968_v33 = vld [vmem:[#allocation40_spill] sm:$0xff] }
 0x30c   : > { %v4409_v34 = vpop.eup %4408  ;;  %v1844_v18 = vadd.f32 1.0, %v4407_v49 }
 0x30d   : > { %v4411_v15 = vpop.eup %4410  ;;  %v2642_v29 = vadd.f32 %v2610_v17, %v2546_v30  ;;  %v2575_v7 = vsub.f32 %v1934_v14, %v2543_v19  ;;  %v2451_v47 = vadd.f32 1.0, %v4409_v34 }
 0x30e   : > { %v4413_v46 = vpop.eup %4412  ;;  %4430 = vrcp.f32 %v1844_v18  ;;  %v2453_v44 = vadd.f32 1.0, %v4411_v15 }
 0x30f   : > { %v2660_v27 = vpack.c.bf16 %v2642_v29, %v2640_v8  ;;  %v2545_v50 = vmul.f32 %v4413_v46, %v6397_v40  ;;  %v2607_v55 = vmul.f32 %v6968_v33, %v2575_v7  ;;  %4432 = vrcp.f32 %v2451_v47  ;;  %v4415_v2 = vpop.eup %4414 }
 0x310   : > { %4434 = vrcp.f32 %v2453_v44 }
 0x311   : > { %3055 = vmatprep.mubr.bf16.mxu1 %v2660_v27  ;;  %v2577_v53 = vsub.f32 %v1936_v13, %v2545_v50  ;;  %v2639_v20 = vadd.f32 %v2607_v55, %v2543_v19  ;;  %v4417_v24 = vpop.eup %4416  ;;  %4436 = vrcp.f32 %v1048_v23 }
 0x312   : > { %4438 = vrcp.f32 %v1050_v60  ;;  %v1939_v4 = vmul.f32 %v4417_v24, %v6401_v12 }
 0x313   : > { %v4419_v31 = vpop.eup %4418  ;;  %v2609_v59 = vmul.f32 %v4415_v2, %v2577_v53  ;;  %v3701_v41 = vpack.c.bf16 %v2640_v8, %v2639_v20  ;;  %v6971_v8 = vld [vmem:[#allocation26_spill] sm:$0xff] }
 0x314   : > { %v4421_v25 = vpop.eup %4420  ;;  %v1941_v61 = vmul.f32 %v4419_v31, %v6411_v35 }
 0x315   : > { %v4423_v40 = vpop.eup %4422  ;;  %v2641_v26 = vadd.f32 %v2609_v59, %v2545_v50  ;;  %2755 = vst [vmem:[%s6088_s4 + $0x60] sm:$0xff] %v3701_v41  ;;  %v2548_v16 = vmul.f32 %v4421_v25, %v6424_v10 }
 0x316   : > { %v2550_v37 = vmul.f32 %v4423_v40, %v6427_v38  ;;  %v4425_v43 = vpop.eup %4424 }
 0x317   : > { %v2659_v57 = vpack.c.bf16 %v2641_v26, %v2639_v20  ;;  %v3702_v62 = vpack.c.bf16 %v2642_v29, %v2641_v26  ;;  %v2580_v6 = vsub.f32 %v1939_v4, %v2548_v16  ;;  %v4427_v42 = vpop.eup %4426 }
 0x318   : > { %v2582_v39 = vsub.f32 %v1941_v61, %v2550_v37  ;;  %v4429_v5 = vpop.eup %4428 }
 0x319   : > { %2756 = vst [vmem:[%s6088_s4 + $0x68] sm:$0xff] %v3702_v62  ;;  %3056 = vmatmul.mubr.bf16.gmra.mxu1 %v2659_v57  ;;  %v2612_v54 = vmul.f32 %v4425_v43, %v2580_v6  ;;  %v1938_v35 = vmul.f32 %v4429_v5, %v6432_v0 }
 0x31a   : > { %v2614_v32 = vmul.f32 %v4427_v42, %v2582_v39 }
 0x31b   : > { %v4431_v30 = vpop.eup %4430  ;;  %v2644_v12 = vadd.f32 %v2612_v54, %v2548_v16 }
 0x31c   : > { %v4433_v9 = vpop.eup %4432  ;;  %v2646_v1 = vadd.f32 %v2614_v32, %v2550_v37  ;;  %v1940_v56 = vmul.f32 %v4431_v30, %v6445_v48  ;;  %v2791_v48 = vld [vmem:[%s6654_s8] sm:$0x3] }
 0x31d   : > { %v4435_v10 = vpop.eup %4434  ;;  %v2547_v38 = vmul.f32 %v4433_v9, %v6451_v22  ;;  %v6504_v18 = vrot.slane %v2791_v48, %v6971_v8 }
 0x31e   : > { %v2662_v11 = vpack.c.bf16 %v2646_v1, %v2644_v12  ;;  %v2549_v63 = vmul.f32 %v4435_v10, %v6454_v51  ;;  %v4437_v45 = vpop.eup %4436  ;;  %v6970_v51 = vld [vmem:[#allocation25_spill] sm:$0xff] }
 0x31f   : > { %v2579_v21 = vsub.f32 %v1938_v35, %v2547_v38  ;;  %v4439_v3 = vpop.eup %4438  ;;  %v6501_v34 = vrot.slane %v2791_v48, %v6970_v51 }
 0x320   : > { %3065 = vmatprep.mubr.bf16.mxu1 %v2662_v11  ;;  %v2581_v36 = vsub.f32 %v1940_v56, %v2549_v63 }
 0x321   : > { %v2611_v49 = vmul.f32 %v4437_v45, %v2579_v21 }
 0x322   : > { %v2613_v28 = vmul.f32 %v4439_v3, %v2581_v36 }
 0x323   : > { %v2643_v17 = vadd.f32 %v2611_v49, %v2547_v38 }
 0x324   : > { %v2645_v14 = vadd.f32 %v2613_v28, %v2549_v63 }
 0x325   : > { %v3703_v19 = vpack.c.bf16 %v2644_v12, %v2643_v17 }
 0x326   : > { %v2661_v0 = vpack.c.bf16 %v2645_v14, %v2643_v17  ;;  %v3704_v22 = vpack.c.bf16 %v2646_v1, %v2645_v14 }
 0x327   : > { %2757 = vst [vmem:[%s6088_s4 + $0x70] sm:$0xff] %v3703_v19 }
 0x328   : > { %2758 = vst [vmem:[%s6088_s4 + $0x78] sm:$0xff] %v3704_v22  ;;  %3066 = vmatmul.mubr.bf16.gmra.mxu1 %v2661_v0 }
 0x369   : > { %v2997_v15 = vpop.f32.mrf.mxu1 }
 0x36a   : > { %v2998_v7 = vadd.f32 %v2997_v15, %v6501_v34 }
 0x36b   : > { %v2999_v29 = vpop.f32.mrf.mxu1 }
 0x36c   : > { %v3000_v47 = vadd.f32 %v2999_v29, %v6504_v18 }
 0x36d   : > { %v3001_v46 = vpop.f32.mrf.mxu1 }
 0x36e   : > { %v3705_v52 = vpack.c.bf16 %v3000_v47, %v2998_v7  ;;  %v3002_v13 = vadd.f32 %v3001_v46, %v6501_v34 }
 0x36f   : > { %v3003_v23 = vpop.f32.mrf.mxu1 }
 0x370   : > { %3172 = vst [vmem:[%s6509_s30] sm:$0xff] %v3705_v52  ;;  %v3004_v44 = vadd.f32 %v3003_v23, %v6504_v18 }
 0x372   : > { %v3706_v27 = vpack.c.bf16 %v3004_v44, %v3002_v13 }
 0x374   : > { %3173 = vst [vmem:[%s6509_s30 + $0x8] sm:$0xff] %v3706_v27 }
 0x375   : > { %4587 = shalt.err (!%p4584_p6)
}
 0x376   : > { %s4588_s15 = scalar_lea.hbm %s6521_s20, 2048  ;;  %s4592_s18 = scalar_lea.hbm %s6656_s10, 4096 }
 0x377   : > { %p4589_p7 = scmp.ne.s32.totalorder %s6521_s20, %s4588_s15  ;;  %p4593_p11 = scmp.lt.s32.totalorder %s6521_s20, %s6656_s10 }
 0x378   : > { %p4594_p3 = scmp.lt.s32.totalorder %s4592_s18, %s4588_s15 }
 0x379   : > { %p4590_p5 = pnand %p4589_p7, %p6972_p13 }
 0x37a   : > { %p4595_p12 = por %p4594_p3, %p4593_p11 }
 0x37b   : > { %p4591_p8 = pneg %p4590_p5 }
 0x37d   : > { %p4596_p9 = pnand %p4595_p12, %p4591_p8 }
 0x37f   : > { %4599 = shalt.err (!%p4596_p9)
}
 0x380   : > { %s4690_s22 = smov 128   ;;  %s4691_s27 = smov 8  }
 0x381   : > { %3742 = dma.vmem_to_hbm [thread:$0]  (%p6972_p13), %s6524_s11, 2048, %s6521_s20, %s3194_s13, %s4690_s22, %s4690_s22, %s4691_s27  }
 0x382   : > { %s3208_s24 = sshll.u32 %s6509_s30, 4  ;;  %s6599_s11 = scalar_lea.hbm %s6655_s9, %s3722_s28  ;;  %s6601_s24 = int_to_ptr.vmem [resolvable:$true] %s3208_s24 }
 0x383   : > { %s3189_s13 = scalar_lea.sflag [#allocation4], %s4938_s0  ;;  %s4600_s21 = scalar_lea.vmem %s6601_s24, 2048 }
 0x384   : > { %p4601_p0 = scmp.ne.s32.totalorder %s6601_s24, %s4600_s21  ;;  %s4692_s29 = smov [#allocation11]  }
 0x385   : > { %s4604_s7 = sshll.u32 %s4692_s29, 4  ;;  %s4605_s7 = int_to_ptr.vmem [resolvable:$false] %s4604_s7 }
 0x386   : > { %p4602_p2 = pnand %p4601_p0, %p6972_p13  ;;  %s4606_s17 = scalar_lea.vmem %s4605_s7, 4096 }
 0x387   : > { %p4607_p1 = scmp.lt.s32.totalorder %s6601_s24, %s4605_s7  ;;  %p4608_p4 = scmp.lt.s32.totalorder %s4606_s17, %s4600_s21 }
 0x388   : > { %v3007_v50 = vpop.f32.mrf.mxu1  ;;  %p4603_p10 = pneg %p4602_p2 }
 0x389   : > { %v3008_v55 = vadd.f32 %v3007_v50, %v6501_v34  ;;  %p4609_p6 = por %p4608_p4, %p4607_p1 }
 0x38a   : > { %v3009_v33 = vpop.f32.mrf.mxu1 }
 0x38b   : > { %v3010_v58 = vadd.f32 %v3009_v33, %v6504_v18  ;;  %p4610_p7 = pnand %p4609_p6, %p4603_p10 }
 0x38c   : > { %v3011_v60 = vpop.f32.mrf.mxu1 }
 0x38d   : > { %v3707_v2 = vpack.c.bf16 %v3010_v58, %v3008_v55  ;;  %v3012_v20 = vadd.f32 %v3011_v60, %v6501_v34 }
 0x38e   : > { %v3013_v53 = vpop.f32.mrf.mxu1 }
 0x38f   : > { %3174 = vst [vmem:[%s6509_s30 + $0x10] sm:$0xff] %v3707_v2  ;;  %v3014_v24 = vadd.f32 %v3013_v53, %v6504_v18 }
 0x391   : > { %v3708_v31 = vpack.c.bf16 %v3014_v24, %v3012_v20  ;;  %v3017_v59 = vpop.f32.mrf.mxu1 }
 0x392   : > { %v3018_v25 = vadd.f32 %v3017_v59, %v6501_v34 }
 0x393   : > { %3175 = vst [vmem:[%s6509_s30 + $0x18] sm:$0xff] %v3708_v31  ;;  %v3019_v41 = vpop.f32.mrf.mxu1 }
 0x394   : > { %v3020_v40 = vadd.f32 %v3019_v41, %v6504_v18 }
 0x395   : > { %v3021_v26 = vpop.f32.mrf.mxu1 }
 0x396   : > { %v3709_v4 = vpack.c.bf16 %v3020_v40, %v3018_v25  ;;  %v3022_v61 = vadd.f32 %v3021_v26, %v6501_v34 }
 0x397   : > { %v3023_v16 = vpop.f32.mrf.mxu1 }
 0x398   : > { %3176 = vst [vmem:[%s6509_s30 + $0x20] sm:$0xff] %v3709_v4  ;;  %v3024_v37 = vadd.f32 %v3023_v16, %v6504_v18 }
 0x39a   : > { %v3710_v57 = vpack.c.bf16 %v3024_v37, %v3022_v61 }
 0x39c   : > { %3177 = vst [vmem:[%s6509_s30 + $0x28] sm:$0xff] %v3710_v57 }
 0x3a8   : > { %v3027_v62 = vpop.f32.mrf.mxu1 }
 0x3a9   : > { %v3028_v43 = vadd.f32 %v3027_v62, %v6501_v34 }
 0x3aa   : > { %v3029_v6 = vpop.f32.mrf.mxu1 }
 0x3ab   : > { %v3030_v39 = vadd.f32 %v3029_v6, %v6504_v18 }
 0x3ac   : > { %v3031_v42 = vpop.f32.mrf.mxu1 }
 0x3ad   : > { %v3711_v54 = vpack.c.bf16 %v3030_v39, %v3028_v43  ;;  %v3032_v32 = vadd.f32 %v3031_v42, %v6501_v34 }
 0x3ae   : > { %v3033_v5 = vpop.f32.mrf.mxu1 }
 0x3af   : > { %3178 = vst [vmem:[%s6509_s30 + $0x30] sm:$0xff] %v3711_v54  ;;  %v3034_v30 = vadd.f32 %v3033_v5, %v6504_v18 }
 0x3b1   : > { %v3712_v9 = vpack.c.bf16 %v3034_v30, %v3032_v32 }
 0x3b3   : > { %3179 = vst [vmem:[%s6509_s30 + $0x38] sm:$0xff] %v3712_v9 }
 0x3b4   : > { %v3037_v12 = vpop.f32.mrf.mxu1 }
 0x3b5   : > { %v3038_v10 = vadd.f32 %v3037_v12, %v6501_v34 }
 0x3b6   : > { %v3039_v1 = vpop.f32.mrf.mxu1 }
 0x3b7   : > { %v3040_v35 = vadd.f32 %v3039_v1, %v6504_v18 }
 0x3b8   : > { %v3041_v38 = vpop.f32.mrf.mxu1 }
 0x3b9   : > { %v3713_v11 = vpack.c.bf16 %v3040_v35, %v3038_v10  ;;  %v3042_v63 = vadd.f32 %v3041_v38, %v6501_v34 }
 0x3ba   : > { %v3043_v56 = vpop.f32.mrf.mxu1 }
 0x3bb   : > { %3180 = vst [vmem:[%s6509_s30 + $0x40] sm:$0xff] %v3713_v11  ;;  %v3044_v21 = vadd.f32 %v3043_v56, %v6504_v18 }
 0x3bd   : > { %v3714_v45 = vpack.c.bf16 %v3044_v21, %v3042_v63 }
 0x3bf   : > { %3181 = vst [vmem:[%s6509_s30 + $0x48] sm:$0xff] %v3714_v45 }
 0x3c8   : > { %v3047_v36 = vpop.f32.mrf.mxu1 }
 0x3c9   : > { %v3048_v49 = vadd.f32 %v3047_v36, %v6501_v34 }
 0x3ca   : > { %v3049_v3 = vpop.f32.mrf.mxu1 }
 0x3cb   : > { %v3050_v28 = vadd.f32 %v3049_v3, %v6504_v18 }
 0x3cc   : > { %v3051_v17 = vpop.f32.mrf.mxu1 }
 0x3cd   : > { %v3715_v14 = vpack.c.bf16 %v3050_v28, %v3048_v49  ;;  %v3052_v0 = vadd.f32 %v3051_v17, %v6501_v34 }
 0x3ce   : > { %v3053_v19 = vpop.f32.mrf.mxu1 }
 0x3cf   : > { %3182 = vst [vmem:[%s6509_s30 + $0x50] sm:$0xff] %v3715_v14  ;;  %v3054_v22 = vadd.f32 %v3053_v19, %v6504_v18 }
 0x3d1   : > { %v3716_v48 = vpack.c.bf16 %v3054_v22, %v3052_v0 }
 0x3d3   : > { %3183 = vst [vmem:[%s6509_s30 + $0x58] sm:$0xff] %v3716_v48 }
 0x3d9   : > { %v3057_v51 = vpop.f32.mrf.mxu1 }
 0x3da   : > { %v3058_v15 = vadd.f32 %v3057_v51, %v6501_v34 }
 0x3db   : > { %v3059_v8 = vpop.f32.mrf.mxu1 }
 0x3dc   : > { %v3060_v29 = vadd.f32 %v3059_v8, %v6504_v18 }
 0x3dd   : > { %v3061_v7 = vpop.f32.mrf.mxu1 }
 0x3de   : > { %v3717_v47 = vpack.c.bf16 %v3060_v29, %v3058_v15  ;;  %v3062_v52 = vadd.f32 %v3061_v7, %v6501_v34 }
 0x3df   : > { %v3063_v46 = vpop.f32.mrf.mxu1 }
 0x3e0   : > { %3184 = vst [vmem:[%s6509_s30 + $0x60] sm:$0xff] %v3717_v47  ;;  %v3064_v23 = vadd.f32 %v3063_v46, %v6504_v18 }
 0x3e2   : > { %v3718_v13 = vpack.c.bf16 %v3064_v23, %v3062_v52 }
 0x3e4   : > { %3185 = vst [vmem:[%s6509_s30 + $0x68] sm:$0xff] %v3718_v13 }
 0x3e8   : > { %v3067_v44 = vpop.f32.mrf.mxu1 }
 0x3e9   : > { %v3068_v50 = vadd.f32 %v3067_v44, %v6501_v34 }
 0x3ea   : > { %v3069_v27 = vpop.f32.mrf.mxu1 }
 0x3eb   : > { %v3070_v33 = vadd.f32 %v3069_v27, %v6504_v18 }
 0x3ec   : > { %v3071_v55 = vpop.f32.mrf.mxu1 }
 0x3ed   : > { %v3719_v58 = vpack.c.bf16 %v3070_v33, %v3068_v50  ;;  %v3072_v2 = vadd.f32 %v3071_v55, %v6501_v34 }
 0x3ee   : > { %v3073_v60 = vpop.f32.mrf.mxu1 }
 0x3ef   : > { %3186 = vst [vmem:[%s6509_s30 + $0x70] sm:$0xff] %v3719_v58  ;;  %v3074_v53 = vadd.f32 %v3073_v60, %v6504_v18 }
 0x3f1   : > { %v3720_v20 = vpack.c.bf16 %v3074_v53, %v3072_v2 }
 0x3f3   : > { %3187 = vst [vmem:[%s6509_s30 + $0x78] sm:$0xff] %v3720_v20 }
 0x3f4   : > { %4613 = shalt.err (!%p4610_p7)
}
 0x3f5   : > { %s4614_s30 = scalar_lea.hbm %s6599_s11, 2048  ;;  %s4618_s19 = scalar_lea.hbm %s6655_s9, 4096 }
 0x3f6   : > { %p4615_p5 = scmp.ne.s32.totalorder %s6599_s11, %s4614_s30  ;;  %p4619_p3 = scmp.lt.s32.totalorder %s6599_s11, %s6655_s9 }
 0x3f7   : > { %p4620_p12 = scmp.lt.s32.totalorder %s4618_s19, %s4614_s30 }
 0x3f8   : > { %p4616_p8 = pnand %p4615_p5, %p6972_p13 }
 0x3f9   : > { %p4621_p9 = por %p4620_p12, %p4619_p3 }
 0x3fa   : > { %p4617_p11 = pneg %p4616_p8 }
 0x3fc   : > { %p4622_p0 = pnand %p4621_p9, %p4617_p11 }
 0x3fe   : > { %4625 = shalt.err (!%p4622_p0)
}
 0x3ff   : > { %3741 = dma.vmem_to_hbm [thread:$0]  (%p6972_p13), %s6601_s24, 2048, %s6599_s11, %s3189_s13, %s4690_s22, %s4690_s22, %s4691_s27  }
 0x400 PF: > { %s6973_s23 = sld [smem:[#allocation20_spill]]  ;;  %p6976_p10 = scmp.ge.s32.totalorder %s4680_s16, 2 }
 0x401   : > { %s6974_s18 = sld [smem:[#allocation22_spill]] }
 0x406   : > { %s3240_s2 = sand.u32 1, %s6973_s23  }
 0x407   : > { %p6975_p2 = scmp.ne.s32.totalorder %s6974_s18, 0  ;;  %s3241_s4 = scalar_lea.sflag [#allocation4], %s3240_s2 }
 0x409   : > { %p3763_p1 = pnand %p6976_p10, %p6975_p2 }
 0x40b   : > { %p3764_p4 = pneg %p3763_p1 }
 0x40d   : > { %4659 = dma.done.wait (%p3764_p4), %s3241_s4, 2048  }
 0x40e   : > { %4661 = vsyncadd (%p3764_p4), %s3241_s4, 4294965248  ;;  %s3250_s12 = scalar_lea.sflag [#allocation13], %s3240_s2 }
 0x40f   : > { %4663 = dma.done.wait (%p3764_p4), %s3250_s12, 2048  }
 0x410   : > { %4665 = vsyncadd (%p3764_p4), %s3250_s12, 4294965248  ;;  %s6977_s16 = sld [smem:[#allocation23_spill]]  ;;  %s6980_s13 = smov %s4672_s14 }
 0x411   : > { %s6978_s25 = sld [smem:[#allocation21_spill]] }
 0x412   : > { %s6979_s15 = sld [smem:[#allocation24_spill]] }
 0x416   : > { %p31_p13 = scmp.ge.s32.totalorder %s6977_s16, 4  }
 0x417   : > { %s6981_s14 = smov %s6978_s25 }
 0x418   :  { %33 = sbr.rel (!%p31_p13) target bundleno = 15 (0xf), region = 143 }
 0x41d   :  { %3255 = vsyncpa [#allocation3], 1 }
 0x41e   :  { %3257 = vsyncpa [#allocation3 + $0x1], 1 }
 0x41f   :  { %3258 = vsyncpa [#allocation6], 1 }
 0x420   :  { %3260 = vsyncpa [#allocation6 + $0x1], 1 }
 0x421   :  { %3261 = vsyncpa [#allocation9], 1 }
 0x422   :  { %3262 = vsyncpa [#allocation4], 1 }
 0x423   :  { %3264 = vsyncpa [#allocation4 + $0x1], 1 }
 0x424   :  { %3265 = vsyncpa [#allocation13], 1 }
 0x425   :  { %3267 = vsyncpa [#allocation13 + $0x1], 1 }

</bundles_post_ra>
